<compile_context>
chip_gen: v7x
topology: tpu7x:2x2x1
jax: 0.10.0
libtpu: 0.0.40
codegen_flags: <defaults>
</compile_context>

<pallas_src>
import functools

import jax
import jax.numpy as jnp
from jax.experimental import pallas as pl
from jax.experimental.pallas import tpu as pltpu


def _round_up(x, m):
    return ((x + m - 1) // m) * m


def _pick_block_hw(hw, feat, *, vmem_budget_bytes=8 << 20, cap=2048):
    """Largest 128-multiple pixel tile whose (F, T) f32 intermediate fits the
    per-step VMEM/vreg budget (conservative enough for v7x's 64 MiB VMEM)."""
    max_t = max(128, (vmem_budget_bytes // (feat * 4)) // 128 * 128)
    return int(min(_round_up(hw, 128), max_t, cap))


def _multihead_kernel(x_ref, w1t_ref, b1_ref, wh_ref, bh_ref, o_ref, acc_ref, *,
                      hw_total, hw_padded):
    t = pl.program_id(1)

    # ---- init the dense (F, 128) pixel-sum accumulator per batch -------------
    @pl.when(t == 0)
    def _init():
        acc_ref[...] = jnp.zeros_like(acc_ref)

    xb = x_ref[0]                       # (C, T): native layout, C sublanes / T lanes
    T = xb.shape[1]

    # ---- backbone stand-in 1x1 conv on the MXU: (F,C) @ (C,T) -> (F,T) -------
    # K = C is tiny, but the MXU is otherwise idle and is still far faster than
    # a C-length VPU FMA loop; the VPU only does bias+ReLU and the pixel fold.
    g = jax.lax.dot_general(
        w1t_ref[...], xb,
        dimension_numbers=(((1,), (0,)), ((), ())),
        preferred_element_type=jnp.float32)

    # Fused bias + ReLU (b1 is (F, 1) and broadcasts along lanes; no temp).
    g = jnp.maximum(g + b1_ref[...], 0.0)

    # Mask zero-padded pixels (static branch: only emitted when HW was padded).
    if hw_padded != hw_total:
        pix = t * T + jax.lax.broadcasted_iota(jnp.int32, (1, T), 1)
        g = jnp.where(pix < hw_total, g, 0.0)

    # ---- fold the T pixel lanes down to 128 with aligned vreg-column adds ----
    # (pure VPU, no XLU in the steady state); cross-lane reduce is deferred.
    part = g[:, 0:128]
    for j in range(1, T // 128):
        part = part + g[:, j * 128:(j + 1) * 128]
    acc_ref[...] += part

    # ---- finalize once per batch: GAP mean, 3 heads (Linear + Sigmoid) -------
    @pl.when(t == pl.num_programs(1) - 1)
    def _finalize():
        feat = jnp.sum(acc_ref[...], axis=1, keepdims=True) * (1.0 / hw_total)  # (F,1)
        # Dropout(p=0.2) is identity in eval mode; heads packed lane-dense (3, F).
        logits = jax.lax.dot_general(
            wh_ref[...], feat,
            dimension_numbers=(((1,), (0,)), ((), ())),
            preferred_element_type=jnp.float32)                  # (3, 1)
        o_ref[...] = jax.nn.sigmoid(logits + bh_ref[...])[None]  # (1, 3, 1)


def multihead_forward(x_nchw, w1, b1, wh, bh, *, block_hw=None):
    """x_nchw: (B,C,H,W). w1: (C,F), b1: (F,) backbone stand-in 1x1 conv.
    wh: (3,F) stacked head Linear weights (PyTorch layout), bh: (3,).
    Returns (l0, l1, l2), each (B, 1): the EF40 / TR0 / MR0 sigmoid heads."""
    B, C, H, W = x_nchw.shape
    Cw, F = w1.shape
    assert Cw == C and wh.shape == (3, F) and bh.shape == (3,)
    HW = H * W

    x3d = x_nchw.reshape(B, C, HW)            # metadata-only; no HBM transpose

    if block_hw is None:
        block_hw = _pick_block_hw(HW, F)
    assert block_hw % 128 == 0, "pixel tile must be a multiple of 128 lanes"

    hw_padded = _round_up(HW, block_hw)
    if hw_padded != HW:                        # ragged pixel count: pad + mask in kernel
        x3d = jnp.pad(x3d, ((0, 0), (0, 0), (0, hw_padded - HW)))
    n_steps = hw_padded // block_hw

    # Feed the MXU in the input dtype (bf16 stays bf16); accumulate in f32.
    w1t = w1.T.astype(x3d.dtype)               # (F, C): standard (M,K) LHS, resident
    b1c = b1.reshape(F, 1).astype(jnp.float32)
    whc = wh.astype(jnp.float32)               # (3, F): lane-dense resident head weights
    bhc = bh.reshape(3, 1).astype(jnp.float32)

    kernel = functools.partial(_multihead_kernel, hw_total=HW, hw_padded=hw_padded)

    grid_spec = pltpu.PrefetchScalarGridSpec(
        num_scalar_prefetch=0,
        grid=(B, n_steps),                     # (parallel batch, pixel reduction)
        in_specs=[
            pl.BlockSpec((1, C, block_hw), lambda b, t: (b, 0, t)),  # streamed x tiles
            pl.BlockSpec((F, C), lambda b, t: (0, 0)),               # resident w1^T
            pl.BlockSpec((F, 1), lambda b, t: (0, 0)),               # conv bias
            pl.BlockSpec((3, F), lambda b, t: (0, 0)),               # 3 head weights
            pl.BlockSpec((3, 1), lambda b, t: (0, 0)),               # head biases
        ],
        out_specs=pl.BlockSpec((1, 3, 1), lambda b, t: (b, 0, 0)),
        scratch_shapes=[pltpu.VMEM((F, 128), jnp.float32)],          # pixel-sum acc
    )

    out = pl.pallas_call(
        kernel,
        out_shape=jax.ShapeDtypeStruct((B, 3, 1), jnp.float32),
        grid_spec=grid_spec,
        compiler_params=pltpu.CompilerParams(
            dimension_semantics=("parallel", "arbitrary"),
            vmem_limit_bytes=32 << 20,
        ),
    )(x3d, w1t, b1c, whc, bhc)

    out = out.reshape(B, 3)
    return out[:, 0:1], out[:, 1:2], out[:, 2:3]   # EF40, TR0, MR0


def _reference(x_nchw, w1, b1, wh, bh):
    """Pure-JAX reference for the correctness check."""
    B, C, H, W = x_nchw.shape
    x3d = x_nchw.reshape(B, C, H * W).astype(jnp.float32)
    h = jnp.einsum("bcp,cf->bpf", x3d, w1.astype(jnp.float32),
                   precision=jax.lax.Precision.HIGHEST)
    h = jnp.maximum(h + b1[None, None, :], 0.0)
    feat = jnp.mean(h, axis=1)                                 # (B, F)
    logits = jnp.dot(feat, wh.T, precision=jax.lax.Precision.HIGHEST) + bh[None, :]
    out = jax.nn.sigmoid(logits)
    return out[:, 0:1], out[:, 1:2], out[:, 2:3]


if __name__ == "__main__":
    B, C, H, W = 2, 4, 16, 16
    F = 1280  # flattened backbone feature size (matches nn.Linear(1280, 1) heads)

    key = jax.random.PRNGKey(0)
    kx, kw1, kb1, kwh, kbh = jax.random.split(key, 5)

    x = jax.random.normal(kx, (B, C, H, W), dtype=jnp.float32)

    # Backbone stand-in params (1x1 conv C -> 1280).
    w1 = jax.random.normal(kw1, (C, F), dtype=jnp.float32) / (C ** 0.5)
    b1 = 0.01 * jax.random.normal(kb1, (F,), dtype=jnp.float32)

    # Three heads Linear(1280 -> 1), stacked in PyTorch (out, in) layout -> (3, F).
    bound = 1.0 / (F ** 0.5)
    wh = jax.random.uniform(kwh, (3, F), minval=-bound, maxval=bound, dtype=jnp.float32)
    bh = jax.random.uniform(kbh, (3,), minval=-bound, maxval=bound, dtype=jnp.float32)

    # block_hw=128 -> 2 pixel tiles per batch, exercising the streaming accumulator.
    fwd = jax.jit(functools.partial(multihead_forward, block_hw=128))
    l0, l1, l2 = fwd(x, w1, b1, wh, bh)
    jax.block_until_ready((l0, l1, l2))

    r0, r1, r2 = _reference(x, w1, b1, wh, bh)
    assert l0.shape == (B, 1) and l1.shape == (B, 1) and l2.shape == (B, 1)
    # MXU f32 matmuls use multi-pass bf16 accumulation -> looser tol vs pure-f32 ref.
    assert jnp.allclose(l0, r0, atol=1e-3)
    assert jnp.allclose(l1, r1, atol=1e-3)
    assert jnp.allclose(l2, r2, atol=1e-3)

    print("KERNEL_OK")
</pallas_src>

<mosaic_0001>
module attributes {stable_mosaic.version = 11 : i64} {
  func.func @_multihead_kernel(%arg0: i32, %arg1: i32, %arg2: memref<1x4x128xf32, #tpu.memory_space<vmem>>, %arg3: memref<1280x4xf32, #tpu.memory_space<vmem>>, %arg4: memref<1280x1xf32, #tpu.memory_space<vmem>>, %arg5: memref<3x1280xf32, #tpu.memory_space<vmem>>, %arg6: memref<3x1xf32, #tpu.memory_space<vmem>>, %arg7: memref<1x3x1xf32, #tpu.memory_space<vmem>>, %arg8: memref<1280x128xf32, #tpu.memory_space<vmem>>) attributes {dimension_semantics = [#tpu.dimension_semantics<parallel>, #tpu.dimension_semantics<arbitrary>], iteration_bounds = array<i64: 2, 2>, scalar_prefetch = 0 : i64, scratch_operands = 1 : i64, tpu.core_type = #tpu.core_type<tc>, window_params = [{transform_indices = @transform_0, window_bounds = array<i64: 1, 4, 128>}, {pipeline_mode = #tpu.pipeline_mode<synchronous>, transform_indices = @transform_1, window_bounds = array<i64: 1280, 4>}, {pipeline_mode = #tpu.pipeline_mode<synchronous>, transform_indices = @transform_2, window_bounds = array<i64: 1280, 1>}, {pipeline_mode = #tpu.pipeline_mode<synchronous>, transform_indices = @transform_3, window_bounds = array<i64: 3, 1280>}, {pipeline_mode = #tpu.pipeline_mode<synchronous>, transform_indices = @transform_4, window_bounds = array<i64: 3, 1>}, {transform_indices = @transform_5, window_bounds = array<i64: 1, 3, 1>}]} {
    %c0_i32 = arith.constant 0 : i32
    %0 = arith.cmpi eq, %arg1, %c0_i32 : i32
    %1 = arith.extui %0 : i1 to i32
    %c0_i32_0 = arith.constant 0 : i32
    %2 = arith.cmpi ne, %1, %c0_i32_0 : i32
    scf.if %2 {
      %cst_13 = arith.constant 0.000000e+00 : f32
      %18 = vector.broadcast %cst_13 : f32 to vector<1280x128xf32>
      %c0_14 = arith.constant 0 : index
      %c0_15 = arith.constant 0 : index
      %19 = vector.load %arg8[%c0_14, %c0_15] : memref<1280x128xf32, #tpu.memory_space<vmem>>, vector<1280x128xf32>
      tpu.vector_store %arg8[%c0_14, %c0_15], %18 {strides = array<i32>} : memref<1280x128xf32, #tpu.memory_space<vmem>>, vector<1280x128xf32>,
    } else {
    }
    %c0 = arith.constant 0 : index
    %c0_1 = arith.constant 0 : index
    %c0_2 = arith.constant 0 : index
    %3 = vector.load %arg2[%c0, %c0_1, %c0_2] : memref<1x4x128xf32, #tpu.memory_space<vmem>>, vector<1x4x128xf32>
    %4 = vector.shape_cast %3 : vector<1x4x128xf32> to vector<4x128xf32>
    %c0_3 = arith.constant 0 : index
    %c0_4 = arith.constant 0 : index
    %5 = vector.load %arg3[%c0_3, %c0_4] : memref<1280x4xf32, #tpu.memory_space<vmem>>, vector<1280x4xf32>
    %cst = arith.constant dense<0.000000e+00> : vector<1280x128xf32>
    %6 = tpu.matmul %5, %4, %cst {dimension_numbers = #tpu.dot_dimension_numbers<[1], [0], [0], [1], [0, 0, 1, 1], [], []>} : vector<1280x4xf32>, vector<4x128xf32>, vector<1280x128xf32> -> vector<1280x128xf32>
    %c0_5 = arith.constant 0 : index
    %c0_6 = arith.constant 0 : index
    %7 = vector.load %arg4[%c0_5, %c0_6] : memref<1280x1xf32, #tpu.memory_space<vmem>>, vector<1280x1xf32>
    %8 = vector.broadcast %7 : vector<1280x1xf32> to vector<1280x128xf32>
    %9 = arith.addf %6, %8 : vector<1280x128xf32>
    %cst_7 = arith.constant 0.000000e+00 : f32
    %10 = vector.broadcast %cst_7 : f32 to vector<1280x128xf32>
    %11 = arith.maximumf %9, %10 : vector<1280x128xf32>
    %c0_8 = arith.constant 0 : index
    %c0_9 = arith.constant 0 : index
    %12 = vector.load %arg8[%c0_8, %c0_9] : memref<1280x128xf32, #tpu.memory_space<vmem>>, vector<1280x128xf32>
    %13 = arith.addf %12, %11 : vector<1280x128xf32>
    %c0_10 = arith.constant 0 : index
    %c0_11 = arith.constant 0 : index
    %14 = vector.load %arg8[%c0_10, %c0_11] : memref<1280x128xf32, #tpu.memory_space<vmem>>, vector<1280x128xf32>
    tpu.vector_store %arg8[%c0_10, %c0_11], %13 {strides = array<i32>} : memref<1280x128xf32, #tpu.memory_space<vmem>>, vector<1280x128xf32>,
    %c1_i32 = arith.constant 1 : i32
    %15 = arith.cmpi eq, %arg1, %c1_i32 : i32
    %16 = arith.extui %15 : i1 to i32
    %c0_i32_12 = arith.constant 0 : i32
    %17 = arith.cmpi ne, %16, %c0_i32_12 : i32
    scf.if %17 {
      %c0_13 = arith.constant 0 : index
      %c0_14 = arith.constant 0 : index
      %18 = vector.load %arg8[%c0_13, %c0_14] : memref<1280x128xf32, #tpu.memory_space<vmem>>, vector<1280x128xf32>
      %cst_15 = arith.constant dense<0.000000e+00> : vector<1280xf32>
      %19 = vector.multi_reduction <add>, %18, %cst_15 [1] : vector<1280x128xf32> to vector<1280xf32>
      %20 = vector.shape_cast %19 : vector<1280xf32> to vector<1280x1xf32>
      %cst_16 = arith.constant 3.906250e-03 : f32
      %21 = vector.broadcast %cst_16 : f32 to vector<1280x1xf32>
      %22 = arith.mulf %20, %21 : vector<1280x1xf32>
      %c0_17 = arith.constant 0 : index
      %c0_18 = arith.constant 0 : index
      %23 = vector.load %arg5[%c0_17, %c0_18] : memref<3x1280xf32, #tpu.memory_space<vmem>>, vector<3x1280xf32>
      %cst_19 = arith.constant dense<0.000000e+00> : vector<3x1xf32>
      %24 = tpu.matmul %23, %22, %cst_19 {dimension_numbers = #tpu.dot_dimension_numbers<[1], [0], [0], [1], [0, 0, 1, 1], [], []>} : vector<3x1280xf32>, vector<1280x1xf32>, vector<3x1xf32> -> vector<3x1xf32>
      %c0_20 = arith.constant 0 : index
      %c0_21 = arith.constant 0 : index
      %25 = vector.load %arg6[%c0_20, %c0_21] : memref<3x1xf32, #tpu.memory_space<vmem>>, vector<3x1xf32>
      %26 = arith.addf %24, %25 : vector<3x1xf32>
      %27 = arith.negf %26 : vector<3x1xf32>
      %28 = math.exp %27 : vector<3x1xf32>
      %cst_22 = arith.constant 1.000000e+00 : f32
      %29 = vector.broadcast %cst_22 : f32 to vector<3x1xf32>
      %30 = arith.addf %29, %28 : vector<3x1xf32>
      %31 = arith.divf %29, %30 : vector<3x1xf32>
      %32 = vector.shape_cast %31 : vector<3x1xf32> to vector<1x3x1xf32>
      %c0_23 = arith.constant 0 : index
      %c0_24 = arith.constant 0 : index
      %c0_25 = arith.constant 0 : index
      %33 = vector.load %arg7[%c0_23, %c0_24, %c0_25] : memref<1x3x1xf32, #tpu.memory_space<vmem>>, vector<1x3x1xf32>
      tpu.vector_store %arg7[%c0_23, %c0_24, %c0_25], %32 {strides = array<i32>} : memref<1x3x1xf32, #tpu.memory_space<vmem>>, vector<1x3x1xf32>,
    } else {
    }
    return
  }
  func.func @transform_0(%arg0: i32, %arg1: i32) -> (i32, i32, i32) {
    %c0_i32 = arith.constant 0 : i32
    %c0_i32_0 = arith.constant 0 : i32
    return %arg0, %c0_i32, %arg1 : i32, i32, i32
  }
  func.func @transform_1(%arg0: i32, %arg1: i32) -> (i32, i32) {
    %c0_i32 = arith.constant 0 : i32
    %c0_i32_0 = arith.constant 0 : i32
    %c0_i32_1 = arith.constant 0 : i32
    return %c0_i32, %c0_i32_0 : i32, i32
  }
  func.func @transform_2(%arg0: i32, %arg1: i32) -> (i32, i32) {
    %c0_i32 = arith.constant 0 : i32
    %c0_i32_0 = arith.constant 0 : i32
    %c0_i32_1 = arith.constant 0 : i32
    return %c0_i32, %c0_i32_0 : i32, i32
  }
  func.func @transform_3(%arg0: i32, %arg1: i32) -> (i32, i32) {
    %c0_i32 = arith.constant 0 : i32
    %c0_i32_0 = arith.constant 0 : i32
    %c0_i32_1 = arith.constant 0 : i32
    return %c0_i32, %c0_i32_0 : i32, i32
  }
  func.func @transform_4(%arg0: i32, %arg1: i32) -> (i32, i32) {
    %c0_i32 = arith.constant 0 : i32
    %c0_i32_0 = arith.constant 0 : i32
    %c0_i32_1 = arith.constant 0 : i32
    return %c0_i32, %c0_i32_0 : i32, i32
  }
  func.func @transform_5(%arg0: i32, %arg1: i32) -> (i32, i32, i32) {
    %c0_i32 = arith.constant 0 : i32
    %c0_i32_0 = arith.constant 0 : i32
    %c0_i32_1 = arith.constant 0 : i32
    return %arg0, %c0_i32, %c0_i32_0 : i32, i32, i32
  }
}

</mosaic_0001>

<bundles_post_ra>
// kernel: multihead_forward.1
= control target key start
LH: loop header
LB: loop body
LE: loop exit
PB: predicated region body
PF: predicated region fallthrough
CT: control target
= control target key end

     0   :  { %s5653_s18 = smov 0   ;;  %s5655_s19 = smov 0   ;;  %s7523_s0 = inlined_call_operand.vmem [shape: f32[2,4,256], index: 0, kind: input, shape index: {}]   ;;  %s7524_s1 = inlined_call_operand.vmem [shape: f32[1280,4], index: 1, kind: input, shape index: {}]   ;;  %s7525_s2 = inlined_call_operand.vmem [shape: f32[1280,1], index: 2, kind: input, shape index: {}]   ;;  %s7526_s3 = inlined_call_operand.vmem [shape: f32[3,1280], index: 3, kind: input, shape index: {}]   ;;  %s7527_s4 = inlined_call_operand.vmem [shape: f32[3,1], index: 4, kind: input, shape index: {}]   ;;  %s7528_s5 = inlined_call_operand.vmem [shape: f32[2,3,1], index: 5, kind: output, shape index: {}]  }
   0x1   :  { %s5657_s20 = smov 0   ;;  %s5659_s21 = smov 0  }
   0x2   :  { %s5661_s22 = smov 0  }
   0x3 LB: > { %s24_s23 = sadd.s32 1, %s5611_s20  ;;  %s27_s24 = sadd.s32 1, %s5615_s21  ;;  %s5619_s22 = sphi %s5661_s22, %s15_s22   ;;  %s5615_s21 = sphi %s5659_s21, %s7592_s21   ;;  %s5611_s20 = sphi %s5657_s20, %s7591_s20   ;;  %s5607_s19 = sphi %s5655_s19, %s7590_s19   ;;  %s5603_s18 = sphi %s5653_s18, %s7589_s18  }
   0x4   : > { %p25_p0 = scmp.ge.s32.totalorder %s24_s23, 2  ;;  %p4618_p1 = scmp.ge.s32.totalorder %s5619_s22, 1 }
   0x5   : > { %p204_p2 = scmp.lt.s32.totalorder %s5619_s22, 5 }
   0x6   : > { %s7594_s23 = smov (%p25_p0, %s24_s23), 0  ;;  %s7596_s24 = smov (!%p25_p0, %s27_s24), %s5615_s21 }
   0x7   : > { %p205_p3 = pnand %p4618_p1, %p204_p2  ;;  %p29_p4 = scmp.ge.s32.totalorder %s7596_s24, 2 }
   0x9   : > { %s7598_s24 = smov (%p29_p4, %s7596_s24), 0  ;;  %208 = sbr.rel (%p205_p3) target bundleno = 1252 (0x4e4), region = 40 }
  0x10   : > { %p234_p5 = scmp.lt.s32.totalorder %s5607_s19, 1  ;;  %p236_p6 = scmp.lt.s32.totalorder %s5603_s18, 1 }
  0x11   : > { %p4622_p7 = scmp.ne.s32.totalorder %s5603_s18, 0 }
  0x12   : > { %s7600_s19 = smov (!%p234_p5, %s5607_s19), 1  ;;  %v5621_v0 = vmov (!%p4622_p7), 0.0  }
  0x13   : > { %s237_s25 = scalar_select %p236_p6, %s5603_s18, 1 }
  0x14   : > { %s4619_s26 = sshll.u32 %s7600_s19, 1  ;;  %s4621_s27 = sshll.u32 %s7600_s19, 2  ;;  %250 = vst [vmem:[#allocation2] sm:$0xff] (!%p4622_p7), %v5621_v0  ;;  %251 = vst [vmem:[#allocation2 + $0x8] sm:$0xff] (!%p4622_p7), %v5621_v0 }
  0x15   : > { %s239_s28 = sadd.s32 %s4619_s26, %s237_s25  ;;  %s5690_s6 = scalar_lea.vmem %s7528_s5, %s4621_s27  ;;  %252 = vst [vmem:[#allocation2 + $0x10] sm:$0xff] (!%p4622_p7), %v5621_v0  ;;  %253 = vst [vmem:[#allocation2 + $0x18] sm:$0xff] (!%p4622_p7), %v5621_v0 }
  0x16   : > { %s4620_s7 = sshll.u32 %s239_s28, 2  ;;  %249 = sbr.rel (%p4622_p7) target bundleno = 100 (0x64), region = 44  ;;  %254 = vst [vmem:[#allocation2 + $0x20] sm:$0xff] (!%p4622_p7), %v5621_v0  ;;  %255 = vst [vmem:[#allocation2 + $0x28] sm:$0xff] (!%p4622_p7), %v5621_v0 }
  0x17   : > { %s5695_s10 = scalar_lea.vmem %s7523_s0, %s4620_s7  ;;  %256 = vst [vmem:[#allocation2 + $0x30] sm:$0xff] (!%p4622_p7), %v5621_v0  ;;  %257 = vst [vmem:[#allocation2 + $0x38] sm:$0xff] (!%p4622_p7), %v5621_v0 }
  0x18   : > { %258 = vst [vmem:[#allocation2 + $0x40] sm:$0xff] (!%p4622_p7), %v5621_v0  ;;  %259 = vst [vmem:[#allocation2 + $0x48] sm:$0xff] (!%p4622_p7), %v5621_v0 }
  0x19   : > { %260 = vst [vmem:[#allocation2 + $0x50] sm:$0xff] (!%p4622_p7), %v5621_v0  ;;  %261 = vst [vmem:[#allocation2 + $0x58] sm:$0xff] (!%p4622_p7), %v5621_v0 }
  0x1a   : > { %262 = vst [vmem:[#allocation2 + $0x60] sm:$0xff] (!%p4622_p7), %v5621_v0  ;;  %263 = vst [vmem:[#allocation2 + $0x68] sm:$0xff] (!%p4622_p7), %v5621_v0 }
  0x1b   : > { %264 = vst [vmem:[#allocation2 + $0x70] sm:$0xff] (!%p4622_p7), %v5621_v0  ;;  %265 = vst [vmem:[#allocation2 + $0x78] sm:$0xff] (!%p4622_p7), %v5621_v0 }
  0x1c   : > { %266 = vst [vmem:[#allocation2 + $0x80] sm:$0xff] (!%p4622_p7), %v5621_v0  ;;  %267 = vst [vmem:[#allocation2 + $0x88] sm:$0xff] (!%p4622_p7), %v5621_v0 }
  0x1d   : > { %268 = vst [vmem:[#allocation2 + $0x90] sm:$0xff] %v5621_v0  ;;  %269 = vst [vmem:[#allocation2 + $0x98] sm:$0xff] %v5621_v0 }
  0x1e   : > { %270 = vst [vmem:[#allocation2 + $0xa0] sm:$0xff] %v5621_v0  ;;  %271 = vst [vmem:[#allocation2 + $0xa8] sm:$0xff] %v5621_v0 }
  0x1f   : > { %272 = vst [vmem:[#allocation2 + $0xb0] sm:$0xff] %v5621_v0  ;;  %273 = vst [vmem:[#allocation2 + $0xb8] sm:$0xff] %v5621_v0 }
  0x20   : > { %274 = vst [vmem:[#allocation2 + $0xc0] sm:$0xff] %v5621_v0  ;;  %275 = vst [vmem:[#allocation2 + $0xc8] sm:$0xff] %v5621_v0 }
  0x21   : > { %276 = vst [vmem:[#allocation2 + $0xd0] sm:$0xff] %v5621_v0  ;;  %277 = vst [vmem:[#allocation2 + $0xd8] sm:$0xff] %v5621_v0 }
  0x22   : > { %278 = vst [vmem:[#allocation2 + $0xe0] sm:$0xff] %v5621_v0  ;;  %279 = vst [vmem:[#allocation2 + $0xe8] sm:$0xff] %v5621_v0 }
  0x23   : > { %280 = vst [vmem:[#allocation2 + $0xf0] sm:$0xff] %v5621_v0  ;;  %281 = vst [vmem:[#allocation2 + $0xf8] sm:$0xff] %v5621_v0 }
  0x24   : > { %282 = vst [vmem:[#allocation2 + $0x100] sm:$0xff] %v5621_v0  ;;  %283 = vst [vmem:[#allocation2 + $0x108] sm:$0xff] %v5621_v0 }
  0x25   : > { %284 = vst [vmem:[#allocation2 + $0x110] sm:$0xff] %v5621_v0  ;;  %285 = vst [vmem:[#allocation2 + $0x118] sm:$0xff] %v5621_v0 }
  0x26   : > { %286 = vst [vmem:[#allocation2 + $0x120] sm:$0xff] %v5621_v0  ;;  %287 = vst [vmem:[#allocation2 + $0x128] sm:$0xff] %v5621_v0 }
  0x27   : > { %288 = vst [vmem:[#allocation2 + $0x130] sm:$0xff] %v5621_v0  ;;  %289 = vst [vmem:[#allocation2 + $0x138] sm:$0xff] %v5621_v0 }
  0x28   : > { %290 = vst [vmem:[#allocation2 + $0x140] sm:$0xff] %v5621_v0  ;;  %291 = vst [vmem:[#allocation2 + $0x148] sm:$0xff] %v5621_v0 }
  0x29   : > { %292 = vst [vmem:[#allocation2 + $0x150] sm:$0xff] %v5621_v0  ;;  %293 = vst [vmem:[#allocation2 + $0x158] sm:$0xff] %v5621_v0 }
  0x2a   : > { %294 = vst [vmem:[#allocation2 + $0x160] sm:$0xff] %v5621_v0  ;;  %295 = vst [vmem:[#allocation2 + $0x168] sm:$0xff] %v5621_v0 }
  0x2b   : > { %296 = vst [vmem:[#allocation2 + $0x170] sm:$0xff] %v5621_v0  ;;  %297 = vst [vmem:[#allocation2 + $0x178] sm:$0xff] %v5621_v0 }
  0x2c   : > { %298 = vst [vmem:[#allocation2 + $0x180] sm:$0xff] %v5621_v0  ;;  %299 = vst [vmem:[#allocation2 + $0x188] sm:$0xff] %v5621_v0 }
  0x2d   : > { %300 = vst [vmem:[#allocation2 + $0x190] sm:$0xff] %v5621_v0  ;;  %301 = vst [vmem:[#allocation2 + $0x198] sm:$0xff] %v5621_v0 }
  0x2e   : > { %302 = vst [vmem:[#allocation2 + $0x1a0] sm:$0xff] %v5621_v0  ;;  %303 = vst [vmem:[#allocation2 + $0x1a8] sm:$0xff] %v5621_v0 }
  0x2f   : > { %304 = vst [vmem:[#allocation2 + $0x1b0] sm:$0xff] %v5621_v0  ;;  %305 = vst [vmem:[#allocation2 + $0x1b8] sm:$0xff] %v5621_v0 }
  0x30   : > { %306 = vst [vmem:[#allocation2 + $0x1c0] sm:$0xff] %v5621_v0  ;;  %307 = vst [vmem:[#allocation2 + $0x1c8] sm:$0xff] %v5621_v0 }
  0x31   : > { %308 = vst [vmem:[#allocation2 + $0x1d0] sm:$0xff] %v5621_v0  ;;  %309 = vst [vmem:[#allocation2 + $0x1d8] sm:$0xff] %v5621_v0 }
  0x32   : > { %310 = vst [vmem:[#allocation2 + $0x1e0] sm:$0xff] %v5621_v0  ;;  %311 = vst [vmem:[#allocation2 + $0x1e8] sm:$0xff] %v5621_v0 }
  0x33   : > { %312 = vst [vmem:[#allocation2 + $0x1f0] sm:$0xff] %v5621_v0  ;;  %313 = vst [vmem:[#allocation2 + $0x1f8] sm:$0xff] %v5621_v0 }
  0x34   : > { %314 = vst [vmem:[#allocation2 + $0x200] sm:$0xff] %v5621_v0  ;;  %315 = vst [vmem:[#allocation2 + $0x208] sm:$0xff] %v5621_v0 }
  0x35   : > { %316 = vst [vmem:[#allocation2 + $0x210] sm:$0xff] %v5621_v0  ;;  %317 = vst [vmem:[#allocation2 + $0x218] sm:$0xff] %v5621_v0 }
  0x36   : > { %318 = vst [vmem:[#allocation2 + $0x220] sm:$0xff] %v5621_v0  ;;  %319 = vst [vmem:[#allocation2 + $0x228] sm:$0xff] %v5621_v0 }
  0x37   : > { %320 = vst [vmem:[#allocation2 + $0x230] sm:$0xff] %v5621_v0  ;;  %321 = vst [vmem:[#allocation2 + $0x238] sm:$0xff] %v5621_v0 }
  0x38   : > { %322 = vst [vmem:[#allocation2 + $0x240] sm:$0xff] %v5621_v0  ;;  %323 = vst [vmem:[#allocation2 + $0x248] sm:$0xff] %v5621_v0 }
  0x39   : > { %324 = vst [vmem:[#allocation2 + $0x250] sm:$0xff] %v5621_v0  ;;  %325 = vst [vmem:[#allocation2 + $0x258] sm:$0xff] %v5621_v0 }
  0x3a   : > { %326 = vst [vmem:[#allocation2 + $0x260] sm:$0xff] %v5621_v0  ;;  %327 = vst [vmem:[#allocation2 + $0x268] sm:$0xff] %v5621_v0 }
  0x3b   : > { %328 = vst [vmem:[#allocation2 + $0x270] sm:$0xff] %v5621_v0  ;;  %329 = vst [vmem:[#allocation2 + $0x278] sm:$0xff] %v5621_v0 }
  0x3c   : > { %330 = vst [vmem:[#allocation2 + $0x280] sm:$0xff] %v5621_v0  ;;  %331 = vst [vmem:[#allocation2 + $0x288] sm:$0xff] %v5621_v0 }
  0x3d   : > { %332 = vst [vmem:[#allocation2 + $0x290] sm:$0xff] %v5621_v0  ;;  %333 = vst [vmem:[#allocation2 + $0x298] sm:$0xff] %v5621_v0 }
  0x3e   : > { %334 = vst [vmem:[#allocation2 + $0x2a0] sm:$0xff] %v5621_v0  ;;  %335 = vst [vmem:[#allocation2 + $0x2a8] sm:$0xff] %v5621_v0 }
  0x3f   : > { %336 = vst [vmem:[#allocation2 + $0x2b0] sm:$0xff] %v5621_v0  ;;  %337 = vst [vmem:[#allocation2 + $0x2b8] sm:$0xff] %v5621_v0 }
  0x40   : > { %338 = vst [vmem:[#allocation2 + $0x2c0] sm:$0xff] %v5621_v0  ;;  %339 = vst [vmem:[#allocation2 + $0x2c8] sm:$0xff] %v5621_v0 }
  0x41   : > { %340 = vst [vmem:[#allocation2 + $0x2d0] sm:$0xff] %v5621_v0  ;;  %341 = vst [vmem:[#allocation2 + $0x2d8] sm:$0xff] %v5621_v0 }
  0x42   : > { %342 = vst [vmem:[#allocation2 + $0x2e0] sm:$0xff] %v5621_v0  ;;  %343 = vst [vmem:[#allocation2 + $0x2e8] sm:$0xff] %v5621_v0 }
  0x43   : > { %344 = vst [vmem:[#allocation2 + $0x2f0] sm:$0xff] %v5621_v0  ;;  %345 = vst [vmem:[#allocation2 + $0x2f8] sm:$0xff] %v5621_v0 }
  0x44   : > { %346 = vst [vmem:[#allocation2 + $0x300] sm:$0xff] %v5621_v0  ;;  %347 = vst [vmem:[#allocation2 + $0x308] sm:$0xff] %v5621_v0 }
  0x45   : > { %348 = vst [vmem:[#allocation2 + $0x310] sm:$0xff] %v5621_v0  ;;  %349 = vst [vmem:[#allocation2 + $0x318] sm:$0xff] %v5621_v0 }
  0x46   : > { %350 = vst [vmem:[#allocation2 + $0x320] sm:$0xff] %v5621_v0  ;;  %351 = vst [vmem:[#allocation2 + $0x328] sm:$0xff] %v5621_v0 }
  0x47   : > { %352 = vst [vmem:[#allocation2 + $0x330] sm:$0xff] %v5621_v0  ;;  %353 = vst [vmem:[#allocation2 + $0x338] sm:$0xff] %v5621_v0 }
  0x48   : > { %354 = vst [vmem:[#allocation2 + $0x340] sm:$0xff] %v5621_v0  ;;  %355 = vst [vmem:[#allocation2 + $0x348] sm:$0xff] %v5621_v0 }
  0x49   : > { %356 = vst [vmem:[#allocation2 + $0x350] sm:$0xff] %v5621_v0  ;;  %357 = vst [vmem:[#allocation2 + $0x358] sm:$0xff] %v5621_v0 }
  0x4a   : > { %358 = vst [vmem:[#allocation2 + $0x360] sm:$0xff] %v5621_v0  ;;  %359 = vst [vmem:[#allocation2 + $0x368] sm:$0xff] %v5621_v0 }
  0x4b   : > { %360 = vst [vmem:[#allocation2 + $0x370] sm:$0xff] %v5621_v0  ;;  %361 = vst [vmem:[#allocation2 + $0x378] sm:$0xff] %v5621_v0 }
  0x4c   : > { %362 = vst [vmem:[#allocation2 + $0x380] sm:$0xff] %v5621_v0  ;;  %363 = vst [vmem:[#allocation2 + $0x388] sm:$0xff] %v5621_v0 }
  0x4d   : > { %364 = vst [vmem:[#allocation2 + $0x390] sm:$0xff] %v5621_v0  ;;  %365 = vst [vmem:[#allocation2 + $0x398] sm:$0xff] %v5621_v0 }
  0x4e   : > { %366 = vst [vmem:[#allocation2 + $0x3a0] sm:$0xff] %v5621_v0  ;;  %367 = vst [vmem:[#allocation2 + $0x3a8] sm:$0xff] %v5621_v0 }
  0x4f   : > { %368 = vst [vmem:[#allocation2 + $0x3b0] sm:$0xff] %v5621_v0  ;;  %369 = vst [vmem:[#allocation2 + $0x3b8] sm:$0xff] %v5621_v0 }
  0x50   : > { %370 = vst [vmem:[#allocation2 + $0x3c0] sm:$0xff] %v5621_v0  ;;  %371 = vst [vmem:[#allocation2 + $0x3c8] sm:$0xff] %v5621_v0 }
  0x51   : > { %372 = vst [vmem:[#allocation2 + $0x3d0] sm:$0xff] %v5621_v0  ;;  %373 = vst [vmem:[#allocation2 + $0x3d8] sm:$0xff] %v5621_v0 }
  0x52   : > { %374 = vst [vmem:[#allocation2 + $0x3e0] sm:$0xff] %v5621_v0  ;;  %375 = vst [vmem:[#allocation2 + $0x3e8] sm:$0xff] %v5621_v0 }
  0x53   : > { %376 = vst [vmem:[#allocation2 + $0x3f0] sm:$0xff] %v5621_v0  ;;  %377 = vst [vmem:[#allocation2 + $0x3f8] sm:$0xff] %v5621_v0 }
  0x54   : > { %378 = vst [vmem:[#allocation2 + $0x400] sm:$0xff] %v5621_v0  ;;  %379 = vst [vmem:[#allocation2 + $0x408] sm:$0xff] %v5621_v0 }
  0x55   : > { %380 = vst [vmem:[#allocation2 + $0x410] sm:$0xff] %v5621_v0  ;;  %381 = vst [vmem:[#allocation2 + $0x418] sm:$0xff] %v5621_v0 }
  0x56   : > { %382 = vst [vmem:[#allocation2 + $0x420] sm:$0xff] %v5621_v0  ;;  %383 = vst [vmem:[#allocation2 + $0x428] sm:$0xff] %v5621_v0 }
  0x57   : > { %384 = vst [vmem:[#allocation2 + $0x430] sm:$0xff] %v5621_v0  ;;  %385 = vst [vmem:[#allocation2 + $0x438] sm:$0xff] %v5621_v0 }
  0x58   : > { %386 = vst [vmem:[#allocation2 + $0x440] sm:$0xff] %v5621_v0  ;;  %387 = vst [vmem:[#allocation2 + $0x448] sm:$0xff] %v5621_v0 }
  0x59   : > { %388 = vst [vmem:[#allocation2 + $0x450] sm:$0xff] %v5621_v0  ;;  %389 = vst [vmem:[#allocation2 + $0x458] sm:$0xff] %v5621_v0 }
  0x5a   : > { %390 = vst [vmem:[#allocation2 + $0x460] sm:$0xff] %v5621_v0  ;;  %391 = vst [vmem:[#allocation2 + $0x468] sm:$0xff] %v5621_v0 }
  0x5b   : > { %392 = vst [vmem:[#allocation2 + $0x470] sm:$0xff] %v5621_v0  ;;  %393 = vst [vmem:[#allocation2 + $0x478] sm:$0xff] %v5621_v0 }
  0x5c   : > { %394 = vst [vmem:[#allocation2 + $0x480] sm:$0xff] %v5621_v0  ;;  %395 = vst [vmem:[#allocation2 + $0x488] sm:$0xff] %v5621_v0 }
  0x5d   : > { %396 = vst [vmem:[#allocation2 + $0x490] sm:$0xff] %v5621_v0  ;;  %397 = vst [vmem:[#allocation2 + $0x498] sm:$0xff] %v5621_v0 }
  0x5e   : > { %398 = vst [vmem:[#allocation2 + $0x4a0] sm:$0xff] %v5621_v0  ;;  %399 = vst [vmem:[#allocation2 + $0x4a8] sm:$0xff] %v5621_v0 }
  0x5f   : > { %400 = vst [vmem:[#allocation2 + $0x4b0] sm:$0xff] %v5621_v0  ;;  %401 = vst [vmem:[#allocation2 + $0x4b8] sm:$0xff] %v5621_v0 }
  0x60   : > { %402 = vst [vmem:[#allocation2 + $0x4c0] sm:$0xff] %v5621_v0  ;;  %403 = vst [vmem:[#allocation2 + $0x4c8] sm:$0xff] %v5621_v0 }
  0x61   : > { %404 = vst [vmem:[#allocation2 + $0x4d0] sm:$0xff] %v5621_v0  ;;  %405 = vst [vmem:[#allocation2 + $0x4d8] sm:$0xff] %v5621_v0 }
  0x62   : > { %406 = vst [vmem:[#allocation2 + $0x4e0] sm:$0xff] %v5621_v0  ;;  %407 = vst [vmem:[#allocation2 + $0x4e8] sm:$0xff] %v5621_v0 }
  0x63   : > { %408 = vst [vmem:[#allocation2 + $0x4f0] sm:$0xff] %v5621_v0  ;;  %409 = vst [vmem:[#allocation2 + $0x4f8] sm:$0xff] %v5621_v0 }
  0x64 PF: > { %v410_v1 = vld [vmem:[%s5695_s10] sm:$0xf]  ;;  %vm2012_vm0 = vcmask 1043456   ;;  %v573_v2 = vld [vmem:[%s7525_s2 + $0x10] sm:$0xff]  ;;  %v5622_v4 = vmov 0   ;;  %vm1531_vm1 = vcmask 31744  }
  0x65   : > { %v571_v3 = vld [vmem:[%s7525_s2] sm:$0xff]  ;;  %5571 = vset.pattern.permute.xlu1 %v5622_v4  ;;  %5570 = vset.pattern.permute.xlu0 %v5622_v4  ;;  %v412_v6 = vld [vmem:[%s7524_s1 + $0x8] sm:$0xff]  ;;  %v574_v7 = vld [vmem:[%s7525_s2 + $0x18] sm:$0xff]  ;;  %p4784_p8 = scmp.ne.s32.totalorder %s5603_s18, 1 }
  0x66   : > { %v411_v5 = vld [vmem:[%s7524_s1] sm:$0xff]  ;;  %5124 = vmatprep.subr.msk.mxu0 %vm2012_vm0, %v410_v1  ;;  %743 = vperm.xlu1 %5571, %v573_v2   ;;  %v413_v8 = vld [vmem:[%s7524_s1 + $0x10] sm:$0xff]  ;;  %v572_v9 = vld [vmem:[%s7525_s2 + $0x8] sm:$0xff]  ;;  %vm4542_vm2 = vcmask (!%p4784_p8), 2048  }
  0x67   : > { %733 = vperm.xlu0 %5570, %v571_v3   ;;  %5125 = vmatpush3.msk.msra.mxu0 %vm2012_vm0, %v410_v1  ;;  %v414_v10 = vld [vmem:[%s7524_s1 + $0x18] sm:$0xff]  ;;  %v576_v11 = vld [vmem:[%s7525_s2 + $0x28] sm:$0xff]  ;;  %v415_v12 = vld [vmem:[%s7524_s1 + $0x20] sm:$0xff] }
  0x68   : > { %5126 = vmatprep.mubr.msk.f32.mxu0 %vm1531_vm1, %v411_v5  ;;  %5526 = vmatprep.subr.msk.mxu1 %vm2012_vm0, %v410_v1  ;;  %v575_v13 = vld [vmem:[%s7525_s2 + $0x20] sm:$0xff]  ;;  %v416_v14 = vld [vmem:[%s7524_s1 + $0x28] sm:$0xff]  ;;  %v578_v15 = vld [vmem:[%s7525_s2 + $0x38] sm:$0xff] }
  0x69   : > { %5127 = vmatmul.mubr.msk.f32.vlgmr.msra.gmra.mrb[0].mxu0 %vm1531_vm1, %v412_v6  ;;  %5527 = vmatpush3.msk.msra.mxu1 %vm2012_vm0, %v410_v1  ;;  %v417_v16 = vld [vmem:[%s7524_s1 + $0x30] sm:$0xff]  ;;  %v418_v18 = vld [vmem:[%s7524_s1 + $0x38] sm:$0xff]  ;;  %v580_v19 = vld [vmem:[%s7525_s2 + $0x48] sm:$0xff] }
  0x6a   : > { %748 = vperm.xlu1 %5571, %v574_v7   ;;  %5129 = vmatprep.mubr.msk.f32.mxu0 %vm1531_vm1, %v413_v8  ;;  %v577_v17 = vld [vmem:[%s7525_s2 + $0x30] sm:$0xff]  ;;  %v419_v20 = vld [vmem:[%s7524_s1 + $0x40] sm:$0xff]  ;;  %v420_v22 = vld [vmem:[%s7524_s1 + $0x48] sm:$0xff] }
  0x6b   : > { %738 = vperm.xlu0 %5570, %v572_v9   ;;  %v579_v21 = vld [vmem:[%s7525_s2 + $0x40] sm:$0xff]  ;;  %v582_v23 = vld [vmem:[%s7525_s2 + $0x58] sm:$0xff]  ;;  %v421_v24 = vld [vmem:[%s7524_s1 + $0x50] sm:$0xff] }
  0x6c   : > { %v581_v25 = vld [vmem:[%s7525_s2 + $0x50] sm:$0xff]  ;;  %v422_v26 = vld [vmem:[%s7524_s1 + $0x58] sm:$0xff]  ;;  %v584_v27 = vld [vmem:[%s7525_s2 + $0x68] sm:$0xff] }
  0x6d   : > { %5130 = vmatmul.mubr.msk.f32.gmra.mrb[2].mxu0 %vm1531_vm1, %v414_v10  ;;  %v423_v28 = vld [vmem:[%s7524_s1 + $0x60] sm:$0xff]  ;;  %v424_v31 = vld [vmem:[%s7524_s1 + $0x68] sm:$0xff]  ;;  %v586_v33 = vld [vmem:[%s7525_s2 + $0x78] sm:$0xff] }
  0x6e   : > { %758 = vperm.xlu1 %5571, %v576_v11   ;;  %5132 = vmatprep.mubr.msk.f32.mxu0 %vm1531_vm1, %v415_v12  ;;  %v583_v29 = vld [vmem:[%s7525_s2 + $0x60] sm:$0xff]  ;;  %v492_v32 = vld [vmem:[%s7524_s1 + $0x288] sm:$0xff]  ;;  %v425_v34 = vld [vmem:[%s7524_s1 + $0x70] sm:$0xff] }
  0x6f   : > { %753 = vperm.xlu0 %5570, %v575_v13   ;;  %v491_v30 = vld [vmem:[%s7524_s1 + $0x280] sm:$0xff]  ;;  %v493_v35 = vld [vmem:[%s7524_s1 + $0x290] sm:$0xff]  ;;  %v494_v37 = vld [vmem:[%s7524_s1 + $0x298] sm:$0xff] }
  0x70   : > { %5246 = vmatprep.mubr.msk.f32.mxu1 %vm1531_vm1, %v491_v30  ;;  %v585_v36 = vld [vmem:[%s7525_s2 + $0x70] sm:$0xff]  ;;  %v426_v38 = vld [vmem:[%s7524_s1 + $0x78] sm:$0xff]  ;;  %v495_v39 = vld [vmem:[%s7524_s1 + $0x2a0] sm:$0xff] }
  0x71   : > { %5133 = vmatmul.mubr.msk.f32.gmra.mrb[4].mxu0 %vm1531_vm1, %v416_v14  ;;  %5247 = vmatmul.mubr.msk.f32.vlgmr.msra.gmra.mrb[0].mxu1 %vm1531_vm1, %v492_v32  ;;  %v588_v40 = vld [vmem:[%s7525_s2 + $0x88] sm:$0xff]  ;;  %v427_v41 = vld [vmem:[%s7524_s1 + $0x80] sm:$0xff]  ;;  %v497_v45 = vld [vmem:[%s7524_s1 + $0x2b0] sm:$0xff] }
  0x72   : > { %768 = vperm.xlu1 %5571, %v578_v15   ;;  %5135 = vmatprep.mubr.msk.f32.mxu0 %vm1531_vm1, %v417_v16  ;;  %v587_v42 = vld [vmem:[%s7525_s2 + $0x80] sm:$0xff]  ;;  %v496_v43 = vld [vmem:[%s7524_s1 + $0x2a8] sm:$0xff]  ;;  %v590_v46 = vld [vmem:[%s7525_s2 + $0x98] sm:$0xff] }
  0x73   : > { %763 = vperm.xlu0 %5570, %v577_v17   ;;  %5249 = vmatprep.mubr.msk.f32.mxu1 %vm1531_vm1, %v493_v35  ;;  %v428_v44 = vld [vmem:[%s7524_s1 + $0x88] sm:$0xff]  ;;  %v429_v47 = vld [vmem:[%s7524_s1 + $0x90] sm:$0xff]  ;;  %v498_v49 = vld [vmem:[%s7524_s1 + $0x2b8] sm:$0xff] }
  0x74   : > { %v589_v48 = vld [vmem:[%s7525_s2 + $0x90] sm:$0xff]  ;;  %v430_v50 = vld [vmem:[%s7524_s1 + $0x98] sm:$0xff]  ;;  %v499_v51 = vld [vmem:[%s7524_s1 + $0x2c0] sm:$0xff] }
  0x75   : > { %5136 = vmatmul.mubr.msk.f32.gmra.mrb[6].mxu0 %vm1531_vm1, %v418_v18  ;;  %5250 = vmatmul.mubr.msk.f32.gmra.mrb[2].mxu1 %vm1531_vm1, %v494_v37  ;;  %v592_v52 = vld [vmem:[%s7525_s2 + $0xa8] sm:$0xff]  ;;  %v431_v53 = vld [vmem:[%s7524_s1 + $0xa0] sm:$0xff]  ;;  %v501_v57 = vld [vmem:[%s7524_s1 + $0x2d0] sm:$0xff] }
  0x76   : > { %778 = vperm.xlu1 %5571, %v580_v19   ;;  %5138 = vmatprep.mubr.msk.f32.mxu0 %vm1531_vm1, %v419_v20  ;;  %v591_v54 = vld [vmem:[%s7525_s2 + $0xa0] sm:$0xff]  ;;  %v500_v55 = vld [vmem:[%s7524_s1 + $0x2c8] sm:$0xff]  ;;  %v594_v58 = vld [vmem:[%s7525_s2 + $0xb8] sm:$0xff] }
  0x77   : > { %773 = vperm.xlu0 %5570, %v579_v21   ;;  %5252 = vmatprep.mubr.msk.f32.mxu1 %vm1531_vm1, %v495_v39  ;;  %v432_v56 = vld [vmem:[%s7524_s1 + $0xa8] sm:$0xff]  ;;  %v433_v59 = vld [vmem:[%s7524_s1 + $0xb0] sm:$0xff]  ;;  %v502_v61 = vld [vmem:[%s7524_s1 + $0x2d8] sm:$0xff] }
  0x78   : > { %v593_v60 = vld [vmem:[%s7525_s2 + $0xb0] sm:$0xff]  ;;  %v434_v62 = vld [vmem:[%s7524_s1 + $0xb8] sm:$0xff]  ;;  %v503_v63 = vld [vmem:[%s7524_s1 + $0x2e0] sm:$0xff] }
  0x79   : > { %5139 = vmatmul.mubr.msk.f32.gmra.mrb[8].mxu0 %vm1531_vm1, %v420_v22  ;;  %5253 = vmatmul.mubr.msk.f32.gmra.mrb[4].mxu1 %vm1531_vm1, %v496_v43  ;;  %v596_v0 = vld [vmem:[%s7525_s2 + $0xc8] sm:$0xff]  ;;  %v435_v1 = vld [vmem:[%s7524_s1 + $0xc0] sm:$0xff]  ;;  %v505_v5 = vld [vmem:[%s7524_s1 + $0x2f0] sm:$0xff] }
  0x7a   : > { %788 = vperm.xlu1 %5571, %v582_v23   ;;  %5141 = vmatprep.mubr.msk.f32.mxu0 %vm1531_vm1, %v421_v24  ;;  %v595_v2 = vld [vmem:[%s7525_s2 + $0xc0] sm:$0xff]  ;;  %v504_v3 = vld [vmem:[%s7524_s1 + $0x2e8] sm:$0xff]  ;;  %v598_v6 = vld [vmem:[%s7525_s2 + $0xd8] sm:$0xff] }
  0x7b   : > { %783 = vperm.xlu0 %5570, %v581_v25   ;;  %5255 = vmatprep.mubr.msk.f32.mxu1 %vm1531_vm1, %v497_v45  ;;  %v436_v4 = vld [vmem:[%s7524_s1 + $0xc8] sm:$0xff]  ;;  %v437_v7 = vld [vmem:[%s7524_s1 + $0xd0] sm:$0xff]  ;;  %v506_v9 = vld [vmem:[%s7524_s1 + $0x2f8] sm:$0xff] }
  0x7c   : > { %v597_v8 = vld [vmem:[%s7525_s2 + $0xd0] sm:$0xff]  ;;  %v438_v10 = vld [vmem:[%s7524_s1 + $0xd8] sm:$0xff]  ;;  %v507_v11 = vld [vmem:[%s7524_s1 + $0x300] sm:$0xff] }
  0x7d   : > { %5142 = vmatmul.mubr.msk.f32.gmra.mrb[10].mxu0 %vm1531_vm1, %v422_v26  ;;  %5256 = vmatmul.mubr.msk.f32.gmra.mrb[6].mxu1 %vm1531_vm1, %v498_v49  ;;  %v600_v12 = vld [vmem:[%s7525_s2 + $0xe8] sm:$0xff]  ;;  %v439_v13 = vld [vmem:[%s7524_s1 + $0xe0] sm:$0xff]  ;;  %v509_v17 = vld [vmem:[%s7524_s1 + $0x310] sm:$0xff] }
  0x7e   : > { %798 = vperm.xlu1 %5571, %v584_v27   ;;  %5144 = vmatprep.mubr.msk.f32.mxu0 %vm1531_vm1, %v423_v28  ;;  %v599_v14 = vld [vmem:[%s7525_s2 + $0xe0] sm:$0xff]  ;;  %v508_v15 = vld [vmem:[%s7524_s1 + $0x308] sm:$0xff]  ;;  %v602_v18 = vld [vmem:[%s7525_s2 + $0xf8] sm:$0xff] }
  0x7f   : > { %793 = vperm.xlu0 %5570, %v583_v29   ;;  %5258 = vmatprep.mubr.msk.f32.mxu1 %vm1531_vm1, %v499_v51  ;;  %v440_v16 = vld [vmem:[%s7524_s1 + $0xe8] sm:$0xff]  ;;  %v441_v19 = vld [vmem:[%s7524_s1 + $0xf0] sm:$0xff]  ;;  %v510_v21 = vld [vmem:[%s7524_s1 + $0x318] sm:$0xff] }
  0x80   : > { %v601_v20 = vld [vmem:[%s7525_s2 + $0xf0] sm:$0xff]  ;;  %v442_v22 = vld [vmem:[%s7524_s1 + $0xf8] sm:$0xff]  ;;  %v511_v23 = vld [vmem:[%s7524_s1 + $0x320] sm:$0xff] }
  0x81   : > { %5145 = vmatmul.mubr.msk.f32.gmra.mrb[12].mxu0 %vm1531_vm1, %v424_v31  ;;  %5259 = vmatmul.mubr.msk.f32.gmra.mrb[8].mxu1 %vm1531_vm1, %v500_v55  ;;  %v604_v24 = vld [vmem:[%s7525_s2 + $0x108] sm:$0xff]  ;;  %v443_v25 = vld [vmem:[%s7524_s1 + $0x100] sm:$0xff]  ;;  %v513_v29 = vld [vmem:[%s7524_s1 + $0x330] sm:$0xff] }
  0x82   : > { %808 = vperm.xlu1 %5571, %v586_v33   ;;  %5147 = vmatprep.mubr.msk.f32.mxu0 %vm1531_vm1, %v425_v34  ;;  %v603_v26 = vld [vmem:[%s7525_s2 + $0x100] sm:$0xff]  ;;  %v512_v27 = vld [vmem:[%s7524_s1 + $0x328] sm:$0xff]  ;;  %v606_v30 = vld [vmem:[%s7525_s2 + $0x118] sm:$0xff] }
  0x83   : > { %803 = vperm.xlu0 %5570, %v585_v36   ;;  %5261 = vmatprep.mubr.msk.f32.mxu1 %vm1531_vm1, %v501_v57  ;;  %v444_v28 = vld [vmem:[%s7524_s1 + $0x108] sm:$0xff]  ;;  %v445_v31 = vld [vmem:[%s7524_s1 + $0x110] sm:$0xff]  ;;  %v514_v33 = vld [vmem:[%s7524_s1 + $0x338] sm:$0xff] }
  0x84   : > { %v605_v32 = vld [vmem:[%s7525_s2 + $0x110] sm:$0xff]  ;;  %v446_v34 = vld [vmem:[%s7524_s1 + $0x118] sm:$0xff]  ;;  %v515_v35 = vld [vmem:[%s7524_s1 + $0x340] sm:$0xff] }
  0x85   : > { %5148 = vmatmul.mubr.msk.f32.gmra.mrb[14].mxu0 %vm1531_vm1, %v426_v38  ;;  %5262 = vmatmul.mubr.msk.f32.gmra.mrb[10].mxu1 %vm1531_vm1, %v502_v61  ;;  %v608_v36 = vld [vmem:[%s7525_s2 + $0x128] sm:$0xff]  ;;  %v447_v37 = vld [vmem:[%s7524_s1 + $0x120] sm:$0xff]  ;;  %v449_v43 = vld [vmem:[%s7524_s1 + $0x130] sm:$0xff] }
  0x86   : > { %818 = vperm.xlu1 %5571, %v588_v40   ;;  %5150 = vmatprep.mubr.msk.f32.mxu0 %vm1531_vm1, %v427_v41  ;;  %v607_v38 = vld [vmem:[%s7525_s2 + $0x120] sm:$0xff]  ;;  %v516_v39 = vld [vmem:[%s7524_s1 + $0x348] sm:$0xff]  ;;  %v517_v41 = vld [vmem:[%s7524_s1 + $0x350] sm:$0xff] }
  0x87   : > { %813 = vperm.xlu0 %5570, %v587_v42   ;;  %5264 = vmatprep.mubr.msk.f32.mxu1 %vm1531_vm1, %v503_v63  ;;  %v448_v40 = vld [vmem:[%s7524_s1 + $0x128] sm:$0xff]  ;;  %v610_v42 = vld [vmem:[%s7525_s2 + $0x138] sm:$0xff]  ;;  %v451_v49 = vld [vmem:[%s7524_s1 + $0x140] sm:$0xff] }
  0x88   : > { %v518_v45 = vld [vmem:[%s7524_s1 + $0x358] sm:$0xff]  ;;  %v520_v51 = vld [vmem:[%s7524_s1 + $0x368] sm:$0xff]  ;;  %v453_v55 = vld [vmem:[%s7524_s1 + $0x150] sm:$0xff] }
  0x89   : > { %5151 = vmatmul.mubr.msk.f32.gmra.mrb[16].mxu0 %vm1531_vm1, %v428_v44  ;;  %5265 = vmatmul.mubr.msk.f32.gmra.mrb[12].mxu1 %vm1531_vm1, %v504_v3  ;;  %v609_v44 = vld [vmem:[%s7525_s2 + $0x130] sm:$0xff]  ;;  %v522_v57 = vld [vmem:[%s7524_s1 + $0x378] sm:$0xff]  ;;  %v455_v61 = vld [vmem:[%s7524_s1 + $0x160] sm:$0xff] }
  0x8a   : > { %828 = vperm.xlu1 %5571, %v590_v46   ;;  %5153 = vmatprep.mubr.msk.f32.mxu0 %vm1531_vm1, %v429_v47  ;;  %v450_v46 = vld [vmem:[%s7524_s1 + $0x138] sm:$0xff]  ;;  %v519_v47 = vld [vmem:[%s7524_s1 + $0x360] sm:$0xff]  ;;  %v524_v63 = vld [vmem:[%s7524_s1 + $0x388] sm:$0xff] }
  0x8b   : > { %823 = vperm.xlu0 %5570, %v589_v48   ;;  %5267 = vmatprep.mubr.msk.f32.mxu1 %vm1531_vm1, %v505_v5  ;;  %v612_v48 = vld [vmem:[%s7525_s2 + $0x148] sm:$0xff]  ;;  %v457_v3 = vld [vmem:[%s7524_s1 + $0x170] sm:$0xff]  ;;  %v526_v5 = vld [vmem:[%s7524_s1 + $0x398] sm:$0xff] }
  0x8d   : > { %5154 = vmatmul.mubr.msk.f32.gmra.mrb[18].mxu0 %vm1531_vm1, %v430_v50  ;;  %5268 = vmatmul.mubr.msk.f32.gmra.mrb[14].mxu1 %vm1531_vm1, %v506_v9  ;;  %v611_v50 = vld [vmem:[%s7525_s2 + $0x140] sm:$0xff] }
  0x8e   : > { %838 = vperm.xlu1 %5571, %v592_v52   ;;  %5156 = vmatprep.mubr.msk.f32.mxu0 %vm1531_vm1, %v431_v53  ;;  %v452_v52 = vld [vmem:[%s7524_s1 + $0x148] sm:$0xff]  ;;  %v521_v53 = vld [vmem:[%s7524_s1 + $0x370] sm:$0xff]  ;;  %v459_v9 = vld [vmem:[%s7524_s1 + $0x180] sm:$0xff] }
  0x8f   : > { %833 = vperm.xlu0 %5570, %v591_v54   ;;  %5270 = vmatprep.mubr.msk.f32.mxu1 %vm1531_vm1, %v507_v11  ;;  %v614_v54 = vld [vmem:[%s7525_s2 + $0x158] sm:$0xff]  ;;  %v528_v11 = vld [vmem:[%s7524_s1 + $0x3a8] sm:$0xff] }
  0x91   : > { %5157 = vmatmul.mubr.msk.f32.gmra.mrb[20].mxu0 %vm1531_vm1, %v432_v56  ;;  %5271 = vmatmul.mubr.msk.f32.gmra.mrb[16].mxu1 %vm1531_vm1, %v508_v15  ;;  %v613_v56 = vld [vmem:[%s7525_s2 + $0x150] sm:$0xff] }
  0x92   : > { %848 = vperm.xlu1 %5571, %v594_v58   ;;  %5159 = vmatprep.mubr.msk.f32.mxu0 %vm1531_vm1, %v433_v59  ;;  %v454_v58 = vld [vmem:[%s7524_s1 + $0x158] sm:$0xff]  ;;  %v523_v59 = vld [vmem:[%s7524_s1 + $0x380] sm:$0xff]  ;;  %v461_v15 = vld [vmem:[%s7524_s1 + $0x190] sm:$0xff] }
  0x93   : > { %843 = vperm.xlu0 %5570, %v593_v60   ;;  %5273 = vmatprep.mubr.msk.f32.mxu1 %vm1531_vm1, %v509_v17  ;;  %v616_v60 = vld [vmem:[%s7525_s2 + $0x168] sm:$0xff]  ;;  %v530_v17 = vld [vmem:[%s7524_s1 + $0x3b8] sm:$0xff] }
  0x95   : > { %5160 = vmatmul.mubr.msk.f32.gmra.mrb[22].mxu0 %vm1531_vm1, %v434_v62  ;;  %5274 = vmatmul.mubr.msk.f32.gmra.mrb[18].mxu1 %vm1531_vm1, %v510_v21  ;;  %v615_v62 = vld [vmem:[%s7525_s2 + $0x160] sm:$0xff] }
  0x96   : > { %858 = vperm.xlu1 %5571, %v596_v0   ;;  %5162 = vmatprep.mubr.msk.f32.mxu0 %vm1531_vm1, %v435_v1  ;;  %v456_v0 = vld [vmem:[%s7524_s1 + $0x168] sm:$0xff]  ;;  %v525_v1 = vld [vmem:[%s7524_s1 + $0x390] sm:$0xff]  ;;  %v463_v21 = vld [vmem:[%s7524_s1 + $0x1a0] sm:$0xff] }
  0x97   : > { %853 = vperm.xlu0 %5570, %v595_v2   ;;  %5276 = vmatprep.mubr.msk.f32.mxu1 %vm1531_vm1, %v511_v23  ;;  %v618_v2 = vld [vmem:[%s7525_s2 + $0x178] sm:$0xff]  ;;  %v532_v23 = vld [vmem:[%s7524_s1 + $0x3c8] sm:$0xff] }
  0x99   : > { %5163 = vmatmul.mubr.msk.f32.gmra.mrb[24].mxu0 %vm1531_vm1, %v436_v4  ;;  %5277 = vmatmul.mubr.msk.f32.gmra.mrb[20].mxu1 %vm1531_vm1, %v512_v27  ;;  %v617_v4 = vld [vmem:[%s7525_s2 + $0x170] sm:$0xff] }
  0x9a   : > { %868 = vperm.xlu1 %5571, %v598_v6   ;;  %5165 = vmatprep.mubr.msk.f32.mxu0 %vm1531_vm1, %v437_v7  ;;  %v458_v6 = vld [vmem:[%s7524_s1 + $0x178] sm:$0xff]  ;;  %v527_v7 = vld [vmem:[%s7524_s1 + $0x3a0] sm:$0xff]  ;;  %v465_v27 = vld [vmem:[%s7524_s1 + $0x1b0] sm:$0xff] }
  0x9b   : > { %863 = vperm.xlu0 %5570, %v597_v8   ;;  %5279 = vmatprep.mubr.msk.f32.mxu1 %vm1531_vm1, %v513_v29  ;;  %v620_v8 = vld [vmem:[%s7525_s2 + $0x188] sm:$0xff]  ;;  %v534_v29 = vld [vmem:[%s7524_s1 + $0x3d8] sm:$0xff] }
  0x9d   : > { %5166 = vmatmul.mubr.msk.f32.gmra.mrb[26].mxu0 %vm1531_vm1, %v438_v10  ;;  %5280 = vmatmul.mubr.msk.f32.gmra.mrb[22].mxu1 %vm1531_vm1, %v514_v33  ;;  %v619_v10 = vld [vmem:[%s7525_s2 + $0x180] sm:$0xff] }
  0x9e   : > { %878 = vperm.xlu1 %5571, %v600_v12   ;;  %5168 = vmatprep.mubr.msk.f32.mxu0 %vm1531_vm1, %v439_v13  ;;  %v460_v12 = vld [vmem:[%s7524_s1 + $0x188] sm:$0xff]  ;;  %v529_v13 = vld [vmem:[%s7524_s1 + $0x3b0] sm:$0xff]  ;;  %v467_v33 = vld [vmem:[%s7524_s1 + $0x1c0] sm:$0xff] }
  0x9f   : > { %873 = vperm.xlu0 %5570, %v599_v14   ;;  %5282 = vmatprep.mubr.msk.f32.mxu1 %vm1531_vm1, %v515_v35  ;;  %v622_v14 = vld [vmem:[%s7525_s2 + $0x198] sm:$0xff]  ;;  %v536_v35 = vld [vmem:[%s7524_s1 + $0x3e8] sm:$0xff] }
  0xa1   : > { %5169 = vmatmul.mubr.msk.f32.gmra.mrb[28].mxu0 %vm1531_vm1, %v440_v16  ;;  %5283 = vmatmul.mubr.msk.f32.gmra.mrb[24].mxu1 %vm1531_vm1, %v516_v39  ;;  %v621_v16 = vld [vmem:[%s7525_s2 + $0x190] sm:$0xff] }
  0xa2   : > { %888 = vperm.xlu1 %5571, %v602_v18   ;;  %5171 = vmatprep.mubr.msk.f32.mxu0 %vm1531_vm1, %v441_v19  ;;  %v462_v18 = vld [vmem:[%s7524_s1 + $0x198] sm:$0xff]  ;;  %v531_v19 = vld [vmem:[%s7524_s1 + $0x3c0] sm:$0xff]  ;;  %v469_v39 = vld [vmem:[%s7524_s1 + $0x1d0] sm:$0xff] }
  0xa3   : > { %883 = vperm.xlu0 %5570, %v601_v20   ;;  %5285 = vmatprep.mubr.msk.f32.mxu1 %vm1531_vm1, %v517_v41  ;;  %v624_v20 = vld [vmem:[%s7525_s2 + $0x1a8] sm:$0xff]  ;;  %v538_v41 = vld [vmem:[%s7524_s1 + $0x3f8] sm:$0xff] }
  0xa5   : > { %5172 = vmatmul.mubr.msk.f32.gmra.mrb[30].mxu0 %vm1531_vm1, %v442_v22  ;;  %5286 = vmatmul.mubr.msk.f32.gmra.mrb[26].mxu1 %vm1531_vm1, %v518_v45  ;;  %v623_v22 = vld [vmem:[%s7525_s2 + $0x1a0] sm:$0xff] }
  0xa6   : > { %898 = vperm.xlu1 %5571, %v604_v24   ;;  %5174 = vmatprep.mubr.msk.f32.mxu0 %vm1531_vm1, %v443_v25  ;;  %v464_v24 = vld [vmem:[%s7524_s1 + $0x1a8] sm:$0xff]  ;;  %v533_v25 = vld [vmem:[%s7524_s1 + $0x3d0] sm:$0xff]  ;;  %v471_v45 = vld [vmem:[%s7524_s1 + $0x1e0] sm:$0xff] }
  0xa7   : > { %893 = vperm.xlu0 %5570, %v603_v26   ;;  %5288 = vmatprep.mubr.msk.f32.mxu1 %vm1531_vm1, %v519_v47  ;;  %v626_v26 = vld [vmem:[%s7525_s2 + $0x1b8] sm:$0xff]  ;;  %v540_v47 = vld [vmem:[%s7524_s1 + $0x408] sm:$0xff] }
  0xa9   : > { %5175 = vmatmul.mubr.msk.f32.gmra.mrb[32].mxu0 %vm1531_vm1, %v444_v28  ;;  %5289 = vmatmul.mubr.msk.f32.gmra.mrb[28].mxu1 %vm1531_vm1, %v520_v51  ;;  %v625_v28 = vld [vmem:[%s7525_s2 + $0x1b0] sm:$0xff] }
  0xaa   : > { %908 = vperm.xlu1 %5571, %v606_v30   ;;  %5177 = vmatprep.mubr.msk.f32.mxu0 %vm1531_vm1, %v445_v31  ;;  %v466_v30 = vld [vmem:[%s7524_s1 + $0x1b8] sm:$0xff]  ;;  %v535_v31 = vld [vmem:[%s7524_s1 + $0x3e0] sm:$0xff]  ;;  %v473_v51 = vld [vmem:[%s7524_s1 + $0x1f0] sm:$0xff] }
  0xab   : > { %903 = vperm.xlu0 %5570, %v605_v32   ;;  %5291 = vmatprep.mubr.msk.f32.mxu1 %vm1531_vm1, %v521_v53  ;;  %v628_v32 = vld [vmem:[%s7525_s2 + $0x1c8] sm:$0xff]  ;;  %v542_v53 = vld [vmem:[%s7524_s1 + $0x418] sm:$0xff] }
  0xad   : > { %5178 = vmatmul.mubr.msk.f32.gmra.mrb[34].mxu0 %vm1531_vm1, %v446_v34  ;;  %5292 = vmatmul.mubr.msk.f32.gmra.mrb[30].mxu1 %vm1531_vm1, %v522_v57  ;;  %v627_v34 = vld [vmem:[%s7525_s2 + $0x1c0] sm:$0xff] }
  0xae   : > { %918 = vperm.xlu1 %5571, %v608_v36   ;;  %5180 = vmatprep.mubr.msk.f32.mxu0 %vm1531_vm1, %v447_v37  ;;  %v468_v36 = vld [vmem:[%s7524_s1 + $0x1c8] sm:$0xff]  ;;  %v537_v37 = vld [vmem:[%s7524_s1 + $0x3f0] sm:$0xff]  ;;  %v475_v57 = vld [vmem:[%s7524_s1 + $0x200] sm:$0xff] }
  0xaf   : > { %913 = vperm.xlu0 %5570, %v607_v38   ;;  %5294 = vmatprep.mubr.msk.f32.mxu1 %vm1531_vm1, %v523_v59  ;;  %v630_v38 = vld [vmem:[%s7525_s2 + $0x1d8] sm:$0xff] }
  0xb1   : > { %5181 = vmatmul.mubr.msk.f32.gmra.mrb[36].mxu0 %vm1531_vm1, %v448_v40  ;;  %5295 = vmatmul.mubr.msk.f32.gmra.mrb[32].mxu1 %vm1531_vm1, %v524_v63  ;;  %v629_v40 = vld [vmem:[%s7525_s2 + $0x1d0] sm:$0xff] }
  0xb2   : > { %928 = vperm.xlu1 %5571, %v610_v42   ;;  %5183 = vmatprep.mubr.msk.f32.mxu0 %vm1531_vm1, %v449_v43  ;;  %v470_v42 = vld [vmem:[%s7524_s1 + $0x1d8] sm:$0xff]  ;;  %v539_v43 = vld [vmem:[%s7524_s1 + $0x400] sm:$0xff]  ;;  %v545_v63 = vld [vmem:[%s7524_s1 + $0x430] sm:$0xff] }
  0xb3   : > { %923 = vperm.xlu0 %5570, %v609_v44   ;;  %5297 = vmatprep.mubr.msk.f32.mxu1 %vm1531_vm1, %v525_v1  ;;  %v632_v44 = vld [vmem:[%s7525_s2 + $0x1e8] sm:$0xff]  ;;  %v477_v1 = vld [vmem:[%s7524_s1 + $0x210] sm:$0xff] }
  0xb5   : > { %5184 = vmatmul.mubr.msk.f32.gmra.mrb[38].mxu0 %vm1531_vm1, %v450_v46  ;;  %5298 = vmatmul.mubr.msk.f32.gmra.mrb[34].mxu1 %vm1531_vm1, %v526_v5  ;;  %v631_v46 = vld [vmem:[%s7525_s2 + $0x1e0] sm:$0xff] }
  0xb6   : > { %938 = vperm.xlu1 %5571, %v612_v48   ;;  %5186 = vmatprep.mubr.msk.f32.mxu0 %vm1531_vm1, %v451_v49  ;;  %v472_v48 = vld [vmem:[%s7524_s1 + $0x1e8] sm:$0xff]  ;;  %v541_v49 = vld [vmem:[%s7524_s1 + $0x410] sm:$0xff] }
  0xb7   : > { %933 = vperm.xlu0 %5570, %v611_v50   ;;  %5300 = vmatprep.mubr.msk.f32.mxu1 %vm1531_vm1, %v527_v7  ;;  %v634_v50 = vld [vmem:[%s7525_s2 + $0x1f8] sm:$0xff]  ;;  %v547_v7 = vld [vmem:[%s7524_s1 + $0x440] sm:$0xff] }
  0xb9   : > { %5187 = vmatmul.mubr.msk.f32.gmra.mrb[40].mxu0 %vm1531_vm1, %v452_v52  ;;  %5301 = vmatmul.mubr.msk.f32.gmra.mrb[36].mxu1 %vm1531_vm1, %v528_v11  ;;  %v633_v52 = vld [vmem:[%s7525_s2 + $0x1f0] sm:$0xff] }
  0xba   : > { %948 = vperm.xlu1 %5571, %v614_v54   ;;  %5189 = vmatprep.mubr.msk.f32.mxu0 %vm1531_vm1, %v453_v55  ;;  %v474_v54 = vld [vmem:[%s7524_s1 + $0x1f8] sm:$0xff]  ;;  %v543_v55 = vld [vmem:[%s7524_s1 + $0x420] sm:$0xff] }
  0xbb   : > { %943 = vperm.xlu0 %5570, %v613_v56   ;;  %5303 = vmatprep.mubr.msk.f32.mxu1 %vm1531_vm1, %v529_v13  ;;  %v636_v56 = vld [vmem:[%s7525_s2 + $0x208] sm:$0xff] }
  0xbd   : > { %5190 = vmatmul.mubr.msk.f32.gmra.mrb[42].mxu0 %vm1531_vm1, %v454_v58  ;;  %5304 = vmatmul.mubr.msk.f32.gmra.mrb[38].mxu1 %vm1531_vm1, %v530_v17  ;;  %v635_v58 = vld [vmem:[%s7525_s2 + $0x200] sm:$0xff]  ;;  %v481_v17 = vld [vmem:[%s7524_s1 + $0x230] sm:$0xff] }
  0xbe   : > { %958 = vperm.xlu1 %5571, %v616_v60   ;;  %5192 = vmatprep.mubr.msk.f32.mxu0 %vm1531_vm1, %v455_v61  ;;  %v544_v60 = vld [vmem:[%s7524_s1 + $0x428] sm:$0xff] }
  0xbf   : > { %953 = vperm.xlu0 %5570, %v615_v62   ;;  %5306 = vmatprep.mubr.msk.f32.mxu1 %vm1531_vm1, %v531_v19  ;;  %v476_v62 = vld [vmem:[%s7524_s1 + $0x208] sm:$0xff] }
  0xc1   : > { %5193 = vmatmul.mubr.msk.f32.gmra.mrb[44].mxu0 %vm1531_vm1, %v456_v0  ;;  %5307 = vmatmul.mubr.msk.f32.gmra.mrb[40].mxu1 %vm1531_vm1, %v532_v23  ;;  %v638_v0 = vld [vmem:[%s7525_s2 + $0x218] sm:$0xff]  ;;  %v551_v23 = vld [vmem:[%s7524_s1 + $0x460] sm:$0xff] }
  0xc2   : > { %968 = vperm.xlu1 %5571, %v618_v2   ;;  %5195 = vmatprep.mubr.msk.f32.mxu0 %vm1531_vm1, %v457_v3  ;;  %v637_v2 = vld [vmem:[%s7525_s2 + $0x210] sm:$0xff] }
  0xc3   : > { %963 = vperm.xlu0 %5570, %v617_v4   ;;  %5309 = vmatprep.mubr.msk.f32.mxu1 %vm1531_vm1, %v533_v25  ;;  %v546_v4 = vld [vmem:[%s7524_s1 + $0x438] sm:$0xff]  ;;  %v483_v25 = vld [vmem:[%s7524_s1 + $0x240] sm:$0xff] }
  0xc5   : > { %5196 = vmatmul.mubr.msk.f32.gmra.mrb[46].mxu0 %vm1531_vm1, %v458_v6  ;;  %5310 = vmatmul.mubr.msk.f32.gmra.mrb[42].mxu1 %vm1531_vm1, %v534_v29  ;;  %v478_v6 = vld [vmem:[%s7524_s1 + $0x218] sm:$0xff] }
  0xc6   : > { %978 = vperm.xlu1 %5571, %v620_v8   ;;  %5198 = vmatprep.mubr.msk.f32.mxu0 %vm1531_vm1, %v459_v9  ;;  %v640_v8 = vld [vmem:[%s7525_s2 + $0x228] sm:$0xff]  ;;  %v479_v9 = vld [vmem:[%s7524_s1 + $0x220] sm:$0xff] }
  0xc7   : > { %973 = vperm.xlu0 %5570, %v619_v10   ;;  %5312 = vmatprep.mubr.msk.f32.mxu1 %vm1531_vm1, %v535_v31  ;;  %v639_v10 = vld [vmem:[%s7525_s2 + $0x220] sm:$0xff]  ;;  %v553_v31 = vld [vmem:[%s7524_s1 + $0x470] sm:$0xff] }
  0xc9   : > { %5199 = vmatmul.mubr.msk.f32.gmra.mrb[48].mxu0 %vm1531_vm1, %v460_v12  ;;  %5313 = vmatmul.mubr.msk.f32.gmra.mrb[44].mxu1 %vm1531_vm1, %v536_v35  ;;  %v548_v12 = vld [vmem:[%s7524_s1 + $0x448] sm:$0xff] }
  0xca   : > { %988 = vperm.xlu1 %5571, %v622_v14   ;;  %5201 = vmatprep.mubr.msk.f32.mxu0 %vm1531_vm1, %v461_v15  ;;  %v480_v14 = vld [vmem:[%s7524_s1 + $0x228] sm:$0xff]  ;;  %v549_v15 = vld [vmem:[%s7524_s1 + $0x450] sm:$0xff] }
  0xcb   : > { %983 = vperm.xlu0 %5570, %v621_v16   ;;  %5315 = vmatprep.mubr.msk.f32.mxu1 %vm1531_vm1, %v537_v37  ;;  %v642_v16 = vld [vmem:[%s7525_s2 + $0x238] sm:$0xff] }
  0xcd   : > { %5202 = vmatmul.mubr.msk.f32.gmra.mrb[50].mxu0 %vm1531_vm1, %v462_v18  ;;  %5316 = vmatmul.mubr.msk.f32.gmra.mrb[46].mxu1 %vm1531_vm1, %v538_v41  ;;  %v641_v18 = vld [vmem:[%s7525_s2 + $0x230] sm:$0xff]  ;;  %v487_v41 = vld [vmem:[%s7524_s1 + $0x260] sm:$0xff] }
  0xce   : > { %998 = vperm.xlu1 %5571, %v624_v20   ;;  %5204 = vmatprep.mubr.msk.f32.mxu0 %vm1531_vm1, %v463_v21  ;;  %v550_v20 = vld [vmem:[%s7524_s1 + $0x458] sm:$0xff] }
  0xcf   : > { %993 = vperm.xlu0 %5570, %v623_v22   ;;  %5318 = vmatprep.mubr.msk.f32.mxu1 %vm1531_vm1, %v539_v43  ;;  %v482_v22 = vld [vmem:[%s7524_s1 + $0x238] sm:$0xff] }
  0xd1   : > { %5205 = vmatmul.mubr.msk.f32.gmra.mrb[52].mxu0 %vm1531_vm1, %v464_v24  ;;  %5319 = vmatmul.mubr.msk.f32.gmra.mrb[48].mxu1 %vm1531_vm1, %v540_v47  ;;  %v644_v24 = vld [vmem:[%s7525_s2 + $0x248] sm:$0xff]  ;;  %v557_v47 = vld [vmem:[%s7524_s1 + $0x490] sm:$0xff] }
  0xd2   : > { %1008 = vperm.xlu1 %5571, %v626_v26   ;;  %5207 = vmatprep.mubr.msk.f32.mxu0 %vm1531_vm1, %v465_v27  ;;  %v643_v26 = vld [vmem:[%s7525_s2 + $0x240] sm:$0xff] }
  0xd3   : > { %1003 = vperm.xlu0 %5570, %v625_v28   ;;  %5321 = vmatprep.mubr.msk.f32.mxu1 %vm1531_vm1, %v541_v49  ;;  %v552_v28 = vld [vmem:[%s7524_s1 + $0x468] sm:$0xff]  ;;  %v489_v49 = vld [vmem:[%s7524_s1 + $0x270] sm:$0xff] }
  0xd5   : > { %5208 = vmatmul.mubr.msk.f32.gmra.mrb[54].mxu0 %vm1531_vm1, %v466_v30  ;;  %5322 = vmatmul.mubr.msk.f32.gmra.mrb[50].mxu1 %vm1531_vm1, %v542_v53  ;;  %v484_v30 = vld [vmem:[%s7524_s1 + $0x248] sm:$0xff] }
  0xd6   : > { %1018 = vperm.xlu1 %5571, %v628_v32   ;;  %5210 = vmatprep.mubr.msk.f32.mxu0 %vm1531_vm1, %v467_v33  ;;  %v646_v32 = vld [vmem:[%s7525_s2 + $0x258] sm:$0xff]  ;;  %v485_v33 = vld [vmem:[%s7524_s1 + $0x250] sm:$0xff] }
  0xd7   : > { %1013 = vperm.xlu0 %5570, %v627_v34   ;;  %5324 = vmatprep.mubr.msk.f32.mxu1 %vm1531_vm1, %v543_v55  ;;  %v645_v34 = vld [vmem:[%s7525_s2 + $0x250] sm:$0xff]  ;;  %v559_v55 = vld [vmem:[%s7524_s1 + $0x4a0] sm:$0xff] }
  0xd9   : > { %5211 = vmatmul.mubr.msk.f32.gmra.mrb[56].mxu0 %vm1531_vm1, %v468_v36  ;;  %5325 = vmatmul.mubr.msk.f32.gmra.mrb[52].mxu1 %vm1531_vm1, %v544_v60  ;;  %v554_v36 = vld [vmem:[%s7524_s1 + $0x478] sm:$0xff]  ;;  %v560_v60 = vld [vmem:[%s7524_s1 + $0x4a8] sm:$0xff] }
  0xda   : > { %1028 = vperm.xlu1 %5571, %v630_v38   ;;  %5213 = vmatprep.mubr.msk.f32.mxu0 %vm1531_vm1, %v469_v39  ;;  %v486_v38 = vld [vmem:[%s7524_s1 + $0x258] sm:$0xff]  ;;  %v555_v39 = vld [vmem:[%s7524_s1 + $0x480] sm:$0xff] }
  0xdb   : > { %1023 = vperm.xlu0 %5570, %v629_v40   ;;  %5327 = vmatprep.mubr.msk.f32.mxu1 %vm1531_vm1, %v545_v63  ;;  %v648_v40 = vld [vmem:[%s7525_s2 + $0x268] sm:$0xff]  ;;  %v561_v63 = vld [vmem:[%s7524_s1 + $0x4b0] sm:$0xff] }
  0xdd   : > { %5214 = vmatmul.mubr.msk.f32.gmra.mrb[58].mxu0 %vm1531_vm1, %v470_v42  ;;  %5328 = vmatmul.mubr.msk.f32.gmra.mrb[54].mxu1 %vm1531_vm1, %v546_v4  ;;  %v647_v42 = vld [vmem:[%s7525_s2 + $0x260] sm:$0xff]  ;;  %v562_v4 = vld [vmem:[%s7524_s1 + $0x4b8] sm:$0xff] }
  0xde   : > { %1038 = vperm.xlu1 %5571, %v632_v44   ;;  %5216 = vmatprep.mubr.msk.f32.mxu0 %vm1531_vm1, %v471_v45  ;;  %v556_v44 = vld [vmem:[%s7524_s1 + $0x488] sm:$0xff] }
  0xdf   : > { %1033 = vperm.xlu0 %5570, %v631_v46   ;;  %5330 = vmatprep.mubr.msk.f32.mxu1 %vm1531_vm1, %v547_v7  ;;  %v488_v46 = vld [vmem:[%s7524_s1 + $0x268] sm:$0xff]  ;;  %v563_v7 = vld [vmem:[%s7524_s1 + $0x4c0] sm:$0xff] }
  0xe1   : > { %5217 = vmatmul.mubr.msk.f32.gmra.mrb[60].mxu0 %vm1531_vm1, %v472_v48  ;;  %5331 = vmatmul.mubr.msk.f32.gmra.mrb[56].mxu1 %vm1531_vm1, %v548_v12  ;;  %v650_v48 = vld [vmem:[%s7525_s2 + $0x278] sm:$0xff]  ;;  %v564_v12 = vld [vmem:[%s7524_s1 + $0x4c8] sm:$0xff] }
  0xe2   : > { %1048 = vperm.xlu1 %5571, %v634_v50   ;;  %5219 = vmatprep.mubr.msk.f32.mxu0 %vm1531_vm1, %v473_v51  ;;  %v649_v50 = vld [vmem:[%s7525_s2 + $0x270] sm:$0xff] }
  0xe3   : > { %1043 = vperm.xlu0 %5570, %v633_v52   ;;  %5333 = vmatprep.mubr.msk.f32.mxu1 %vm1531_vm1, %v549_v15  ;;  %v558_v52 = vld [vmem:[%s7524_s1 + $0x498] sm:$0xff]  ;;  %v565_v15 = vld [vmem:[%s7524_s1 + $0x4d0] sm:$0xff] }
  0xe5   : > { %5220 = vmatmul.mubr.msk.f32.gmra.mrb[62].mxu0 %vm1531_vm1, %v474_v54  ;;  %v6531_v59 = vpop.permute.xlu1 %743  ;;  %5334 = vmatmul.mubr.msk.f32.gmra.mrb[58].mxu1 %vm1531_vm1, %v550_v20  ;;  %v490_v54 = vld [vmem:[%s7524_s1 + $0x278] sm:$0xff] }
  0xe6   : > { %v6537_v61 = vpop.permute.xlu0 %733  ;;  %1058 = vperm.xlu1 %5571, %v636_v56   ;;  %5222 = vmatprep.mubr.msk.f32.mxu0 %vm1531_vm1, %v475_v57  ;;  %v652_v56 = vld [vmem:[%s7525_s2 + $0x288] sm:$0xff]  ;;  %v651_v57 = vld [vmem:[%s7525_s2 + $0x280] sm:$0xff]  ;;  %v566_v20 = vld [vmem:[%s7524_s1 + $0x4d8] sm:$0xff] }
  0xe7   : > { %1053 = vperm.xlu0 %5570, %v635_v58   ;;  %5336 = vmatprep.mubr.msk.f32.mxu1 %vm1531_vm1, %v551_v23  ;;  %v567_v23 = vld [vmem:[%s7524_s1 + $0x4e0] sm:$0xff] }
  0xe9   : > { %5223 = vmatmul.mubr.msk.f32.gmra.mrb[64].mxu0 %vm1531_vm1, %v476_v62  ;;  %v6557_v3 = vpop.permute.xlu1 %748  ;;  %5337 = vmatmul.mubr.msk.f32.gmra.mrb[60].mxu1 %vm1531_vm1, %v552_v28  ;;  %v568_v28 = vld [vmem:[%s7524_s1 + $0x4e8] sm:$0xff] }
  0xea   : > { %v6563_v5 = vpop.permute.xlu0 %738  ;;  %1068 = vperm.xlu1 %5571, %v638_v0   ;;  %5225 = vmatprep.mubr.msk.f32.mxu0 %vm1531_vm1, %v477_v1  ;;  %v654_v0 = vld [vmem:[%s7525_s2 + $0x298] sm:$0xff]  ;;  %v653_v1 = vld [vmem:[%s7525_s2 + $0x290] sm:$0xff] }
  0xeb   : > { %1063 = vperm.xlu0 %5570, %v637_v2   ;;  %5339 = vmatprep.mubr.msk.f32.mxu1 %vm1531_vm1, %v553_v31  ;;  %v569_v31 = vld [vmem:[%s7524_s1 + $0x4f0] sm:$0xff] }
  0xed   : > { %5226 = vmatmul.mubr.msk.f32.gmra.mrb[66].mxu0 %vm1531_vm1, %v478_v6  ;;  %v6583_v11 = vpop.permute.xlu1 %758  ;;  %5340 = vmatmul.mubr.msk.f32.gmra.mrb[62].mxu1 %vm1531_vm1, %v554_v36  ;;  %v570_v36 = vld [vmem:[%s7524_s1 + $0x4f8] sm:$0xff] }
  0xee   : > { %v6589_v13 = vpop.permute.xlu0 %753  ;;  %1078 = vperm.xlu1 %5571, %v640_v8   ;;  %5228 = vmatprep.mubr.msk.f32.mxu0 %vm1531_vm1, %v479_v9  ;;  %v656_v8 = vld [vmem:[%s7525_s2 + $0x2a8] sm:$0xff]  ;;  %v655_v9 = vld [vmem:[%s7525_s2 + $0x2a0] sm:$0xff] }
  0xef   : > { %1073 = vperm.xlu0 %5570, %v639_v10   ;;  %5342 = vmatprep.mubr.msk.f32.mxu1 %vm1531_vm1, %v555_v39  ;;  %v664_v39 = vld [vmem:[%s7525_s2 + $0x2e8] sm:$0xff] }
  0xf1   : > { %5229 = vmatmul.mubr.msk.f32.gmra.mrb[68].mxu0 %vm1531_vm1, %v480_v14  ;;  %v6609_v19 = vpop.permute.xlu1 %768  ;;  %5343 = vmatmul.mubr.msk.f32.gmra.mrb[64].mxu1 %vm1531_vm1, %v556_v44  ;;  %v666_v44 = vld [vmem:[%s7525_s2 + $0x2f8] sm:$0xff] }
  0xf2   : > { %v6615_v21 = vpop.permute.xlu0 %763  ;;  %1088 = vperm.xlu1 %5571, %v642_v16   ;;  %5231 = vmatprep.mubr.msk.f32.mxu0 %vm1531_vm1, %v481_v17  ;;  %v658_v16 = vld [vmem:[%s7525_s2 + $0x2b8] sm:$0xff]  ;;  %v657_v17 = vld [vmem:[%s7525_s2 + $0x2b0] sm:$0xff] }
  0xf3   : > { %1083 = vperm.xlu0 %5570, %v641_v18   ;;  %5345 = vmatprep.mubr.msk.f32.mxu1 %vm1531_vm1, %v557_v47 }
  0xf5   : > { %5232 = vmatmul.mubr.msk.f32.gmra.mrb[70].mxu0 %vm1531_vm1, %v482_v22  ;;  %v6635_v27 = vpop.permute.xlu1 %778  ;;  %5346 = vmatmul.mubr.msk.f32.gmra.mrb[66].mxu1 %vm1531_vm1, %v558_v52 }
  0xf6   : > { %v6641_v29 = vpop.permute.xlu0 %773  ;;  %1098 = vperm.xlu1 %5571, %v644_v24   ;;  %5234 = vmatprep.mubr.msk.f32.mxu0 %vm1531_vm1, %v483_v25  ;;  %v660_v24 = vld [vmem:[%s7525_s2 + $0x2c8] sm:$0xff]  ;;  %v659_v25 = vld [vmem:[%s7525_s2 + $0x2c0] sm:$0xff] }
  0xf7   : > { %1093 = vperm.xlu0 %5570, %v643_v26   ;;  %5348 = vmatprep.mubr.msk.f32.mxu1 %vm1531_vm1, %v559_v55  ;;  %v670_v55 = vld [vmem:[%s7525_s2 + $0x318] sm:$0xff] }
  0xf9   : > { %5235 = vmatmul.mubr.msk.f32.gmra.mrb[72].mxu0 %vm1531_vm1, %v484_v30  ;;  %v6661_v35 = vpop.permute.xlu1 %788  ;;  %5349 = vmatmul.mubr.msk.f32.gmra.mrb[68].mxu1 %vm1531_vm1, %v560_v60 }
  0xfa   : > { %v6667_v37 = vpop.permute.xlu0 %783  ;;  %1108 = vperm.xlu1 %5571, %v646_v32   ;;  %5237 = vmatprep.mubr.msk.f32.mxu0 %vm1531_vm1, %v485_v33  ;;  %v662_v32 = vld [vmem:[%s7525_s2 + $0x2d8] sm:$0xff]  ;;  %v661_v33 = vld [vmem:[%s7525_s2 + $0x2d0] sm:$0xff] }
  0xfb   : > { %1103 = vperm.xlu0 %5570, %v645_v34   ;;  %5351 = vmatprep.mubr.msk.f32.mxu1 %vm1531_vm1, %v561_v63  ;;  %v672_v63 = vld [vmem:[%s7525_s2 + $0x328] sm:$0xff] }
  0xfd   : > { %5238 = vmatmul.mubr.msk.f32.gmra.mrb[74].mxu0 %vm1531_vm1, %v486_v38  ;;  %v6687_v43 = vpop.permute.xlu1 %798  ;;  %5352 = vmatmul.mubr.msk.f32.gmra.mrb[70].mxu1 %vm1531_vm1, %v562_v4 }
  0xfe   : > { %v6693_v45 = vpop.permute.xlu0 %793  ;;  %1118 = vperm.xlu1 %5571, %v648_v40   ;;  %5240 = vmatprep.mubr.msk.f32.mxu0 %vm1531_vm1, %v487_v41  ;;  %v663_v40 = vld [vmem:[%s7525_s2 + $0x2e0] sm:$0xff] }
  0xff   : > { %1113 = vperm.xlu0 %5570, %v647_v42   ;;  %5354 = vmatprep.mubr.msk.f32.mxu1 %vm1531_vm1, %v563_v7  ;;  %v674_v7 = vld [vmem:[%s7525_s2 + $0x338] sm:$0xff] }
 0x101   : > { %5241 = vmatmul.mubr.msk.f32.gmra.mrb[76].mxu0 %vm1531_vm1, %v488_v46  ;;  %v6713_v51 = vpop.permute.xlu1 %808  ;;  %5355 = vmatmul.mubr.msk.f32.gmra.mrb[72].mxu1 %vm1531_vm1, %v564_v12  ;;  %v665_v46 = vld [vmem:[%s7525_s2 + $0x2f0] sm:$0xff] }
 0x102   : > { %v6719_v53 = vpop.permute.xlu0 %803  ;;  %1128 = vperm.xlu1 %5571, %v650_v48   ;;  %5243 = vmatprep.mubr.msk.f32.mxu0 %vm1531_vm1, %v489_v49  ;;  %v668_v49 = vld [vmem:[%s7525_s2 + $0x308] sm:$0xff] }
 0x103   : > { %1123 = vperm.xlu0 %5570, %v649_v50   ;;  %5357 = vmatprep.mubr.msk.f32.mxu1 %vm1531_vm1, %v565_v15  ;;  %v667_v50 = vld [vmem:[%s7525_s2 + $0x300] sm:$0xff]  ;;  %v676_v15 = vld [vmem:[%s7525_s2 + $0x348] sm:$0xff] }
 0x105   : > { %5244 = vmatmul.mubr.msk.f32.gmra.mrb[78].mxu0 %vm1531_vm1, %v490_v54  ;;  %v6736_v58 = vpop.permute.xlu1 %818  ;;  %5358 = vmatmul.mubr.msk.f32.gmra.mrb[74].mxu1 %vm1531_vm1, %v566_v20 }
 0x106   : > { %v6742_v62 = vpop.permute.xlu0 %813  ;;  %1138 = vperm.xlu1 %5571, %v652_v56   ;;  %5360 = vmatprep.mubr.msk.f32.mxu1 %vm1531_vm1, %v567_v23  ;;  %v669_v56 = vld [vmem:[%s7525_s2 + $0x310] sm:$0xff]  ;;  %v678_v23 = vld [vmem:[%s7525_s2 + $0x358] sm:$0xff] }
 0x107   : > { %1133 = vperm.xlu0 %5570, %v651_v57  }
 0x109   : > { %v6754_v2 = vpop.permute.xlu1 %828  ;;  %5361 = vmatmul.mubr.msk.f32.gmra.mrb[76].mxu1 %vm1531_vm1, %v568_v28 }
 0x10a   : > { %v6760_v6 = vpop.permute.xlu0 %823  ;;  %1148 = vperm.xlu1 %5571, %v654_v0   ;;  %5363 = vmatprep.mubr.msk.f32.mxu1 %vm1531_vm1, %v569_v31  ;;  %v671_v0 = vld [vmem:[%s7525_s2 + $0x320] sm:$0xff]  ;;  %v680_v31 = vld [vmem:[%s7525_s2 + $0x368] sm:$0xff] }
 0x10b   : > { %1143 = vperm.xlu0 %5570, %v653_v1  }
 0x10d   : > { %v6772_v10 = vpop.permute.xlu1 %838  ;;  %5364 = vmatmul.mubr.msk.f32.gmra.mrb[78].mxu1 %vm1531_vm1, %v570_v36 }
 0x10e   : > { %v6778_v14 = vpop.permute.xlu0 %833  ;;  %1158 = vperm.xlu1 %5571, %v656_v8   ;;  %v673_v8 = vld [vmem:[%s7525_s2 + $0x330] sm:$0xff] }
 0x10f   : > { %1153 = vperm.xlu0 %5570, %v655_v9  }
 0x111   : > { %v6790_v18 = vpop.permute.xlu1 %848 }
 0x112   : > { %v6796_v22 = vpop.permute.xlu0 %843  ;;  %1168 = vperm.xlu1 %5571, %v658_v16   ;;  %v675_v16 = vld [vmem:[%s7525_s2 + $0x340] sm:$0xff] }
 0x113   : > { %1163 = vperm.xlu0 %5570, %v657_v17  }
 0x115   : > { %v6808_v26 = vpop.permute.xlu1 %858 }
 0x116   : > { %v6814_v30 = vpop.permute.xlu0 %853  ;;  %1178 = vperm.xlu1 %5571, %v660_v24   ;;  %v677_v24 = vld [vmem:[%s7525_s2 + $0x350] sm:$0xff] }
 0x117   : > { %1173 = vperm.xlu0 %5570, %v659_v25  }
 0x119   : > { %v6826_v34 = vpop.permute.xlu1 %868 }
 0x11a   : > { %v6832_v38 = vpop.permute.xlu0 %863  ;;  %1188 = vperm.xlu1 %5571, %v662_v32  }
 0x11b   : > { %1183 = vperm.xlu0 %5570, %v661_v33   ;;  %v679_v33 = vld [vmem:[%s7525_s2 + $0x360] sm:$0xff] }
 0x11d   : > { %v6841_v41 = vpop.permute.xlu1 %878 }
 0x11e   : > { %v6843_v42 = vpop.permute.xlu0 %873  ;;  %1198 = vperm.xlu1 %5571, %v664_v39  }
 0x11f   : > { %1193 = vperm.xlu0 %5570, %v663_v40  }
 0x121   : > { %v6851_v47 = vpop.permute.xlu1 %888 }
 0x122   : > { %v6853_v48 = vpop.permute.xlu0 %883  ;;  %1208 = vperm.xlu1 %5571, %v666_v44   ;;  %v3042_v44 = vld [vmem:[#allocation2 + $0x8] sm:$0xff] }
 0x123   : > { %1203 = vperm.xlu0 %5570, %v665_v46  }
 0x125   : > { %v6861_v52 = vpop.permute.xlu1 %898 }
 0x126   : > { %v6863_v54 = vpop.permute.xlu0 %893  ;;  %1218 = vperm.xlu1 %5571, %v668_v49  }
 0x127   : > { %1213 = vperm.xlu0 %5570, %v667_v50  }
 0x129   : > { %v6871_v57 = vpop.permute.xlu1 %908 }
 0x12a   : > { %v6873_v60 = vpop.permute.xlu0 %903  ;;  %1228 = vperm.xlu1 %5571, %v670_v55   ;;  %v3041_v55 = vld [vmem:[#allocation2] sm:$0xff] }
 0x12b   : > { %1223 = vperm.xlu0 %5570, %v669_v56   ;;  %v682_v56 = vld [vmem:[%s7525_s2 + $0x378] sm:$0xff] }
 0x12d   : > { %v6881_v1 = vpop.permute.xlu1 %918 }
 0x12e   : > { %v6883_v4 = vpop.permute.xlu0 %913  ;;  %1238 = vperm.xlu1 %5571, %v672_v63  }
 0x12f   : > { %1233 = vperm.xlu0 %5570, %v671_v0  }
 0x131   : > { %v6891_v9 = vpop.permute.xlu1 %928 }
 0x132   : > { %v6893_v12 = vpop.permute.xlu0 %923  ;;  %1248 = vperm.xlu1 %5571, %v674_v7  }
 0x133   : > { %1243 = vperm.xlu0 %5570, %v673_v8  }
 0x135   : > { %v6901_v17 = vpop.permute.xlu1 %938 }
 0x136   : > { %v6903_v20 = vpop.permute.xlu0 %933  ;;  %1258 = vperm.xlu1 %5571, %v676_v15  }
 0x137   : > { %1253 = vperm.xlu0 %5570, %v675_v16  }
 0x139   : > { %v6911_v25 = vpop.permute.xlu1 %948 }
 0x13a   : > { %v6913_v28 = vpop.permute.xlu0 %943  ;;  %1268 = vperm.xlu1 %5571, %v678_v23   ;;  %v3044_v23 = vld [vmem:[#allocation2 + $0x18] sm:$0xff] }
 0x13b   : > { %1263 = vperm.xlu0 %5570, %v677_v24  }
 0x13c   : > { %v5128_v32 = vpop.f32.mrb[0].mxu0 }
 0x13d   : > { %v2088_v36 = vadd.f32 %v5128_v32, %v6563_v5  ;;  %v2082_v39 = vpop.f32.mrb[1].mxu0  ;;  %v6922_v40 = vpop.permute.xlu1 %958  ;;  %v681_v5 = vld [vmem:[%s7525_s2 + $0x370] sm:$0xff] }
 0x13e   : > { %v2083_v46 = vadd.f32 %v2082_v39, %v6537_v61  ;;  %v6925_v49 = vpop.permute.xlu0 %953  ;;  %1278 = vperm.xlu1 %5571, %v680_v31  }
 0x13f   : > { %v2882_v50 = vmax.f32 %v2088_v36, 0.0  ;;  %1273 = vperm.xlu0 %5570, %v679_v33   ;;  %v3043_v33 = vld [vmem:[#allocation2 + $0x10] sm:$0xff]  ;;  %v684_v36 = vld [vmem:[%s7525_s2 + $0x388] sm:$0xff] }
 0x140   : > { %v2881_v63 = vmax.f32 %v2083_v46, 0.0  ;;  %v5131_v0 = vpop.f32.mrb[2].mxu0 }
 0x141   : > { %v3202_v7 = vadd.f32 %v3042_v44, %v2882_v50  ;;  %v2098_v8 = vadd.f32 %v5131_v0, %v6557_v3  ;;  %v2092_v61 = vpop.f32.mrb[3].mxu0  ;;  %v6934_v15 = vpop.permute.xlu1 %968  ;;  %v683_v44 = vld [vmem:[%s7525_s2 + $0x380] sm:$0xff] }
 0x142   : > { %v3201_v16 = vadd.f32 %v3041_v55, %v2881_v63  ;;  %v2093_v24 = vadd.f32 %v2092_v61, %v6531_v59  ;;  %v6937_v31 = vpop.permute.xlu0 %963  ;;  %1288 = vperm.xlu1 %5571, %v682_v56   ;;  %v3046_v63 = vld [vmem:[#allocation2 + $0x28] sm:$0xff]  ;;  %v686_v61 = vld [vmem:[%s7525_s2 + $0x398] sm:$0xff] }
 0x143   : > { %3362 = vst [vmem:[#allocation2 + $0x8] sm:$0xff] %v3202_v7  ;;  %v2884_v32 = vmax.f32 %v2098_v8, 0.0  ;;  %1283 = vperm.xlu0 %5570, %v681_v5   ;;  %v3045_v8 = vld [vmem:[#allocation2 + $0x20] sm:$0xff] }
 0x144   : > { %3361 = vst [vmem:[#allocation2] sm:$0xff] %v3201_v16  ;;  %v2883_v3 = vmax.f32 %v2093_v24, 0.0  ;;  %v5134_v39 = vpop.f32.mrb[4].mxu0 }
 0x145   : > { %v3204_v46 = vadd.f32 %v3044_v23, %v2884_v32  ;;  %v2108_v59 = vadd.f32 %v5134_v39, %v6583_v11  ;;  %v2102_v50 = vpop.f32.mrb[5].mxu0  ;;  %v6946_v55 = vpop.permute.xlu1 %978  ;;  %v685_v23 = vld [vmem:[%s7525_s2 + $0x390] sm:$0xff] }
 0x146   : > { %v3203_v56 = vadd.f32 %v3043_v33, %v2883_v3  ;;  %v2103_v0 = vadd.f32 %v2102_v50, %v6589_v13  ;;  %v6949_v5 = vpop.permute.xlu0 %973  ;;  %1298 = vperm.xlu1 %5571, %v684_v36   ;;  %v3048_v3 = vld [vmem:[#allocation2 + $0x38] sm:$0xff]  ;;  %v688_v50 = vld [vmem:[%s7525_s2 + $0x3a8] sm:$0xff] }
 0x147   : > { %3364 = vst [vmem:[#allocation2 + $0x18] sm:$0xff] %v3204_v46  ;;  %v2886_v7 = vmax.f32 %v2108_v59, 0.0  ;;  %1293 = vperm.xlu0 %5570, %v683_v44   ;;  %v3047_v59 = vld [vmem:[#allocation2 + $0x30] sm:$0xff] }
 0x148   : > { %3363 = vst [vmem:[#allocation2 + $0x10] sm:$0xff] %v3203_v56  ;;  %v2885_v11 = vmax.f32 %v2103_v0, 0.0  ;;  %v5137_v16 = vpop.f32.mrb[6].mxu0 }
 0x149   : > { %v3206_v24 = vadd.f32 %v3046_v63, %v2886_v7  ;;  %v2118_v13 = vadd.f32 %v5137_v16, %v6609_v19  ;;  %v2112_v32 = vpop.f32.mrb[7].mxu0  ;;  %v6958_v33 = vpop.permute.xlu1 %988  ;;  %v687_v63 = vld [vmem:[%s7525_s2 + $0x3a0] sm:$0xff] }
 0x14a   : > { %v3205_v36 = vadd.f32 %v3045_v8, %v2885_v11  ;;  %v2113_v39 = vadd.f32 %v2112_v32, %v6615_v21  ;;  %v6961_v44 = vpop.permute.xlu0 %983  ;;  %1308 = vperm.xlu1 %5571, %v686_v61   ;;  %v3050_v11 = vld [vmem:[#allocation2 + $0x48] sm:$0xff]  ;;  %v690_v32 = vld [vmem:[%s7525_s2 + $0x3b8] sm:$0xff] }
 0x14b   : > { %3366 = vst [vmem:[#allocation2 + $0x28] sm:$0xff] %v3206_v24  ;;  %v2888_v46 = vmax.f32 %v2118_v13, 0.0  ;;  %1303 = vperm.xlu0 %5570, %v685_v23   ;;  %v3049_v13 = vld [vmem:[#allocation2 + $0x40] sm:$0xff] }
 0x14c   : > { %3365 = vst [vmem:[#allocation2 + $0x20] sm:$0xff] %v3205_v36  ;;  %v2887_v19 = vmax.f32 %v2113_v39, 0.0  ;;  %v5140_v56 = vpop.f32.mrb[8].mxu0 }
 0x14d   : > { %v3208_v0 = vadd.f32 %v3048_v3, %v2888_v46  ;;  %v2128_v21 = vadd.f32 %v5140_v56, %v6635_v27  ;;  %v2122_v7 = vpop.f32.mrb[9].mxu0  ;;  %v6970_v8 = vpop.permute.xlu1 %998  ;;  %v689_v3 = vld [vmem:[%s7525_s2 + $0x3b0] sm:$0xff] }
 0x14e   : > { %v3207_v61 = vadd.f32 %v3047_v59, %v2887_v19  ;;  %v2123_v16 = vadd.f32 %v2122_v7, %v6641_v29  ;;  %v6973_v23 = vpop.permute.xlu0 %993  ;;  %1318 = vperm.xlu1 %5571, %v688_v50   ;;  %v3052_v19 = vld [vmem:[#allocation2 + $0x58] sm:$0xff]  ;;  %v692_v7 = vld [vmem:[%s7525_s2 + $0x3c8] sm:$0xff] }
 0x14f   : > { %3368 = vst [vmem:[#allocation2 + $0x38] sm:$0xff] %v3208_v0  ;;  %v2890_v24 = vmax.f32 %v2128_v21, 0.0  ;;  %1313 = vperm.xlu0 %5570, %v687_v63   ;;  %v3051_v21 = vld [vmem:[#allocation2 + $0x50] sm:$0xff] }
 0x150   : > { %3367 = vst [vmem:[#allocation2 + $0x30] sm:$0xff] %v3207_v61  ;;  %v2889_v27 = vmax.f32 %v2123_v16, 0.0  ;;  %v5143_v36 = vpop.f32.mrb[10].mxu0  ;;  %v6990_v61 = vpop.f32.mrb[0].mxu1 }
 0x151   : > { %v3210_v39 = vadd.f32 %v3050_v11, %v2890_v24  ;;  %v2138_v29 = vadd.f32 %v5143_v36, %v6661_v35  ;;  %v2132_v46 = vpop.f32.mrb[11].mxu0  ;;  %v6982_v59 = vpop.permute.xlu1 %1008 }
 0x152   : > { %v3209_v50 = vadd.f32 %v3049_v13, %v2889_v27  ;;  %v2133_v56 = vadd.f32 %v2132_v46, %v6667_v37  ;;  %v6985_v63 = vpop.permute.xlu0 %1003  ;;  %1328 = vperm.xlu1 %5571, %v690_v32   ;;  %v691_v37 = vld [vmem:[%s7525_s2 + $0x3c0] sm:$0xff]  ;;  %v6995_v16 = vpop.f32.mrb[1].mxu1 }
 0x153   : > { %3370 = vst [vmem:[#allocation2 + $0x48] sm:$0xff] %v3210_v39  ;;  %v2892_v0 = vmax.f32 %v2138_v29, 0.0  ;;  %1323 = vperm.xlu0 %5570, %v689_v3   ;;  %v3054_v3 = vld [vmem:[#allocation2 + $0x68] sm:$0xff] }
 0x154   : > { %3369 = vst [vmem:[#allocation2 + $0x40] sm:$0xff] %v3209_v50  ;;  %v2891_v35 = vmax.f32 %v2133_v56, 0.0  ;;  %v5146_v11 = vpop.f32.mrb[12].mxu0  ;;  %v3053_v50 = vld [vmem:[#allocation2 + $0x60] sm:$0xff]  ;;  %v7006_v56 = vpop.f32.mrb[2].mxu1 }
 0x155   : > { %v3212_v24 = vadd.f32 %v3052_v19, %v2892_v0  ;;  %v2148_v13 = vadd.f32 %v5146_v11, %v6687_v43  ;;  %v2142_v32 = vpop.f32.mrb[13].mxu0  ;;  %v6998_v27 = vpop.permute.xlu1 %1018  ;;  %v694_v19 = vld [vmem:[%s7525_s2 + $0x3d8] sm:$0xff] }
 0x156   : > { %v3211_v36 = vadd.f32 %v3051_v21, %v2891_v35  ;;  %v2143_v39 = vadd.f32 %v2142_v32, %v6693_v45  ;;  %v7001_v29 = vpop.permute.xlu0 %1013  ;;  %1338 = vperm.xlu1 %5571, %v692_v7   ;;  %v693_v45 = vld [vmem:[%s7525_s2 + $0x3d0] sm:$0xff]  ;;  %v7011_v21 = vpop.f32.mrb[3].mxu1 }
 0x157   : > { %7529 = vst [vmem:[#allocation3_spill] sm:$0xff] %v7001_v29  ;;  %3372 = vst [vmem:[#allocation2 + $0x58] sm:$0xff] %v3212_v24  ;;  %v2894_v46 = vmax.f32 %v2148_v13, 0.0  ;;  %1333 = vperm.xlu0 %5570, %v691_v37   ;;  %v3056_v13 = vld [vmem:[#allocation2 + $0x78] sm:$0xff] }
 0x158   : > { %3371 = vst [vmem:[#allocation2 + $0x50] sm:$0xff] %v3211_v36  ;;  %v2893_v43 = vmax.f32 %v2143_v39, 0.0  ;;  %v5149_v0 = vpop.f32.mrb[14].mxu0  ;;  %v3055_v39 = vld [vmem:[#allocation2 + $0x70] sm:$0xff] }
 0x159   : > { %v3214_v7 = vadd.f32 %v3054_v3, %v2894_v46  ;;  %v2158_v35 = vadd.f32 %v5149_v0, %v6713_v51  ;;  %v2152_v11 = vpop.f32.mrb[15].mxu0  ;;  %v7014_v37 = vpop.permute.xlu1 %1028  ;;  %v696_v3 = vld [vmem:[%s7525_s2 + $0x3e8] sm:$0xff] }
 0x15a   : > { %7530 = vst [vmem:[#allocation4_spill] sm:$0xff] %v7014_v37  ;;  %v3213_v24 = vadd.f32 %v3053_v50, %v2893_v43  ;;  %v2153_v32 = vadd.f32 %v2152_v11, %v6719_v53  ;;  %v7017_v29 = vpop.permute.xlu0 %1023  ;;  %1348 = vperm.xlu1 %5571, %v694_v19   ;;  %v7022_v46 = vpop.f32.mrb[4].mxu1  ;;  %v695_v53 = vld [vmem:[%s7525_s2 + $0x3e0] sm:$0xff]  ;;  %v3058_v11 = vld [vmem:[#allocation2 + $0x88] sm:$0xff] }
 0x15b   : > { %7531 = vst [vmem:[#allocation5_spill] sm:$0xff] %v7017_v29  ;;  %3374 = vst [vmem:[#allocation2 + $0x68] sm:$0xff] %v3214_v7  ;;  %v2896_v36 = vmax.f32 %v2158_v35, 0.0  ;;  %1343 = vperm.xlu0 %5570, %v693_v45   ;;  %v7027_v50 = vpop.f32.mrb[5].mxu1 }
 0x15c   : > { %3373 = vst [vmem:[#allocation2 + $0x60] sm:$0xff] %v3213_v24  ;;  %v2895_v51 = vmax.f32 %v2153_v32, 0.0  ;;  %v5152_v0 = vpop.f32.mrb[16].mxu0  ;;  %v3057_v32 = vld [vmem:[#allocation2 + $0x80] sm:$0xff] }
 0x15d   : > { %v3216_v19 = vadd.f32 %v3056_v13, %v2896_v36  ;;  %v2168_v43 = vadd.f32 %v5152_v0, %v6736_v58  ;;  %v2162_v7 = vpop.f32.mrb[17].mxu0  ;;  %v7030_v45 = vpop.permute.xlu1 %1038  ;;  %v698_v13 = vld [vmem:[%s7525_s2 + $0x3f8] sm:$0xff] }
 0x15e   : > { %7532 = vst [vmem:[#allocation6_spill] sm:$0xff] %v7030_v45  ;;  %v3215_v35 = vadd.f32 %v3055_v39, %v2895_v51  ;;  %v2163_v29 = vadd.f32 %v2162_v7, %v6742_v62  ;;  %v7033_v37 = vpop.permute.xlu0 %1033  ;;  %1358 = vperm.xlu1 %5571, %v696_v3   ;;  %v7038_v36 = vpop.f32.mrb[6].mxu1  ;;  %v697_v62 = vld [vmem:[%s7525_s2 + $0x3f0] sm:$0xff]  ;;  %v3060_v7 = vld [vmem:[#allocation2 + $0x98] sm:$0xff] }
 0x15f   : > { %7533 = vst [vmem:[#allocation7_spill] sm:$0xff] %v7033_v37  ;;  %3376 = vst [vmem:[#allocation2 + $0x78] sm:$0xff] %v3216_v19  ;;  %v2898_v24 = vmax.f32 %v2168_v43, 0.0  ;;  %1353 = vperm.xlu0 %5570, %v695_v53   ;;  %v7043_v39 = vpop.f32.mrb[7].mxu1 }
 0x160   : > { %3375 = vst [vmem:[#allocation2 + $0x70] sm:$0xff] %v3215_v35  ;;  %v2897_v58 = vmax.f32 %v2163_v29, 0.0  ;;  %v5155_v0 = vpop.f32.mrb[18].mxu0  ;;  %v3059_v35 = vld [vmem:[#allocation2 + $0x90] sm:$0xff] }
 0x161   : > { %v3218_v3 = vadd.f32 %v3058_v11, %v2898_v24  ;;  %v2178_v51 = vadd.f32 %v5155_v0, %v6754_v2  ;;  %v2172_v19 = vpop.f32.mrb[19].mxu0  ;;  %v7046_v53 = vpop.permute.xlu1 %1048  ;;  %v700_v11 = vld [vmem:[%s7525_s2 + $0x408] sm:$0xff] }
 0x162   : > { %7534 = vst [vmem:[#allocation8_spill] sm:$0xff] %v7046_v53  ;;  %v3217_v43 = vadd.f32 %v3057_v32, %v2897_v58  ;;  %v2173_v37 = vadd.f32 %v2172_v19, %v6760_v6  ;;  %v7049_v45 = vpop.permute.xlu0 %1043  ;;  %1368 = vperm.xlu1 %5571, %v698_v13   ;;  %v7054_v24 = vpop.f32.mrb[8].mxu1  ;;  %v699_v6 = vld [vmem:[%s7525_s2 + $0x400] sm:$0xff]  ;;  %v3062_v19 = vld [vmem:[#allocation2 + $0xa8] sm:$0xff] }
 0x163   : > { %7535 = vst [vmem:[#allocation9_spill] sm:$0xff] %v7049_v45  ;;  %3378 = vst [vmem:[#allocation2 + $0x88] sm:$0xff] %v3218_v3  ;;  %v2900_v29 = vmax.f32 %v2178_v51, 0.0  ;;  %1363 = vperm.xlu0 %5570, %v697_v62   ;;  %v7059_v32 = vpop.f32.mrb[9].mxu1 }
 0x164   : > { %3377 = vst [vmem:[#allocation2 + $0x80] sm:$0xff] %v3217_v43  ;;  %v2899_v2 = vmax.f32 %v2173_v37, 0.0  ;;  %v5158_v0 = vpop.f32.mrb[20].mxu0  ;;  %v3061_v43 = vld [vmem:[#allocation2 + $0xa0] sm:$0xff] }
 0x165   : > { %v3220_v13 = vadd.f32 %v3060_v7, %v2900_v29  ;;  %v2188_v58 = vadd.f32 %v5158_v0, %v6772_v10  ;;  %v2182_v3 = vpop.f32.mrb[21].mxu0  ;;  %v7062_v62 = vpop.permute.xlu1 %1058  ;;  %v702_v7 = vld [vmem:[%s7525_s2 + $0x418] sm:$0xff] }
 0x166   : > { %7536 = vst [vmem:[#allocation10_spill] sm:$0xff] %v7062_v62  ;;  %v3219_v51 = vadd.f32 %v3059_v35, %v2899_v2  ;;  %v2183_v45 = vadd.f32 %v2182_v3, %v6778_v14  ;;  %v7065_v53 = vpop.permute.xlu0 %1053  ;;  %1378 = vperm.xlu1 %5571, %v700_v11   ;;  %v7070_v29 = vpop.f32.mrb[10].mxu1  ;;  %v701_v14 = vld [vmem:[%s7525_s2 + $0x410] sm:$0xff]  ;;  %v3064_v3 = vld [vmem:[#allocation2 + $0xb8] sm:$0xff] }
 0x167   : > { %7537 = vst [vmem:[#allocation11_spill] sm:$0xff] %v7065_v53  ;;  %3380 = vst [vmem:[#allocation2 + $0x98] sm:$0xff] %v3220_v13  ;;  %v2902_v37 = vmax.f32 %v2188_v58, 0.0  ;;  %1373 = vperm.xlu0 %5570, %v699_v6   ;;  %v7075_v35 = vpop.f32.mrb[11].mxu1 }
 0x168   : > { %3379 = vst [vmem:[#allocation2 + $0x90] sm:$0xff] %v3219_v51  ;;  %v2901_v10 = vmax.f32 %v2183_v45, 0.0  ;;  %v5161_v0 = vpop.f32.mrb[22].mxu0  ;;  %v3063_v51 = vld [vmem:[#allocation2 + $0xb0] sm:$0xff] }
 0x169   : > { %v3222_v11 = vadd.f32 %v3062_v19, %v2902_v37  ;;  %v2198_v2 = vadd.f32 %v5161_v0, %v6790_v18  ;;  %v2192_v13 = vpop.f32.mrb[23].mxu0  ;;  %v7078_v6 = vpop.permute.xlu1 %1068  ;;  %v704_v19 = vld [vmem:[%s7525_s2 + $0x428] sm:$0xff] }
 0x16a   : > { %7538 = vst [vmem:[#allocation12_spill] sm:$0xff] %v7078_v6  ;;  %v3221_v58 = vadd.f32 %v3061_v43, %v2901_v10  ;;  %v2193_v53 = vadd.f32 %v2192_v13, %v6796_v22  ;;  %v7081_v62 = vpop.permute.xlu0 %1063  ;;  %1388 = vperm.xlu1 %5571, %v702_v7   ;;  %v7086_v37 = vpop.f32.mrb[12].mxu1  ;;  %v703_v22 = vld [vmem:[%s7525_s2 + $0x420] sm:$0xff]  ;;  %v3066_v13 = vld [vmem:[#allocation2 + $0xc8] sm:$0xff] }
 0x16b   : > { %7539 = vst [vmem:[#allocation13_spill] sm:$0xff] %v7081_v62  ;;  %3382 = vst [vmem:[#allocation2 + $0xa8] sm:$0xff] %v3222_v11  ;;  %v2904_v45 = vmax.f32 %v2198_v2, 0.0  ;;  %1383 = vperm.xlu0 %5570, %v701_v14   ;;  %v7091_v43 = vpop.f32.mrb[13].mxu1 }
 0x16c   : > { %3381 = vst [vmem:[#allocation2 + $0xa0] sm:$0xff] %v3221_v58  ;;  %v2903_v18 = vmax.f32 %v2193_v53, 0.0  ;;  %v5164_v0 = vpop.f32.mrb[24].mxu0  ;;  %v3065_v58 = vld [vmem:[#allocation2 + $0xc0] sm:$0xff] }
 0x16d   : > { %v3224_v7 = vadd.f32 %v3064_v3, %v2904_v45  ;;  %v2208_v10 = vadd.f32 %v5164_v0, %v6808_v26  ;;  %v2202_v11 = vpop.f32.mrb[25].mxu0  ;;  %v7094_v14 = vpop.permute.xlu1 %1078  ;;  %v706_v3 = vld [vmem:[%s7525_s2 + $0x438] sm:$0xff] }
 0x16e   : > { %7540 = vst [vmem:[#allocation14_spill] sm:$0xff] %v7094_v14  ;;  %v3223_v2 = vadd.f32 %v3063_v51, %v2903_v18  ;;  %v2203_v62 = vadd.f32 %v2202_v11, %v6814_v30  ;;  %v7097_v6 = vpop.permute.xlu0 %1073  ;;  %1398 = vperm.xlu1 %5571, %v704_v19   ;;  %v7102_v45 = vpop.f32.mrb[14].mxu1  ;;  %v705_v30 = vld [vmem:[%s7525_s2 + $0x430] sm:$0xff]  ;;  %v3068_v11 = vld [vmem:[#allocation2 + $0xd8] sm:$0xff] }
 0x16f   : > { %7541 = vst [vmem:[#allocation15_spill] sm:$0xff] %v7097_v6  ;;  %3384 = vst [vmem:[#allocation2 + $0xb8] sm:$0xff] %v3224_v7  ;;  %v2906_v53 = vmax.f32 %v2208_v10, 0.0  ;;  %1393 = vperm.xlu0 %5570, %v703_v22   ;;  %v7107_v51 = vpop.f32.mrb[15].mxu1 }
 0x170   : > { %3383 = vst [vmem:[#allocation2 + $0xb0] sm:$0xff] %v3223_v2  ;;  %v2905_v26 = vmax.f32 %v2203_v62, 0.0  ;;  %v5167_v0 = vpop.f32.mrb[26].mxu0  ;;  %v3067_v2 = vld [vmem:[#allocation2 + $0xd0] sm:$0xff] }
 0x171   : > { %v3226_v19 = vadd.f32 %v3066_v13, %v2906_v53  ;;  %v2218_v18 = vadd.f32 %v5167_v0, %v6826_v34  ;;  %v2212_v7 = vpop.f32.mrb[27].mxu0  ;;  %v7110_v22 = vpop.permute.xlu1 %1088  ;;  %v708_v13 = vld [vmem:[%s7525_s2 + $0x448] sm:$0xff] }
 0x172   : > { %7542 = vst [vmem:[#allocation16_spill] sm:$0xff] %v7110_v22  ;;  %v3225_v10 = vadd.f32 %v3065_v58, %v2905_v26  ;;  %v2213_v6 = vadd.f32 %v2212_v7, %v6832_v38  ;;  %v7113_v14 = vpop.permute.xlu0 %1083  ;;  %1408 = vperm.xlu1 %5571, %v706_v3   ;;  %v7118_v53 = vpop.f32.mrb[16].mxu1  ;;  %v707_v38 = vld [vmem:[%s7525_s2 + $0x440] sm:$0xff]  ;;  %v3070_v7 = vld [vmem:[#allocation2 + $0xe8] sm:$0xff] }
 0x173   : > { %7543 = vst [vmem:[#allocation17_spill] sm:$0xff] %v7113_v14  ;;  %3386 = vst [vmem:[#allocation2 + $0xc8] sm:$0xff] %v3226_v19  ;;  %v2908_v62 = vmax.f32 %v2218_v18, 0.0  ;;  %1403 = vperm.xlu0 %5570, %v705_v30   ;;  %v7123_v58 = vpop.f32.mrb[17].mxu1 }
 0x174   : > { %3385 = vst [vmem:[#allocation2 + $0xc0] sm:$0xff] %v3225_v10  ;;  %v2907_v34 = vmax.f32 %v2213_v6, 0.0  ;;  %v5170_v0 = vpop.f32.mrb[28].mxu0  ;;  %v3069_v10 = vld [vmem:[#allocation2 + $0xe0] sm:$0xff] }
 0x175   : > { %v3228_v3 = vadd.f32 %v3068_v11, %v2908_v62  ;;  %v2228_v26 = vadd.f32 %v5170_v0, %v6841_v41  ;;  %v2222_v19 = vpop.f32.mrb[29].mxu0  ;;  %v7126_v30 = vpop.permute.xlu1 %1098  ;;  %v710_v11 = vld [vmem:[%s7525_s2 + $0x458] sm:$0xff] }
 0x176   : > { %7544 = vst [vmem:[#allocation18_spill] sm:$0xff] %v7126_v30  ;;  %v3227_v18 = vadd.f32 %v3067_v2, %v2907_v34  ;;  %v2223_v14 = vadd.f32 %v2222_v19, %v6843_v42  ;;  %v7129_v22 = vpop.permute.xlu0 %1093  ;;  %1418 = vperm.xlu1 %5571, %v708_v13   ;;  %v7134_v62 = vpop.f32.mrb[18].mxu1  ;;  %v709_v42 = vld [vmem:[%s7525_s2 + $0x450] sm:$0xff]  ;;  %v3072_v19 = vld [vmem:[#allocation2 + $0xf8] sm:$0xff] }
 0x177   : > { %7545 = vst [vmem:[#allocation19_spill] sm:$0xff] %v7129_v22  ;;  %3388 = vst [vmem:[#allocation2 + $0xd8] sm:$0xff] %v3228_v3  ;;  %v2910_v6 = vmax.f32 %v2228_v26, 0.0  ;;  %1413 = vperm.xlu0 %5570, %v707_v38   ;;  %v7139_v2 = vpop.f32.mrb[19].mxu1 }
 0x178   : > { %3387 = vst [vmem:[#allocation2 + $0xd0] sm:$0xff] %v3227_v18  ;;  %v2909_v41 = vmax.f32 %v2223_v14, 0.0  ;;  %v5173_v0 = vpop.f32.mrb[30].mxu0  ;;  %v3071_v18 = vld [vmem:[#allocation2 + $0xf0] sm:$0xff] }
 0x179   : > { %v3230_v13 = vadd.f32 %v3070_v7, %v2910_v6  ;;  %v2238_v34 = vadd.f32 %v5173_v0, %v6851_v47  ;;  %v2232_v3 = vpop.f32.mrb[31].mxu0  ;;  %v7142_v38 = vpop.permute.xlu1 %1108  ;;  %v712_v7 = vld [vmem:[%s7525_s2 + $0x468] sm:$0xff] }
 0x17a   : > { %7546 = vst [vmem:[#allocation20_spill] sm:$0xff] %v7142_v38  ;;  %v3229_v26 = vadd.f32 %v3069_v10, %v2909_v41  ;;  %v2233_v22 = vadd.f32 %v2232_v3, %v6853_v48  ;;  %v7145_v30 = vpop.permute.xlu0 %1103  ;;  %1428 = vperm.xlu1 %5571, %v710_v11   ;;  %v7150_v6 = vpop.f32.mrb[20].mxu1  ;;  %v711_v48 = vld [vmem:[%s7525_s2 + $0x460] sm:$0xff]  ;;  %v3074_v3 = vld [vmem:[#allocation2 + $0x108] sm:$0xff] }
 0x17b   : > { %7547 = vst [vmem:[#allocation21_spill] sm:$0xff] %v7145_v30  ;;  %3390 = vst [vmem:[#allocation2 + $0xe8] sm:$0xff] %v3230_v13  ;;  %v2912_v14 = vmax.f32 %v2238_v34, 0.0  ;;  %1423 = vperm.xlu0 %5570, %v709_v42   ;;  %v7155_v10 = vpop.f32.mrb[21].mxu1 }
 0x17c   : > { %3389 = vst [vmem:[#allocation2 + $0xe0] sm:$0xff] %v3229_v26  ;;  %v2911_v47 = vmax.f32 %v2233_v22, 0.0  ;;  %v5176_v0 = vpop.f32.mrb[32].mxu0  ;;  %7548 = vst [vmem:[#allocation22_spill] sm:$0xff] %v7155_v10  ;;  %v3073_v26 = vld [vmem:[#allocation2 + $0x100] sm:$0xff]  ;;  %v3079_v10 = vld [vmem:[#allocation2 + $0x130] sm:$0xff] }
 0x17d   : > { %v3232_v11 = vadd.f32 %v3072_v19, %v2912_v14  ;;  %v2248_v41 = vadd.f32 %v5176_v0, %v6861_v52  ;;  %v2242_v13 = vpop.f32.mrb[33].mxu0  ;;  %v7158_v42 = vpop.permute.xlu1 %1118  ;;  %v714_v19 = vld [vmem:[%s7525_s2 + $0x478] sm:$0xff] }
 0x17e   : > { %7549 = vst [vmem:[#allocation23_spill] sm:$0xff] %v7158_v42  ;;  %v3231_v34 = vadd.f32 %v3071_v18, %v2911_v47  ;;  %v2243_v30 = vadd.f32 %v2242_v13, %v6863_v54  ;;  %v7161_v38 = vpop.permute.xlu0 %1113  ;;  %1438 = vperm.xlu1 %5571, %v712_v7   ;;  %v7166_v14 = vpop.f32.mrb[22].mxu1  ;;  %v713_v54 = vld [vmem:[%s7525_s2 + $0x470] sm:$0xff]  ;;  %v3076_v13 = vld [vmem:[#allocation2 + $0x118] sm:$0xff] }
 0x17f   : > { %7550 = vst [vmem:[#allocation24_spill] sm:$0xff] %v7161_v38  ;;  %3392 = vst [vmem:[#allocation2 + $0xf8] sm:$0xff] %v3232_v11  ;;  %v2914_v22 = vmax.f32 %v2248_v41, 0.0  ;;  %1433 = vperm.xlu0 %5570, %v711_v48   ;;  %v7171_v18 = vpop.f32.mrb[23].mxu1 }
 0x180   : > { %7551 = vst [vmem:[#allocation25_spill] sm:$0xff] %v7166_v14  ;;  %3391 = vst [vmem:[#allocation2 + $0xf0] sm:$0xff] %v3231_v34  ;;  %v2913_v52 = vmax.f32 %v2243_v30, 0.0  ;;  %v5179_v0 = vpop.f32.mrb[34].mxu0  ;;  %v3075_v34 = vld [vmem:[#allocation2 + $0x110] sm:$0xff] }
 0x181   : > { %7552 = vst [vmem:[#allocation26_spill] sm:$0xff] %v7171_v18  ;;  %v3234_v7 = vadd.f32 %v3074_v3, %v2914_v22  ;;  %v2258_v47 = vadd.f32 %v5179_v0, %v6871_v57  ;;  %v2252_v11 = vpop.f32.mrb[35].mxu0  ;;  %v7174_v48 = vpop.permute.xlu1 %1128  ;;  %v716_v3 = vld [vmem:[%s7525_s2 + $0x488] sm:$0xff] }
 0x182   : > { %7553 = vst [vmem:[#allocation27_spill] sm:$0xff] %v7174_v48  ;;  %v3233_v41 = vadd.f32 %v3073_v26, %v2913_v52  ;;  %v2253_v38 = vadd.f32 %v2252_v11, %v6873_v60  ;;  %v7177_v42 = vpop.permute.xlu0 %1123  ;;  %1448 = vperm.xlu1 %5571, %v714_v19   ;;  %v7182_v22 = vpop.f32.mrb[24].mxu1  ;;  %v715_v60 = vld [vmem:[%s7525_s2 + $0x480] sm:$0xff]  ;;  %v3078_v11 = vld [vmem:[#allocation2 + $0x128] sm:$0xff] }
 0x183   : > { %7554 = vst [vmem:[#allocation28_spill] sm:$0xff] %v7177_v42  ;;  %3394 = vst [vmem:[#allocation2 + $0x108] sm:$0xff] %v3234_v7  ;;  %v2916_v30 = vmax.f32 %v2258_v47, 0.0  ;;  %1443 = vperm.xlu0 %5570, %v713_v54   ;;  %v7187_v26 = vpop.f32.mrb[25].mxu1  ;;  %v3122_v18 = vld [vmem:[#allocation2 + $0x288] sm:$0xff] }
 0x184   : > { %7555 = vst [vmem:[#allocation29_spill] sm:$0xff] %v7182_v22  ;;  %3393 = vst [vmem:[#allocation2 + $0x100] sm:$0xff] %v3233_v41  ;;  %v2915_v57 = vmax.f32 %v2253_v38, 0.0  ;;  %v5182_v0 = vpop.f32.mrb[36].mxu0  ;;  %v3077_v22 = vld [vmem:[#allocation2 + $0x120] sm:$0xff] }
 0x185   : > { %7556 = vst [vmem:[#allocation30_spill] sm:$0xff] %v7187_v26  ;;  %v3236_v19 = vadd.f32 %v3076_v13, %v2916_v30  ;;  %v2268_v52 = vadd.f32 %v5182_v0, %v6881_v1  ;;  %v2262_v7 = vpop.f32.mrb[37].mxu0  ;;  %v1139_v54 = vpop.permute.xlu1 %1138  ;;  %v718_v1 = vld [vmem:[%s7525_s2 + $0x498] sm:$0xff] }
 0x186   : > { %v3235_v47 = vadd.f32 %v3075_v34, %v2915_v57  ;;  %v2263_v42 = vadd.f32 %v2262_v7, %v6883_v4  ;;  %v2488_v48 = vadd.f32 %v6990_v61, %v1139_v54  ;;  %v1134_v41 = vpop.permute.xlu0 %1133  ;;  %1458 = vperm.xlu1 %5571, %v716_v3   ;;  %v7196_v13 = vpop.f32.mrb[26].mxu1  ;;  %v3121_v34 = vld [vmem:[#allocation2 + $0x280] sm:$0xff]  ;;  %v717_v3 = vld [vmem:[%s7525_s2 + $0x490] sm:$0xff] }
 0x187   : > { %3396 = vst [vmem:[#allocation2 + $0x118] sm:$0xff] %v3236_v19  ;;  %v2918_v38 = vmax.f32 %v2268_v52, 0.0  ;;  %v2483_v14 = vadd.f32 %v6995_v16, %v1134_v41  ;;  %1453 = vperm.xlu0 %5570, %v715_v60   ;;  %7557 = vst [vmem:[#allocation31_spill] sm:$0xff] %v7196_v13  ;;  %v7201_v57 = vpop.f32.mrb[27].mxu1  ;;  %v3080_v41 = vld [vmem:[#allocation2 + $0x138] sm:$0xff] }
 0x188   : > { %3395 = vst [vmem:[#allocation2 + $0x110] sm:$0xff] %v3235_v47  ;;  %v2917_v30 = vmax.f32 %v2263_v42, 0.0  ;;  %v2962_v4 = vmax.f32 %v2488_v48, 0.0  ;;  %v5185_v61 = vpop.f32.mrb[38].mxu0  ;;  %7558 = vst [vmem:[#allocation32_spill] sm:$0xff] %v7201_v57  ;;  %v3124_v57 = vld [vmem:[#allocation2 + $0x298] sm:$0xff] }
 0x189   : > { %v3238_v0 = vadd.f32 %v3078_v11, %v2918_v38  ;;  %v2961_v16 = vmax.f32 %v2483_v14, 0.0  ;;  %v2278_v60 = vadd.f32 %v5185_v61, %v6891_v9  ;;  %v2272_v19 = vpop.f32.mrb[39].mxu0  ;;  %v1149_v52 = vpop.permute.xlu1 %1148  ;;  %v720_v9 = vld [vmem:[%s7525_s2 + $0x4a8] sm:$0xff]  ;;  %v719_v38 = vld [vmem:[%s7525_s2 + $0x4a0] sm:$0xff] }
 0x18a   : > { %v3237_v7 = vadd.f32 %v3077_v22, %v2917_v30  ;;  %v3282_v54 = vadd.f32 %v3122_v18, %v2962_v4  ;;  %v2273_v42 = vadd.f32 %v2272_v19, %v6893_v12  ;;  %v2498_v48 = vadd.f32 %v7006_v56, %v1149_v52  ;;  %v1144_v47 = vpop.permute.xlu0 %1143  ;;  %1468 = vperm.xlu1 %5571, %v718_v1   ;;  %v7210_v18 = vpop.f32.mrb[28].mxu1  ;;  %v3123_v22 = vld [vmem:[#allocation2 + $0x290] sm:$0xff] }
 0x18b   : > { %3398 = vst [vmem:[#allocation2 + $0x128] sm:$0xff] %v3238_v0  ;;  %v3281_v13 = vadd.f32 %v3121_v34, %v2961_v16  ;;  %v2920_v26 = vmax.f32 %v2278_v60, 0.0  ;;  %v2493_v14 = vadd.f32 %v7011_v21, %v1144_v47  ;;  %1463 = vperm.xlu0 %5570, %v717_v3   ;;  %v7215_v1 = vpop.f32.mrb[29].mxu1  ;;  %v3082_v16 = vld [vmem:[#allocation2 + $0x148] sm:$0xff] }
 0x18c   : > { %3397 = vst [vmem:[#allocation2 + $0x120] sm:$0xff] %v3237_v7  ;;  %3442 = vst [vmem:[#allocation2 + $0x288] sm:$0xff] %v3282_v54  ;;  %v2919_v12 = vmax.f32 %v2273_v42, 0.0  ;;  %v2964_v56 = vmax.f32 %v2498_v48, 0.0  ;;  %v5188_v11 = vpop.f32.mrb[40].mxu0  ;;  %v3081_v42 = vld [vmem:[#allocation2 + $0x140] sm:$0xff] }
 0x18d   : > { %3441 = vst [vmem:[#allocation2 + $0x280] sm:$0xff] %v3281_v13  ;;  %v3240_v21 = vadd.f32 %v3080_v41, %v2920_v26  ;;  %v2963_v30 = vmax.f32 %v2493_v14, 0.0  ;;  %v2288_v4 = vadd.f32 %v5188_v11, %v6901_v17  ;;  %v2282_v34 = vpop.f32.mrb[41].mxu0  ;;  %v1159_v61 = vpop.permute.xlu1 %1158  ;;  %v3126_v13 = vld [vmem:[#allocation2 + $0x2a8] sm:$0xff]  ;;  %v722_v17 = vld [vmem:[%s7525_s2 + $0x4b8] sm:$0xff]  ;;  %v721_v48 = vld [vmem:[%s7525_s2 + $0x4b0] sm:$0xff] }
 0x18e   : > { %v3239_v3 = vadd.f32 %v3079_v10, %v2919_v12  ;;  %v3284_v0 = vadd.f32 %v3124_v57, %v2964_v56  ;;  %v2283_v60 = vadd.f32 %v2282_v34, %v6903_v20  ;;  %v2508_v19 = vadd.f32 %v7022_v46, %v1159_v61  ;;  %v1154_v52 = vpop.permute.xlu0 %1153  ;;  %1478 = vperm.xlu1 %5571, %v720_v9   ;;  %v7224_v10 = vpop.f32.mrb[30].mxu1  ;;  %v3125_v57 = vld [vmem:[#allocation2 + $0x2a0] sm:$0xff] }
 0x18f   : > { %3400 = vst [vmem:[#allocation2 + $0x138] sm:$0xff] %v3240_v21  ;;  %v3283_v7 = vadd.f32 %v3123_v22, %v2963_v30  ;;  %v2922_v54 = vmax.f32 %v2288_v4, 0.0  ;;  %v2503_v26 = vadd.f32 %v7027_v50, %v1154_v52  ;;  %1473 = vperm.xlu0 %5570, %v719_v38   ;;  %v7229_v47 = vpop.f32.mrb[31].mxu1  ;;  %v3084_v38 = vld [vmem:[#allocation2 + $0x158] sm:$0xff] }
 0x190   : > { %3399 = vst [vmem:[#allocation2 + $0x130] sm:$0xff] %v3239_v3  ;;  %3444 = vst [vmem:[#allocation2 + $0x298] sm:$0xff] %v3284_v0  ;;  %v2921_v20 = vmax.f32 %v2283_v60, 0.0  ;;  %v2966_v46 = vmax.f32 %v2508_v19, 0.0  ;;  %v5191_v41 = vpop.f32.mrb[42].mxu0  ;;  %v3083_v3 = vld [vmem:[#allocation2 + $0x150] sm:$0xff] }
 0x191   : > { %3443 = vst [vmem:[#allocation2 + $0x290] sm:$0xff] %v3283_v7  ;;  %v3242_v50 = vadd.f32 %v3082_v16, %v2922_v54  ;;  %v2965_v14 = vmax.f32 %v2503_v26, 0.0  ;;  %v2298_v9 = vadd.f32 %v5191_v41, %v6911_v25  ;;  %v2292_v12 = vpop.f32.mrb[43].mxu0  ;;  %v1169_v56 = vpop.permute.xlu1 %1168  ;;  %v3128_v0 = vld [vmem:[#allocation2 + $0x2b8] sm:$0xff]  ;;  %v724_v25 = vld [vmem:[%s7525_s2 + $0x4c8] sm:$0xff]  ;;  %v3127_v19 = vld [vmem:[#allocation2 + $0x2b0] sm:$0xff] }
 0x192   : > { %v3241_v22 = vadd.f32 %v3081_v42, %v2921_v20  ;;  %v3286_v11 = vadd.f32 %v3126_v13, %v2966_v46  ;;  %v2293_v21 = vadd.f32 %v2292_v12, %v6913_v28  ;;  %v2518_v30 = vadd.f32 %v7038_v36, %v1169_v56  ;;  %v1164_v4 = vpop.permute.xlu0 %1163  ;;  %1488 = vperm.xlu1 %5571, %v722_v17   ;;  %v7238_v60 = vpop.f32.mrb[32].mxu1  ;;  %v723_v7 = vld [vmem:[%s7525_s2 + $0x4c0] sm:$0xff]  ;;  %v3130_v56 = vld [vmem:[#allocation2 + $0x2c8] sm:$0xff] }
 0x193   : > { %3402 = vst [vmem:[#allocation2 + $0x148] sm:$0xff] %v3242_v50  ;;  %v3285_v34 = vadd.f32 %v3125_v57, %v2965_v14  ;;  %v2924_v61 = vmax.f32 %v2298_v9, 0.0  ;;  %v2513_v16 = vadd.f32 %v7043_v39, %v1164_v4  ;;  %1483 = vperm.xlu0 %5570, %v721_v48   ;;  %v7243_v54 = vpop.f32.mrb[33].mxu1  ;;  %v3086_v57 = vld [vmem:[#allocation2 + $0x168] sm:$0xff]  ;;  %v3085_v12 = vld [vmem:[#allocation2 + $0x160] sm:$0xff] }
 0x194   : > { %3401 = vst [vmem:[#allocation2 + $0x140] sm:$0xff] %v3241_v22  ;;  %3446 = vst [vmem:[#allocation2 + $0x2a8] sm:$0xff] %v3286_v11  ;;  %v2923_v28 = vmax.f32 %v2293_v21, 0.0  ;;  %v2968_v36 = vmax.f32 %v2518_v30, 0.0  ;;  %v5194_v52 = vpop.f32.mrb[44].mxu0  ;;  %v7252_v11 = vpop.f32.mrb[34].mxu1 }
 0x195   : > { %3445 = vst [vmem:[#allocation2 + $0x2a0] sm:$0xff] %v3285_v34  ;;  %v3244_v39 = vadd.f32 %v3084_v38, %v2924_v61  ;;  %v2967_v42 = vmax.f32 %v2513_v16, 0.0  ;;  %v2308_v13 = vadd.f32 %v5194_v52, %v6922_v40  ;;  %v2302_v26 = vpop.f32.mrb[45].mxu0  ;;  %v1179_v17 = vpop.permute.xlu1 %1178  ;;  %v726_v40 = vld [vmem:[%s7525_s2 + $0x4d8] sm:$0xff]  ;;  %v3129_v38 = vld [vmem:[#allocation2 + $0x2c0] sm:$0xff]  ;;  %v725_v30 = vld [vmem:[%s7525_s2 + $0x4d0] sm:$0xff] }
 0x196   : > { %v3243_v20 = vadd.f32 %v3083_v3, %v2923_v28  ;;  %v3288_v46 = vadd.f32 %v3128_v0, %v2968_v36  ;;  %v2303_v41 = vadd.f32 %v2302_v26, %v6925_v49  ;;  %v2528_v48 = vadd.f32 %v7054_v24, %v1179_v17  ;;  %v1174_v50 = vpop.permute.xlu0 %1173  ;;  %1498 = vperm.xlu1 %5571, %v724_v25   ;;  %v7257_v4 = vpop.f32.mrb[35].mxu1  ;;  %v3088_v28 = vld [vmem:[#allocation2 + $0x178] sm:$0xff] }
 0x197   : > { %3404 = vst [vmem:[#allocation2 + $0x158] sm:$0xff] %v3244_v39  ;;  %v3287_v14 = vadd.f32 %v3127_v19, %v2967_v42  ;;  %v2926_v9 = vmax.f32 %v2308_v13, 0.0  ;;  %v2523_v22 = vadd.f32 %v7059_v32, %v1174_v50  ;;  %1493 = vperm.xlu0 %5570, %v723_v7   ;;  %v3087_v42 = vld [vmem:[#allocation2 + $0x170] sm:$0xff]  ;;  %v3132_v13 = vld [vmem:[#allocation2 + $0x2d8] sm:$0xff]  ;;  %v7266_v17 = vpop.f32.mrb[36].mxu1 }
 0x198   : > { %3403 = vst [vmem:[#allocation2 + $0x150] sm:$0xff] %v3243_v20  ;;  %3448 = vst [vmem:[#allocation2 + $0x2b8] sm:$0xff] %v3288_v46  ;;  %v2925_v49 = vmax.f32 %v2303_v41, 0.0  ;;  %v2970_v24 = vmax.f32 %v2528_v48, 0.0  ;;  %v5197_v21 = vpop.f32.mrb[46].mxu0  ;;  %v3131_v20 = vld [vmem:[#allocation2 + $0x2d0] sm:$0xff] }
 0x199   : > { %3447 = vst [vmem:[#allocation2 + $0x2b0] sm:$0xff] %v3287_v14  ;;  %v3246_v32 = vadd.f32 %v3086_v57, %v2926_v9  ;;  %v2969_v34 = vmax.f32 %v2523_v22, 0.0  ;;  %v2318_v61 = vadd.f32 %v5197_v21, %v6934_v15  ;;  %v2312_v3 = vpop.f32.mrb[47].mxu0  ;;  %v1189_v0 = vpop.permute.xlu1 %1188  ;;  %v728_v15 = vld [vmem:[%s7525_s2 + $0x4e8] sm:$0xff]  ;;  %v727_v57 = vld [vmem:[%s7525_s2 + $0x4e0] sm:$0xff] }
 0x19a   : > { %v3245_v16 = vadd.f32 %v3085_v12, %v2925_v49  ;;  %v3290_v25 = vadd.f32 %v3130_v56, %v2970_v24  ;;  %v2313_v36 = vadd.f32 %v2312_v3, %v6937_v31  ;;  %v2538_v19 = vadd.f32 %v7070_v29, %v1189_v0  ;;  %v1184_v52 = vpop.permute.xlu0 %1183  ;;  %1508 = vperm.xlu1 %5571, %v726_v40   ;;  %v7271_v41 = vpop.f32.mrb[37].mxu1  ;;  %v3090_v22 = vld [vmem:[#allocation2 + $0x188] sm:$0xff]  ;;  %v3133_v3 = vld [vmem:[#allocation2 + $0x2e0] sm:$0xff] }
 0x19b   : > { %3406 = vst [vmem:[#allocation2 + $0x168] sm:$0xff] %v3246_v32  ;;  %v3289_v7 = vadd.f32 %v3129_v38, %v2969_v34  ;;  %v2928_v39 = vmax.f32 %v2318_v61, 0.0  ;;  %v2533_v26 = vadd.f32 %v7075_v35, %v1184_v52  ;;  %1503 = vperm.xlu0 %5570, %v725_v30   ;;  %v3089_v30 = vld [vmem:[#allocation2 + $0x180] sm:$0xff]  ;;  %v3134_v32 = vld [vmem:[#allocation2 + $0x2e8] sm:$0xff]  ;;  %v7280_v61 = vpop.f32.mrb[38].mxu1 }
 0x19c   : > { %3405 = vst [vmem:[#allocation2 + $0x160] sm:$0xff] %v3245_v16  ;;  %3450 = vst [vmem:[#allocation2 + $0x2c8] sm:$0xff] %v3290_v25  ;;  %v2927_v31 = vmax.f32 %v2313_v36, 0.0  ;;  %v2972_v29 = vmax.f32 %v2538_v19, 0.0  ;;  %v5200_v46 = vpop.f32.mrb[48].mxu0  ;;  %v729_v16 = vld [vmem:[%s7525_s2 + $0x4f0] sm:$0xff] }
 0x19d   : > { %3449 = vst [vmem:[#allocation2 + $0x2c0] sm:$0xff] %v3289_v7  ;;  %v3248_v35 = vadd.f32 %v3088_v28, %v2928_v39  ;;  %v2971_v48 = vmax.f32 %v2533_v26, 0.0  ;;  %v2328_v50 = vadd.f32 %v5200_v46, %v6946_v55  ;;  %v2322_v14 = vpop.f32.mrb[49].mxu0  ;;  %v1199_v9 = vpop.permute.xlu1 %1198  ;;  %v730_v55 = vld [vmem:[%s7525_s2 + $0x4f8] sm:$0xff] }
 0x19e   : > { %v3247_v12 = vadd.f32 %v3087_v42, %v2927_v31  ;;  %v3292_v56 = vadd.f32 %v3132_v13, %v2972_v29  ;;  %v2323_v40 = vadd.f32 %v2322_v14, %v6949_v5  ;;  %v2548_v49 = vadd.f32 %v7086_v37, %v1199_v9  ;;  %v1194_v24 = vpop.permute.xlu0 %1193  ;;  %1518 = vperm.xlu1 %5571, %v728_v15   ;;  %v7285_v25 = vpop.f32.mrb[39].mxu1  ;;  %v3092_v42 = vld [vmem:[#allocation2 + $0x198] sm:$0xff] }
 0x19f   : > { %3408 = vst [vmem:[#allocation2 + $0x178] sm:$0xff] %v3248_v35  ;;  %v3291_v38 = vadd.f32 %v3131_v20, %v2971_v48  ;;  %v2930_v21 = vmax.f32 %v2328_v50, 0.0  ;;  %v2543_v34 = vadd.f32 %v7091_v43, %v1194_v24  ;;  %1513 = vperm.xlu0 %5570, %v727_v57   ;;  %v3091_v20 = vld [vmem:[#allocation2 + $0x190] sm:$0xff]  ;;  %v3136_v46 = vld [vmem:[#allocation2 + $0x2f8] sm:$0xff] }
 0x1a0   : > { %3407 = vst [vmem:[#allocation2 + $0x170] sm:$0xff] %v3247_v12  ;;  %3452 = vst [vmem:[#allocation2 + $0x2d8] sm:$0xff] %v3292_v56  ;;  %v2929_v5 = vmax.f32 %v2323_v40, 0.0  ;;  %v2974_v37 = vmax.f32 %v2548_v49, 0.0  ;;  %v5203_v0 = vpop.f32.mrb[50].mxu0  ;;  %v3135_v50 = vld [vmem:[#allocation2 + $0x2f0] sm:$0xff] }
 0x1a1   : > { %3451 = vst [vmem:[#allocation2 + $0x2d0] sm:$0xff] %v3291_v38  ;;  %v3250_v43 = vadd.f32 %v3090_v22, %v2930_v21  ;;  %v2973_v28 = vmax.f32 %v2543_v34, 0.0  ;;  %v2338_v36 = vadd.f32 %v5203_v0, %v6958_v33  ;;  %v2332_v19 = vpop.f32.mrb[51].mxu0  ;;  %v1209_v52 = vpop.permute.xlu1 %1208  ;;  %v3094_v49 = vld [vmem:[#allocation2 + $0x1a8] sm:$0xff]  ;;  %v3093_v34 = vld [vmem:[#allocation2 + $0x1a0] sm:$0xff] }
 0x1a2   : > { %v3249_v7 = vadd.f32 %v3089_v30, %v2929_v5  ;;  %v3294_v39 = vadd.f32 %v3134_v32, %v2974_v37  ;;  %v2333_v13 = vadd.f32 %v2332_v19, %v6961_v44  ;;  %v2558_v26 = vadd.f32 %v7102_v45, %v1209_v52  ;;  %v1204_v15 = vpop.permute.xlu0 %1203  ;;  %1528 = vperm.xlu1 %5571, %v730_v55   ;;  %v7291_v33 = vpop.f32.mrb[40].mxu1  ;;  %v3138_v55 = vld [vmem:[#allocation2 + $0x308] sm:$0xff]  ;;  %v3137_v0 = vld [vmem:[#allocation2 + $0x300] sm:$0xff] }
 0x1a3   : > { %3410 = vst [vmem:[#allocation2 + $0x188] sm:$0xff] %v3250_v43  ;;  %v3293_v31 = vadd.f32 %v3133_v3, %v2973_v28  ;;  %v2932_v29 = vmax.f32 %v2338_v36, 0.0  ;;  %v2553_v57 = vadd.f32 %v7107_v51, %v1204_v15  ;;  %1523 = vperm.xlu0 %5570, %v729_v16   ;;  %v7293_v14 = vpop.f32.mrb[41].mxu1 }
 0x1a4   : > { %3409 = vst [vmem:[#allocation2 + $0x180] sm:$0xff] %v3249_v7  ;;  %3454 = vst [vmem:[#allocation2 + $0x2e8] sm:$0xff] %v3294_v39  ;;  %v2931_v35 = vmax.f32 %v2333_v13, 0.0  ;;  %v2976_v48 = vmax.f32 %v2558_v26, 0.0  ;;  %v5206_v44 = vpop.f32.mrb[52].mxu0  ;;  %v7299_v37 = vpop.f32.mrb[42].mxu1 }
 0x1a5   : > { %3453 = vst [vmem:[#allocation2 + $0x2e0] sm:$0xff] %v3293_v31  ;;  %v3252_v45 = vadd.f32 %v3092_v42, %v2932_v29  ;;  %v2975_v9 = vmax.f32 %v2553_v57, 0.0  ;;  %v2348_v12 = vadd.f32 %v5206_v44, %v6970_v8  ;;  %v2342_v56 = vpop.f32.mrb[53].mxu0  ;;  %v1219_v22 = vpop.permute.xlu1 %1218  ;;  %v3095_v31 = vld [vmem:[#allocation2 + $0x1b0] sm:$0xff]  ;;  %v3140_v29 = vld [vmem:[#allocation2 + $0x318] sm:$0xff] }
 0x1a6   : > { %v3251_v40 = vadd.f32 %v3091_v20, %v2931_v35  ;;  %v3296_v51 = vadd.f32 %v3136_v46, %v2976_v48  ;;  %v2343_v24 = vadd.f32 %v2342_v56, %v6973_v23  ;;  %v2568_v38 = vadd.f32 %v7118_v53, %v1219_v22  ;;  %v1214_v21 = vpop.permute.xlu0 %1213  ;;  %v7301_v43 = vpop.f32.mrb[43].mxu1  ;;  %v3139_v35 = vld [vmem:[#allocation2 + $0x310] sm:$0xff]  ;;  %v7559_v22 = vld [vmem:[#allocation3_spill] sm:$0xff] }
 0x1a7   : > { %3412 = vst [vmem:[#allocation2 + $0x198] sm:$0xff] %v3252_v45  ;;  %v3295_v30 = vadd.f32 %v3135_v50, %v2975_v9  ;;  %v2934_v32 = vmax.f32 %v2348_v12, 0.0  ;;  %v2563_v5 = vadd.f32 %v7123_v58, %v1214_v21  ;;  %v3096_v58 = vld [vmem:[#allocation2 + $0x1b8] sm:$0xff]  ;;  %v7307_v46 = vpop.f32.mrb[44].mxu1  ;;  %v3097_v21 = vld [vmem:[#allocation2 + $0x1c0] sm:$0xff] }
 0x1a8   : > { %3411 = vst [vmem:[#allocation2 + $0x190] sm:$0xff] %v3251_v40  ;;  %3456 = vst [vmem:[#allocation2 + $0x2f8] sm:$0xff] %v3296_v51  ;;  %v2933_v8 = vmax.f32 %v2343_v24, 0.0  ;;  %v2978_v3 = vmax.f32 %v2568_v38, 0.0  ;;  %v5209_v16 = vpop.f32.mrb[54].mxu0  ;;  %v7309_v50 = vpop.f32.mrb[45].mxu1 }
 0x1a9   : > { %3455 = vst [vmem:[#allocation2 + $0x2f0] sm:$0xff] %v3295_v30  ;;  %v3254_v23 = vadd.f32 %v3094_v49, %v2934_v32  ;;  %v2977_v53 = vmax.f32 %v2563_v5, 0.0  ;;  %v2358_v28 = vadd.f32 %v5209_v16, %v6982_v59  ;;  %v2352_v36 = vpop.f32.mrb[55].mxu0  ;;  %v1229_v19 = vpop.permute.xlu1 %1228  ;;  %v3142_v30 = vld [vmem:[#allocation2 + $0x328] sm:$0xff]  ;;  %v7560_v32 = vld [vmem:[#allocation22_spill] sm:$0xff] }
 0x1aa   : > { %v3253_v52 = vadd.f32 %v3093_v34, %v2933_v8  ;;  %v3298_v7 = vadd.f32 %v3138_v55, %v2978_v3  ;;  %v2353_v39 = vadd.f32 %v2352_v36, %v6985_v63  ;;  %v2578_v42 = vadd.f32 %v7134_v62, %v1229_v19  ;;  %v1224_v13 = vpop.permute.xlu0 %1223  ;;  %v7315_v55 = vpop.f32.mrb[46].mxu1  ;;  %v3141_v8 = vld [vmem:[#allocation2 + $0x320] sm:$0xff] }
 0x1ab   : > { %3414 = vst [vmem:[#allocation2 + $0x1a8] sm:$0xff] %v3254_v23  ;;  %v3297_v26 = vadd.f32 %v3137_v0, %v2977_v53  ;;  %v2936_v15 = vmax.f32 %v2358_v28, 0.0  ;;  %v2573_v20 = vadd.f32 %v7139_v2, %v1224_v13  ;;  %v3098_v2 = vld [vmem:[#allocation2 + $0x1c8] sm:$0xff]  ;;  %v7317_v0 = vpop.f32.mrb[47].mxu1 }
 0x1ac   : > { %3413 = vst [vmem:[#allocation2 + $0x1a0] sm:$0xff] %v3253_v52  ;;  %3458 = vst [vmem:[#allocation2 + $0x308] sm:$0xff] %v3298_v7  ;;  %v2935_v59 = vmax.f32 %v2353_v39, 0.0  ;;  %v2980_v57 = vmax.f32 %v2578_v42, 0.0  ;;  %v5212_v48 = vpop.f32.mrb[56].mxu0  ;;  %v7561_v23 = vld [vmem:[#allocation4_spill] sm:$0xff] }
 0x1ad   : > { %3457 = vst [vmem:[#allocation2 + $0x300] sm:$0xff] %v3297_v26  ;;  %v3256_v63 = vadd.f32 %v3096_v58, %v2936_v15  ;;  %v2979_v62 = vmax.f32 %v2573_v20, 0.0  ;;  %v2368_v44 = vadd.f32 %v5212_v48, %v6998_v27  ;;  %v2362_v45 = vpop.f32.mrb[57].mxu0  ;;  %v1239_v9 = vpop.permute.xlu1 %1238  ;;  %v3100_v7 = vld [vmem:[#allocation2 + $0x1d8] sm:$0xff]  ;;  %v7562_v58 = vld [vmem:[#allocation5_spill] sm:$0xff] }
 0x1ae   : > { %v3255_v12 = vadd.f32 %v3095_v31, %v2935_v59  ;;  %v3300_v56 = vadd.f32 %v3140_v29, %v2980_v57  ;;  %v2363_v40 = vadd.f32 %v2362_v45, %v7559_v22  ;;  %v2588_v51 = vadd.f32 %v7150_v6, %v1239_v9  ;;  %v1234_v49 = vpop.permute.xlu0 %1233  ;;  %v7563_v42 = vld [vmem:[#allocation25_spill] sm:$0xff]  ;;  %v3144_v20 = vld [vmem:[#allocation2 + $0x338] sm:$0xff] }
 0x1af   : > { %3416 = vst [vmem:[#allocation2 + $0x1b8] sm:$0xff] %v3256_v63  ;;  %v3299_v24 = vadd.f32 %v3139_v35, %v2979_v62  ;;  %v2938_v38 = vmax.f32 %v2368_v44, 0.0  ;;  %v2583_v34 = vadd.f32 %v7560_v32, %v1234_v49  ;;  %v3099_v29 = vld [vmem:[#allocation2 + $0x1d0] sm:$0xff]  ;;  %v7564_v59 = vld [vmem:[#allocation26_spill] sm:$0xff]  ;;  %v7323_v35 = vpop.f32.mrb[48].mxu1 }
 0x1b0   : > { %3415 = vst [vmem:[#allocation2 + $0x1b0] sm:$0xff] %v3255_v12  ;;  %3460 = vst [vmem:[#allocation2 + $0x318] sm:$0xff] %v3300_v56  ;;  %v2937_v27 = vmax.f32 %v2363_v40, 0.0  ;;  %v2982_v5 = vmax.f32 %v2588_v51, 0.0  ;;  %v5215_v3 = vpop.f32.mrb[58].mxu0  ;;  %v3143_v62 = vld [vmem:[#allocation2 + $0x330] sm:$0xff] }
 0x1b1   : > { %3459 = vst [vmem:[#allocation2 + $0x310] sm:$0xff] %v3299_v24  ;;  %v3258_v6 = vadd.f32 %v3098_v2, %v2938_v38  ;;  %v2981_v16 = vmax.f32 %v2583_v34, 0.0  ;;  %v2378_v53 = vadd.f32 %v5215_v3, %v7561_v23  ;;  %v2372_v28 = vpop.f32.mrb[59].mxu0  ;;  %v1249_v36 = vpop.permute.xlu1 %1248  ;;  %v7565_v56 = vld [vmem:[#allocation6_spill] sm:$0xff]  ;;  %v3102_v24 = vld [vmem:[#allocation2 + $0x1e8] sm:$0xff]  ;;  %v7566_v38 = vld [vmem:[#allocation7_spill] sm:$0xff] }
 0x1b2   : > { %v3257_v19 = vadd.f32 %v3097_v21, %v2937_v27  ;;  %v3302_v52 = vadd.f32 %v3142_v30, %v2982_v5  ;;  %v2373_v39 = vadd.f32 %v2372_v28, %v7562_v58  ;;  %v2598_v13 = vadd.f32 %v7563_v42, %v1249_v36  ;;  %v1244_v26 = vpop.permute.xlu0 %1243  ;;  %v7325_v45 = vpop.f32.mrb[49].mxu1  ;;  %v7567_v30 = vld [vmem:[#allocation29_spill] sm:$0xff]  ;;  %v3146_v3 = vld [vmem:[#allocation2 + $0x348] sm:$0xff]  ;;  %v3145_v36 = vld [vmem:[#allocation2 + $0x340] sm:$0xff] }
 0x1b3   : > { %3418 = vst [vmem:[#allocation2 + $0x1c8] sm:$0xff] %v3258_v6  ;;  %v3301_v15 = vadd.f32 %v3141_v8, %v2981_v16  ;;  %v2940_v31 = vmax.f32 %v2378_v53, 0.0  ;;  %v2593_v57 = vadd.f32 %v7564_v59, %v1244_v26  ;;  %v3101_v8 = vld [vmem:[#allocation2 + $0x1e0] sm:$0xff]  ;;  %v7568_v6 = vld [vmem:[#allocation30_spill] sm:$0xff]  ;;  %v7331_v23 = vpop.f32.mrb[50].mxu1 }
 0x1b4   : > { %3417 = vst [vmem:[#allocation2 + $0x1c0] sm:$0xff] %v3257_v19  ;;  %3462 = vst [vmem:[#allocation2 + $0x328] sm:$0xff] %v3302_v52  ;;  %v2939_v48 = vmax.f32 %v2373_v39, 0.0  ;;  %v2984_v63 = vmax.f32 %v2598_v13, 0.0  ;;  %v5218_v44 = vpop.f32.mrb[60].mxu0  ;;  %v7333_v52 = vpop.f32.mrb[51].mxu1 }
 0x1b5   : > { %3461 = vst [vmem:[#allocation2 + $0x320] sm:$0xff] %v3301_v15  ;;  %v3260_v9 = vadd.f32 %v3100_v7, %v2940_v31  ;;  %v2983_v12 = vmax.f32 %v2593_v57, 0.0  ;;  %v2388_v2 = vadd.f32 %v5218_v44, %v7565_v56  ;;  %v2382_v22 = vpop.f32.mrb[61].mxu0  ;;  %v1259_v40 = vpop.permute.xlu1 %1258  ;;  %v7569_v39 = vld [vmem:[#allocation8_spill] sm:$0xff]  ;;  %v7571_v57 = vld [vmem:[#allocation31_spill] sm:$0xff] }
 0x1b6   : > { %v3259_v51 = vadd.f32 %v3099_v29, %v2939_v48  ;;  %v3304_v49 = vadd.f32 %v3144_v20, %v2984_v63  ;;  %v2383_v21 = vadd.f32 %v2382_v22, %v7566_v38  ;;  %v2608_v32 = vadd.f32 %v7567_v30, %v1259_v40  ;;  %v1254_v34 = vpop.permute.xlu0 %1253  ;;  %v3104_v29 = vld [vmem:[#allocation2 + $0x1f8] sm:$0xff]  ;;  %v7570_v20 = vld [vmem:[#allocation9_spill] sm:$0xff]  ;;  %v7572_v56 = vld [vmem:[#allocation32_spill] sm:$0xff]  ;;  %v7339_v22 = vpop.f32.mrb[52].mxu1 }
 0x1b7   : > { %3420 = vst [vmem:[#allocation2 + $0x1d8] sm:$0xff] %v3260_v9  ;;  %v3303_v27 = vadd.f32 %v3143_v62, %v2983_v12  ;;  %v2942_v5 = vmax.f32 %v2388_v2, 0.0  ;;  %v2603_v16 = vadd.f32 %v7568_v6, %v1254_v34  ;;  %v3103_v9 = vld [vmem:[#allocation2 + $0x1f0] sm:$0xff]  ;;  %v3148_v12 = vld [vmem:[#allocation2 + $0x358] sm:$0xff]  ;;  %v7341_v38 = vpop.f32.mrb[53].mxu1  ;;  %v3106_v6 = vld [vmem:[#allocation2 + $0x208] sm:$0xff] }
 0x1b8   : > { %3419 = vst [vmem:[#allocation2 + $0x1d0] sm:$0xff] %v3259_v51  ;;  %3464 = vst [vmem:[#allocation2 + $0x338] sm:$0xff] %v3304_v49  ;;  %v2941_v53 = vmax.f32 %v2383_v21, 0.0  ;;  %v2986_v28 = vmax.f32 %v2608_v32, 0.0  ;;  %v5221_v19 = vpop.f32.mrb[62].mxu0  ;;  %v3147_v49 = vld [vmem:[#allocation2 + $0x350] sm:$0xff] }
 0x1b9   : > { %3463 = vst [vmem:[#allocation2 + $0x330] sm:$0xff] %v3303_v27  ;;  %v3262_v7 = vadd.f32 %v3102_v24, %v2942_v5  ;;  %v2985_v58 = vmax.f32 %v2603_v16, 0.0  ;;  %v2398_v42 = vadd.f32 %v5221_v19, %v7569_v39  ;;  %v2392_v13 = vpop.f32.mrb[63].mxu0  ;;  %v1269_v26 = vpop.permute.xlu1 %1268  ;;  %v7573_v32 = vld [vmem:[#allocation10_spill] sm:$0xff]  ;;  %v7574_v16 = vld [vmem:[#allocation11_spill] sm:$0xff]  ;;  %v3150_v39 = vld [vmem:[#allocation2 + $0x368] sm:$0xff] }
 0x1ba   : > { %v3261_v15 = vadd.f32 %v3101_v8, %v2941_v53  ;;  %v3306_v31 = vadd.f32 %v3146_v3, %v2986_v28  ;;  %v2393_v59 = vadd.f32 %v2392_v13, %v7570_v20  ;;  %v2618_v48 = vadd.f32 %v7571_v57, %v1269_v26  ;;  %v1264_v63 = vpop.permute.xlu0 %1263  ;;  %v7347_v13 = vpop.f32.mrb[54].mxu1  ;;  %v7575_v57 = vld [vmem:[#allocation12_spill] sm:$0xff] }
 0x1bb   : > { %3422 = vst [vmem:[#allocation2 + $0x1e8] sm:$0xff] %v3262_v7  ;;  %v3305_v62 = vadd.f32 %v3145_v36, %v2985_v58  ;;  %v2944_v44 = vmax.f32 %v2398_v42, 0.0  ;;  %v2613_v2 = vadd.f32 %v7572_v56, %v1264_v63  ;;  %v3105_v58 = vld [vmem:[#allocation2 + $0x200] sm:$0xff]  ;;  %v7349_v20 = vpop.f32.mrb[55].mxu1 }
 0x1bc   : > { %3421 = vst [vmem:[#allocation2 + $0x1e0] sm:$0xff] %v3261_v15  ;;  %3466 = vst [vmem:[#allocation2 + $0x348] sm:$0xff] %v3306_v31  ;;  %v2943_v40 = vmax.f32 %v2393_v59, 0.0  ;;  %v2988_v51 = vmax.f32 %v2618_v48, 0.0  ;;  %v5224_v24 = vpop.f32.mrb[64].mxu0  ;;  %v3149_v31 = vld [vmem:[#allocation2 + $0x360] sm:$0xff] }
 0x1bd   : > { %3465 = vst [vmem:[#allocation2 + $0x340] sm:$0xff] %v3305_v62  ;;  %v3264_v21 = vadd.f32 %v3104_v29, %v2944_v44  ;;  %v2987_v30 = vmax.f32 %v2613_v2, 0.0  ;;  %v2408_v34 = vadd.f32 %v5224_v24, %v7573_v32  ;;  %v2402_v27 = vpop.f32.mrb[65].mxu0  ;;  %v1279_v5 = vpop.permute.xlu1 %1278  ;;  %v3107_v24 = vld [vmem:[#allocation2 + $0x210] sm:$0xff] }
 0x1be   : > { %v3263_v8 = vadd.f32 %v3103_v9, %v2943_v40  ;;  %v3308_v3 = vadd.f32 %v3148_v12, %v2988_v51  ;;  %v2403_v53 = vadd.f32 %v2402_v27, %v7574_v16  ;;  %v2628_v28 = vadd.f32 %v7210_v18, %v1279_v5  ;;  %v1274_v36 = vpop.permute.xlu0 %1273  ;;  %v7576_v12 = vld [vmem:[#allocation13_spill] sm:$0xff]  ;;  %v7355_v32 = vpop.f32.mrb[56].mxu1  ;;  %v7577_v16 = vld [vmem:[#allocation14_spill] sm:$0xff] }
 0x1bf   : > { %3424 = vst [vmem:[#allocation2 + $0x1f8] sm:$0xff] %v3264_v21  ;;  %v3307_v19 = vadd.f32 %v3147_v49, %v2987_v30  ;;  %v2946_v7 = vmax.f32 %v2408_v34, 0.0  ;;  %v2623_v42 = vadd.f32 %v7215_v1, %v1274_v36  ;;  %v3108_v1 = vld [vmem:[#allocation2 + $0x218] sm:$0xff]  ;;  %v3151_v5 = vld [vmem:[#allocation2 + $0x370] sm:$0xff] }
 0x1c0   : > { %3423 = vst [vmem:[#allocation2 + $0x1f0] sm:$0xff] %v3263_v8  ;;  %3468 = vst [vmem:[#allocation2 + $0x358] sm:$0xff] %v3308_v3  ;;  %v2945_v26 = vmax.f32 %v2403_v53, 0.0  ;;  %v2990_v15 = vmax.f32 %v2628_v28, 0.0  ;;  %v5227_v29 = vpop.f32.mrb[66].mxu0  ;;  %v3152_v21 = vld [vmem:[#allocation2 + $0x378] sm:$0xff] }
 0x1c1   : > { %3467 = vst [vmem:[#allocation2 + $0x350] sm:$0xff] %v3307_v19  ;;  %v3266_v18 = vadd.f32 %v3106_v6, %v2946_v7  ;;  %v2989_v59 = vmax.f32 %v2623_v42, 0.0  ;;  %v2418_v48 = vadd.f32 %v5227_v29, %v7575_v57  ;;  %v2412_v63 = vpop.f32.mrb[67].mxu0  ;;  %v1289_v62 = vpop.permute.xlu1 %1288  ;;  %v3109_v29 = vld [vmem:[#allocation2 + $0x220] sm:$0xff] }
 0x1c2   : > { %v3265_v44 = vadd.f32 %v3105_v58, %v2945_v26  ;;  %v3310_v9 = vadd.f32 %v3150_v39, %v2990_v15  ;;  %v2413_v56 = vadd.f32 %v2412_v63, %v7576_v12  ;;  %v2638_v2 = vadd.f32 %v7224_v10, %v1289_v62  ;;  %v1284_v40 = vpop.permute.xlu0 %1283  ;;  %v7357_v3 = vpop.f32.mrb[57].mxu1  ;;  %v7578_v58 = vld [vmem:[#allocation15_spill] sm:$0xff]  ;;  %v7579_v12 = vld [vmem:[#allocation16_spill] sm:$0xff] }
 0x1c3   : > { %3426 = vst [vmem:[#allocation2 + $0x208] sm:$0xff] %v3266_v18  ;;  %v3309_v51 = vadd.f32 %v3149_v31, %v2989_v59  ;;  %v2948_v49 = vmax.f32 %v2418_v48, 0.0  ;;  %v2633_v30 = vadd.f32 %v7229_v47, %v1284_v40  ;;  %v3110_v47 = vld [vmem:[#allocation2 + $0x228] sm:$0xff]  ;;  %v7363_v57 = vpop.f32.mrb[58].mxu1  ;;  %v3153_v62 = vld [vmem:[#allocation2 + $0x380] sm:$0xff] }
 0x1c4   : > { %3425 = vst [vmem:[#allocation2 + $0x200] sm:$0xff] %v3265_v44  ;;  %3470 = vst [vmem:[#allocation2 + $0x368] sm:$0xff] %v3310_v9  ;;  %v2947_v34 = vmax.f32 %v2413_v56, 0.0  ;;  %v2992_v27 = vmax.f32 %v2638_v2, 0.0  ;;  %v5230_v8 = vpop.f32.mrb[68].mxu0  ;;  %v3154_v18 = vld [vmem:[#allocation2 + $0x388] sm:$0xff] }
 0x1c5   : > { %3469 = vst [vmem:[#allocation2 + $0x360] sm:$0xff] %v3309_v51  ;;  %v3268_v10 = vadd.f32 %v3108_v1, %v2948_v49  ;;  %v2991_v6 = vmax.f32 %v2633_v30, 0.0  ;;  %v2428_v53 = vadd.f32 %v5230_v8, %v7577_v16  ;;  %v2422_v28 = vpop.f32.mrb[69].mxu0  ;;  %v1299_v36 = vpop.permute.xlu1 %1298  ;;  %v3111_v8 = vld [vmem:[#allocation2 + $0x230] sm:$0xff] }
 0x1c6   : > { %v3267_v19 = vadd.f32 %v3107_v24, %v2947_v34  ;;  %v3312_v7 = vadd.f32 %v3152_v21, %v2992_v27  ;;  %v2423_v39 = vadd.f32 %v2422_v28, %v7578_v58  ;;  %v2648_v42 = vadd.f32 %v7238_v60, %v1299_v36  ;;  %v1294_v26 = vpop.permute.xlu0 %1293  ;;  %v7365_v9 = vpop.f32.mrb[59].mxu1  ;;  %v7580_v24 = vld [vmem:[#allocation17_spill] sm:$0xff]  ;;  %v7581_v58 = vld [vmem:[#allocation18_spill] sm:$0xff] }
 0x1c7   : > { %3428 = vst [vmem:[#allocation2 + $0x218] sm:$0xff] %v3268_v10  ;;  %v3311_v15 = vadd.f32 %v3151_v5, %v2991_v6  ;;  %v2950_v31 = vmax.f32 %v2428_v53, 0.0  ;;  %v2643_v59 = vadd.f32 %v7243_v54, %v1294_v26  ;;  %v3112_v54 = vld [vmem:[#allocation2 + $0x238] sm:$0xff]  ;;  %v7371_v16 = vpop.f32.mrb[60].mxu1  ;;  %v3155_v36 = vld [vmem:[#allocation2 + $0x390] sm:$0xff] }
 0x1c8   : > { %3427 = vst [vmem:[#allocation2 + $0x210] sm:$0xff] %v3267_v19  ;;  %3472 = vst [vmem:[#allocation2 + $0x378] sm:$0xff] %v3312_v7  ;;  %v2949_v48 = vmax.f32 %v2423_v39, 0.0  ;;  %v2994_v63 = vmax.f32 %v2648_v42, 0.0  ;;  %v5233_v44 = vpop.f32.mrb[70].mxu0  ;;  %v3156_v10 = vld [vmem:[#allocation2 + $0x398] sm:$0xff] }
 0x1c9   : > { %3471 = vst [vmem:[#allocation2 + $0x370] sm:$0xff] %v3311_v15  ;;  %v3270_v60 = vadd.f32 %v3110_v47, %v2950_v31  ;;  %v2993_v1 = vmax.f32 %v2643_v59, 0.0  ;;  %v2438_v56 = vadd.f32 %v5233_v44, %v7579_v12  ;;  %v2432_v2 = vpop.f32.mrb[71].mxu0  ;;  %v1309_v40 = vpop.permute.xlu1 %1308  ;;  %v3113_v44 = vld [vmem:[#allocation2 + $0x240] sm:$0xff] }
 0x1ca   : > { %v3269_v51 = vadd.f32 %v3109_v29, %v2949_v48  ;;  %v3314_v49 = vadd.f32 %v3154_v18, %v2994_v63  ;;  %v2433_v21 = vadd.f32 %v2432_v2, %v7580_v24  ;;  %v2658_v30 = vadd.f32 %v7252_v11, %v1309_v40  ;;  %v1304_v34 = vpop.permute.xlu0 %1303  ;;  %v7373_v7 = vpop.f32.mrb[61].mxu1  ;;  %v7582_v29 = vld [vmem:[#allocation19_spill] sm:$0xff]  ;;  %v7583_v24 = vld [vmem:[#allocation20_spill] sm:$0xff] }
 0x1cb   : > { %3430 = vst [vmem:[#allocation2 + $0x228] sm:$0xff] %v3270_v60  ;;  %v3313_v27 = vadd.f32 %v3153_v62, %v2993_v1  ;;  %v2952_v5 = vmax.f32 %v2438_v56, 0.0  ;;  %v2653_v6 = vadd.f32 %v7257_v4, %v1304_v34  ;;  %v3114_v4 = vld [vmem:[#allocation2 + $0x248] sm:$0xff]  ;;  %v7379_v12 = vpop.f32.mrb[62].mxu1  ;;  %v3157_v40 = vld [vmem:[#allocation2 + $0x3a0] sm:$0xff] }
 0x1cc   : > { %3429 = vst [vmem:[#allocation2 + $0x220] sm:$0xff] %v3269_v51  ;;  %3474 = vst [vmem:[#allocation2 + $0x388] sm:$0xff] %v3314_v49  ;;  %v2951_v53 = vmax.f32 %v2433_v21, 0.0  ;;  %v2996_v28 = vmax.f32 %v2658_v30, 0.0  ;;  %v5236_v19 = vpop.f32.mrb[72].mxu0  ;;  %v3158_v60 = vld [vmem:[#allocation2 + $0x3a8] sm:$0xff] }
 0x1cd   : > { %3473 = vst [vmem:[#allocation2 + $0x380] sm:$0xff] %v3313_v27  ;;  %v3272_v11 = vadd.f32 %v3112_v54, %v2952_v5  ;;  %v2995_v47 = vmax.f32 %v2653_v6, 0.0  ;;  %v2448_v39 = vadd.f32 %v5236_v19, %v7581_v58  ;;  %v2442_v42 = vpop.f32.mrb[73].mxu0  ;;  %v1319_v26 = vpop.permute.xlu1 %1318  ;;  %v3115_v19 = vld [vmem:[#allocation2 + $0x250] sm:$0xff] }
 0x1ce   : > { %v3271_v15 = vadd.f32 %v3111_v8, %v2951_v53  ;;  %v3316_v31 = vadd.f32 %v3156_v10, %v2996_v28  ;;  %v2443_v18 = vadd.f32 %v2442_v42, %v7582_v29  ;;  %v2668_v59 = vadd.f32 %v7266_v17, %v1319_v26  ;;  %v1314_v48 = vpop.permute.xlu0 %1313  ;;  %v7381_v49 = vpop.f32.mrb[63].mxu1  ;;  %v7584_v8 = vld [vmem:[#allocation21_spill] sm:$0xff]  ;;  %v7585_v29 = vld [vmem:[#allocation23_spill] sm:$0xff] }
 0x1cf   : > { %3432 = vst [vmem:[#allocation2 + $0x238] sm:$0xff] %v3272_v11  ;;  %v3315_v63 = vadd.f32 %v3155_v36, %v2995_v47  ;;  %v2954_v62 = vmax.f32 %v2448_v39, 0.0  ;;  %v2663_v1 = vadd.f32 %v7271_v41, %v1314_v48  ;;  %v3116_v41 = vld [vmem:[#allocation2 + $0x258] sm:$0xff]  ;;  %v7387_v58 = vpop.f32.mrb[64].mxu1  ;;  %v3159_v26 = vld [vmem:[#allocation2 + $0x3b0] sm:$0xff] }
 0x1d0   : > { %3431 = vst [vmem:[#allocation2 + $0x230] sm:$0xff] %v3271_v15  ;;  %3476 = vst [vmem:[#allocation2 + $0x398] sm:$0xff] %v3316_v31  ;;  %v2953_v56 = vmax.f32 %v2443_v18, 0.0  ;;  %v2998_v2 = vmax.f32 %v2668_v59, 0.0  ;;  %v5239_v51 = vpop.f32.mrb[74].mxu0  ;;  %v3160_v11 = vld [vmem:[#allocation2 + $0x3b8] sm:$0xff] }
 0x1d1   : > { %3475 = vst [vmem:[#allocation2 + $0x390] sm:$0xff] %v3315_v63  ;;  %v3274_v17 = vadd.f32 %v3114_v4, %v2954_v62  ;;  %v2997_v54 = vmax.f32 %v2663_v1, 0.0  ;;  %v2458_v21 = vadd.f32 %v5239_v51, %v7583_v24  ;;  %v2452_v30 = vpop.f32.mrb[75].mxu0  ;;  %v1329_v34 = vpop.permute.xlu1 %1328  ;;  %v3117_v51 = vld [vmem:[#allocation2 + $0x260] sm:$0xff] }
 0x1d2   : > { %v3273_v27 = vadd.f32 %v3113_v44, %v2953_v56  ;;  %v3318_v5 = vadd.f32 %v3158_v60, %v2998_v2  ;;  %v2453_v10 = vadd.f32 %v2452_v30, %v7584_v8  ;;  %v2678_v6 = vadd.f32 %v7280_v61, %v1329_v34  ;;  %v1324_v53 = vpop.permute.xlu0 %1323  ;;  %v7389_v31 = vpop.f32.mrb[65].mxu1  ;;  %v7586_v44 = vld [vmem:[#allocation24_spill] sm:$0xff]  ;;  %v3161_v34 = vld [vmem:[#allocation2 + $0x3c0] sm:$0xff] }
 0x1d3   : > { %3434 = vst [vmem:[#allocation2 + $0x248] sm:$0xff] %v3274_v17  ;;  %v3317_v28 = vadd.f32 %v3157_v40, %v2997_v54  ;;  %v2956_v36 = vmax.f32 %v2458_v21, 0.0  ;;  %v2673_v47 = vadd.f32 %v7285_v25, %v1324_v53  ;;  %v3118_v25 = vld [vmem:[#allocation2 + $0x268] sm:$0xff]  ;;  %v7395_v24 = vpop.f32.mrb[66].mxu1  ;;  %v7587_v8 = vld [vmem:[#allocation27_spill] sm:$0xff] }
 0x1d4   : > { %3433 = vst [vmem:[#allocation2 + $0x240] sm:$0xff] %v3273_v27  ;;  %3478 = vst [vmem:[#allocation2 + $0x3a8] sm:$0xff] %v3318_v5  ;;  %v2955_v39 = vmax.f32 %v2453_v10, 0.0  ;;  %v3000_v42 = vmax.f32 %v2678_v6, 0.0  ;;  %v5242_v15 = vpop.f32.mrb[76].mxu0  ;;  %v3162_v17 = vld [vmem:[#allocation2 + $0x3c8] sm:$0xff] }
 0x1d5   : > { %3477 = vst [vmem:[#allocation2 + $0x3a0] sm:$0xff] %v3317_v28  ;;  %v3276_v61 = vadd.f32 %v3116_v41, %v2956_v36  ;;  %v2999_v4 = vmax.f32 %v2673_v47, 0.0  ;;  %v2468_v18 = vadd.f32 %v5242_v15, %v7585_v29  ;;  %v2462_v59 = vpop.f32.mrb[77].mxu0  ;;  %v1339_v48 = vpop.permute.xlu1 %1338  ;;  %v3119_v15 = vld [vmem:[#allocation2 + $0x270] sm:$0xff] }
 0x1d6   : > { %v3275_v63 = vadd.f32 %v3115_v19, %v2955_v39  ;;  %v3320_v62 = vadd.f32 %v3160_v11, %v3000_v42  ;;  %v2463_v60 = vadd.f32 %v2462_v59, %v7586_v44  ;;  %v2688_v1 = vadd.f32 %v7291_v33, %v1339_v48  ;;  %v1334_v56 = vpop.permute.xlu0 %1333  ;;  %v7397_v5 = vpop.f32.mrb[67].mxu1  ;;  %v7588_v19 = vld [vmem:[#allocation28_spill] sm:$0xff]  ;;  %v3163_v48 = vld [vmem:[#allocation2 + $0x3d0] sm:$0xff] }
 0x1d7   : > { %3436 = vst [vmem:[#allocation2 + $0x258] sm:$0xff] %v3276_v61  ;;  %v3319_v2 = vadd.f32 %v3159_v26, %v2999_v4  ;;  %v2958_v40 = vmax.f32 %v2468_v18, 0.0  ;;  %v2683_v54 = vadd.f32 %v7293_v14, %v1334_v56  ;;  %v3120_v14 = vld [vmem:[#allocation2 + $0x278] sm:$0xff]  ;;  %v7403_v29 = vpop.f32.mrb[68].mxu1 }
 0x1d8   : > { %3435 = vst [vmem:[#allocation2 + $0x250] sm:$0xff] %v3275_v63  ;;  %3480 = vst [vmem:[#allocation2 + $0x3b8] sm:$0xff] %v3320_v62  ;;  %v2957_v21 = vmax.f32 %v2463_v60, 0.0  ;;  %v3002_v30 = vmax.f32 %v2688_v1, 0.0  ;;  %v5245_v27 = vpop.f32.mrb[78].mxu0  ;;  %v3164_v61 = vld [vmem:[#allocation2 + $0x3d8] sm:$0xff] }
 0x1d9   : > { %3479 = vst [vmem:[#allocation2 + $0x3b0] sm:$0xff] %v3319_v2  ;;  %v3278_v33 = vadd.f32 %v3118_v25, %v2958_v40  ;;  %v3001_v41 = vmax.f32 %v2683_v54, 0.0  ;;  %v2478_v10 = vadd.f32 %v5245_v27, %v7587_v8  ;;  %v2472_v6 = vpop.f32.mrb[79].mxu0  ;;  %v1349_v53 = vpop.permute.xlu1 %1348  ;;  %v3166_v2 = vld [vmem:[#allocation2 + $0x3e8] sm:$0xff]  ;;  %v3165_v54 = vld [vmem:[#allocation2 + $0x3e0] sm:$0xff]  ;;  %v3168_v8 = vld [vmem:[#allocation2 + $0x3f8] sm:$0xff] }
 0x1da   : > { %v3277_v28 = vadd.f32 %v3117_v51, %v2957_v21  ;;  %v3322_v36 = vadd.f32 %v3162_v17, %v3002_v30  ;;  %v2473_v11 = vadd.f32 %v2472_v6, %v7588_v19  ;;  %v2698_v47 = vadd.f32 %v7299_v37, %v1349_v53  ;;  %v1344_v39 = vpop.permute.xlu0 %1343  ;;  %v7405_v63 = vpop.f32.mrb[69].mxu1  ;;  %v3167_v53 = vld [vmem:[#allocation2 + $0x3f0] sm:$0xff] }
 0x1db   : > { %3438 = vst [vmem:[#allocation2 + $0x268] sm:$0xff] %v3278_v33  ;;  %v3321_v42 = vadd.f32 %v3161_v34, %v3001_v41  ;;  %v2960_v26 = vmax.f32 %v2478_v10, 0.0  ;;  %v2693_v4 = vadd.f32 %v7301_v43, %v1344_v39  ;;  %v7409_v51 = vpop.f32.mrb[70].mxu1  ;;  %v3170_v39 = vld [vmem:[#allocation2 + $0x408] sm:$0xff] }
 0x1dc   : > { %3437 = vst [vmem:[#allocation2 + $0x260] sm:$0xff] %v3277_v28  ;;  %3482 = vst [vmem:[#allocation2 + $0x3c8] sm:$0xff] %v3322_v36  ;;  %v2959_v18 = vmax.f32 %v2473_v11, 0.0  ;;  %v3004_v59 = vmax.f32 %v2698_v47, 0.0  ;;  %v7411_v21 = vpop.f32.mrb[71].mxu1 }
 0x1dd   : > { %3481 = vst [vmem:[#allocation2 + $0x3c0] sm:$0xff] %v3321_v42  ;;  %v3280_v62 = vadd.f32 %v3120_v14, %v2960_v26  ;;  %v3003_v37 = vmax.f32 %v2693_v4, 0.0  ;;  %v1359_v25 = vpop.permute.xlu1 %1358 }
 0x1de   : > { %v3279_v44 = vadd.f32 %v3119_v15, %v2959_v18  ;;  %v3324_v60 = vadd.f32 %v3164_v61, %v3004_v59  ;;  %v2708_v1 = vadd.f32 %v7307_v46, %v1359_v25  ;;  %v1354_v56 = vpop.permute.xlu0 %1353  ;;  %v3169_v15 = vld [vmem:[#allocation2 + $0x400] sm:$0xff] }
 0x1df   : > { %3440 = vst [vmem:[#allocation2 + $0x278] sm:$0xff] %v3280_v62  ;;  %v3323_v43 = vadd.f32 %v3163_v48, %v3003_v37  ;;  %v2703_v40 = vadd.f32 %v7309_v50, %v1354_v56  ;;  %v7415_v50 = vpop.f32.mrb[72].mxu1  ;;  %v3172_v37 = vld [vmem:[#allocation2 + $0x418] sm:$0xff] }
 0x1e0   : > { %3439 = vst [vmem:[#allocation2 + $0x270] sm:$0xff] %v3279_v44  ;;  %3484 = vst [vmem:[#allocation2 + $0x3d8] sm:$0xff] %v3324_v60  ;;  %v3006_v17 = vmax.f32 %v2708_v1, 0.0  ;;  %v7417_v28 = vpop.f32.mrb[73].mxu1  ;;  %v3171_v60 = vld [vmem:[#allocation2 + $0x410] sm:$0xff] }
 0x1e1   : > { %3483 = vst [vmem:[#allocation2 + $0x3d0] sm:$0xff] %v3323_v43  ;;  %v3005_v30 = vmax.f32 %v2703_v40, 0.0  ;;  %v1369_v34 = vpop.permute.xlu1 %1368  ;;  %v7421_v26 = vpop.f32.mrb[74].mxu1 }
 0x1e2   : > { %v3326_v27 = vadd.f32 %v3166_v2, %v3006_v17  ;;  %v2718_v46 = vadd.f32 %v7315_v55, %v1369_v34  ;;  %v1364_v33 = vpop.permute.xlu0 %1363  ;;  %v7423_v61 = vpop.f32.mrb[75].mxu1 }
 0x1e3   : > { %v3325_v41 = vadd.f32 %v3165_v54, %v3005_v30  ;;  %v2713_v10 = vadd.f32 %v7317_v0, %v1364_v33  ;;  %v7427_v44 = vpop.f32.mrb[76].mxu1  ;;  %v3174_v54 = vld [vmem:[#allocation2 + $0x428] sm:$0xff] }
 0x1e4   : > { %3486 = vst [vmem:[#allocation2 + $0x3e8] sm:$0xff] %v3326_v27  ;;  %v3008_v6 = vmax.f32 %v2718_v46, 0.0  ;;  %v7429_v1 = vpop.f32.mrb[77].mxu1  ;;  %v3173_v27 = vld [vmem:[#allocation2 + $0x420] sm:$0xff] }
 0x1e5   : > { %3485 = vst [vmem:[#allocation2 + $0x3e0] sm:$0xff] %v3325_v41  ;;  %v3007_v36 = vmax.f32 %v2713_v10, 0.0  ;;  %v1379_v14 = vpop.permute.xlu1 %1378  ;;  %v7433_v34 = vpop.f32.mrb[78].mxu1 }
 0x1e6   : > { %v3328_v19 = vadd.f32 %v3168_v8, %v3008_v6  ;;  %v2728_v11 = vadd.f32 %v7323_v35, %v1379_v14  ;;  %v1374_v47 = vpop.permute.xlu0 %1373  ;;  %v7435_v46 = vpop.f32.mrb[79].mxu1  ;;  %v3175_v14 = vld [vmem:[#allocation2 + $0x430] sm:$0xff] }
 0x1e7   : > { %v3327_v55 = vadd.f32 %v3167_v53, %v3007_v36  ;;  %v2723_v42 = vadd.f32 %v7325_v45, %v1374_v47  ;;  %v3176_v53 = vld [vmem:[#allocation2 + $0x438] sm:$0xff] }
 0x1e8   : > { %3488 = vst [vmem:[#allocation2 + $0x3f8] sm:$0xff] %v3328_v19  ;;  %v3010_v0 = vmax.f32 %v2728_v11, 0.0 }
 0x1e9   : > { %3487 = vst [vmem:[#allocation2 + $0x3f0] sm:$0xff] %v3327_v55  ;;  %v3009_v4 = vmax.f32 %v2723_v42, 0.0  ;;  %v1389_v18 = vpop.permute.xlu1 %1388 }
 0x1ea   : > { %v3330_v59 = vadd.f32 %v3170_v39, %v3010_v0  ;;  %v2738_v48 = vadd.f32 %v7331_v23, %v1389_v18  ;;  %v1384_v62 = vpop.permute.xlu0 %1383  ;;  %v3178_v0 = vld [vmem:[#allocation2 + $0x448] sm:$0xff] }
 0x1eb   : > { %v3329_v35 = vadd.f32 %v3169_v15, %v3009_v4  ;;  %v2733_v25 = vadd.f32 %v7333_v52, %v1384_v62  ;;  %v3177_v4 = vld [vmem:[#allocation2 + $0x440] sm:$0xff] }
 0x1ec   : > { %3490 = vst [vmem:[#allocation2 + $0x408] sm:$0xff] %v3330_v59  ;;  %v3012_v45 = vmax.f32 %v2738_v48, 0.0 }
 0x1ed   : > { %3489 = vst [vmem:[#allocation2 + $0x400] sm:$0xff] %v3329_v35  ;;  %v3011_v56 = vmax.f32 %v2733_v25, 0.0  ;;  %v1399_v43 = vpop.permute.xlu1 %1398 }
 0x1ee   : > { %v3332_v2 = vadd.f32 %v3172_v37, %v3012_v45  ;;  %v2748_v40 = vadd.f32 %v7339_v22, %v1399_v43  ;;  %v1394_v17 = vpop.permute.xlu0 %1393  ;;  %v3180_v37 = vld [vmem:[#allocation2 + $0x458] sm:$0xff]  ;;  %v3179_v45 = vld [vmem:[#allocation2 + $0x450] sm:$0xff] }
 0x1ef   : > { %v3331_v23 = vadd.f32 %v3171_v60, %v3011_v56  ;;  %v2743_v30 = vadd.f32 %v7341_v38, %v1394_v17  ;;  %v3182_v17 = vld [vmem:[#allocation2 + $0x468] sm:$0xff] }
 0x1f0   : > { %3492 = vst [vmem:[#allocation2 + $0x418] sm:$0xff] %v3332_v2  ;;  %v3014_v52 = vmax.f32 %v2748_v40, 0.0 }
 0x1f1   : > { %3491 = vst [vmem:[#allocation2 + $0x410] sm:$0xff] %v3331_v23  ;;  %v3013_v33 = vmax.f32 %v2743_v30, 0.0  ;;  %v1409_v41 = vpop.permute.xlu1 %1408 }
 0x1f2   : > { %v3334_v8 = vadd.f32 %v3174_v54, %v3014_v52  ;;  %v2758_v10 = vadd.f32 %v7347_v13, %v1409_v41  ;;  %v1404_v6 = vpop.permute.xlu0 %1403  ;;  %v3181_v54 = vld [vmem:[#allocation2 + $0x460] sm:$0xff] }
 0x1f3   : > { %v3333_v22 = vadd.f32 %v3173_v27, %v3013_v33  ;;  %v2753_v36 = vadd.f32 %v7349_v20, %v1404_v6  ;;  %v3183_v6 = vld [vmem:[#allocation2 + $0x470] sm:$0xff] }
 0x1f4   : > { %3494 = vst [vmem:[#allocation2 + $0x428] sm:$0xff] %v3334_v8  ;;  %v3016_v38 = vmax.f32 %v2758_v10, 0.0  ;;  %v3184_v8 = vld [vmem:[#allocation2 + $0x478] sm:$0xff] }
 0x1f5   : > { %3493 = vst [vmem:[#allocation2 + $0x420] sm:$0xff] %v3333_v22  ;;  %v3015_v19 = vmax.f32 %v2753_v36, 0.0  ;;  %v1419_v11 = vpop.permute.xlu1 %1418 }
 0x1f6   : > { %v3336_v47 = vadd.f32 %v3176_v53, %v3016_v38  ;;  %v2768_v55 = vadd.f32 %v7355_v32, %v1419_v11  ;;  %v1414_v39 = vpop.permute.xlu0 %1413 }
 0x1f7   : > { %v3335_v42 = vadd.f32 %v3175_v14, %v3015_v19  ;;  %v2763_v15 = vadd.f32 %v7357_v3, %v1414_v39  ;;  %v3186_v19 = vld [vmem:[#allocation2 + $0x488] sm:$0xff] }
 0x1f8   : > { %3496 = vst [vmem:[#allocation2 + $0x438] sm:$0xff] %v3336_v47  ;;  %v3018_v13 = vmax.f32 %v2768_v55, 0.0  ;;  %v3185_v47 = vld [vmem:[#allocation2 + $0x480] sm:$0xff] }
 0x1f9   : > { %3495 = vst [vmem:[#allocation2 + $0x430] sm:$0xff] %v3335_v42  ;;  %v3017_v18 = vmax.f32 %v2763_v15, 0.0  ;;  %v1429_v20 = vpop.permute.xlu1 %1428 }
 0x1fa   : > { %v3338_v59 = vadd.f32 %v3178_v0, %v3018_v13  ;;  %v2778_v48 = vadd.f32 %v7363_v57, %v1429_v20  ;;  %v1424_v62 = vpop.permute.xlu0 %1423  ;;  %v3188_v13 = vld [vmem:[#allocation2 + $0x498] sm:$0xff] }
 0x1fb   : > { %v3337_v35 = vadd.f32 %v3177_v4, %v3017_v18  ;;  %v2773_v25 = vadd.f32 %v7365_v9, %v1424_v62  ;;  %v3187_v18 = vld [vmem:[#allocation2 + $0x490] sm:$0xff] }
 0x1fc   : > { %3498 = vst [vmem:[#allocation2 + $0x448] sm:$0xff] %v3338_v59  ;;  %v3020_v32 = vmax.f32 %v2778_v48, 0.0 }
 0x1fd   : > { %3497 = vst [vmem:[#allocation2 + $0x440] sm:$0xff] %v3337_v35  ;;  %v3019_v60 = vmax.f32 %v2773_v25, 0.0  ;;  %v1439_v3 = vpop.permute.xlu1 %1438 }
 0x1fe   : > { %v3340_v56 = vadd.f32 %v3180_v37, %v3020_v32  ;;  %v2788_v43 = vadd.f32 %v7371_v16, %v1439_v3  ;;  %v1434_v2 = vpop.permute.xlu0 %1433  ;;  %v3190_v37 = vld [vmem:[#allocation2 + $0x4a8] sm:$0xff]  ;;  %v3189_v32 = vld [vmem:[#allocation2 + $0x4a0] sm:$0xff] }
 0x1ff   : > { %v3339_v40 = vadd.f32 %v3179_v45, %v3019_v60  ;;  %v2783_v23 = vadd.f32 %v7373_v7, %v1434_v2  ;;  %v3192_v2 = vld [vmem:[#allocation2 + $0x4b8] sm:$0xff] }
 0x200   : > { %3500 = vst [vmem:[#allocation2 + $0x458] sm:$0xff] %v3340_v56  ;;  %v3022_v57 = vmax.f32 %v2788_v43, 0.0 }
 0x201   : > { %3499 = vst [vmem:[#allocation2 + $0x450] sm:$0xff] %v3339_v40  ;;  %v3021_v30 = vmax.f32 %v2783_v23, 0.0  ;;  %v1449_v9 = vpop.permute.xlu1 %1448 }
 0x202   : > { %v3342_v52 = vadd.f32 %v3182_v17, %v3022_v57  ;;  %v2798_v27 = vadd.f32 %v7379_v12, %v1449_v9  ;;  %v1444_v33 = vpop.permute.xlu0 %1443  ;;  %v3191_v17 = vld [vmem:[#allocation2 + $0x4b0] sm:$0xff] }
 0x203   : > { %v3341_v41 = vadd.f32 %v3181_v54, %v3021_v30  ;;  %v2793_v10 = vadd.f32 %v7381_v49, %v1444_v33  ;;  %v3193_v33 = vld [vmem:[#allocation2 + $0x4c0] sm:$0xff] }
 0x204   : > { %3502 = vst [vmem:[#allocation2 + $0x468] sm:$0xff] %v3342_v52  ;;  %v3024_v16 = vmax.f32 %v2798_v27, 0.0  ;;  %v3194_v52 = vld [vmem:[#allocation2 + $0x4c8] sm:$0xff] }
 0x205   : > { %3501 = vst [vmem:[#allocation2 + $0x460] sm:$0xff] %v3341_v41  ;;  %v3023_v22 = vmax.f32 %v2793_v10, 0.0  ;;  %v1459_v7 = vpop.permute.xlu1 %1458 }
 0x206   : > { %v3344_v53 = vadd.f32 %v3184_v8, %v3024_v16  ;;  %v2808_v36 = vadd.f32 %v7387_v58, %v1459_v7  ;;  %v1454_v38 = vpop.permute.xlu0 %1453 }
 0x207   : > { %v3343_v14 = vadd.f32 %v3183_v6, %v3023_v22  ;;  %v2803_v11 = vadd.f32 %v7389_v31, %v1454_v38  ;;  %v3196_v22 = vld [vmem:[#allocation2 + $0x4d8] sm:$0xff] }
 0x208   : > { %3504 = vst [vmem:[#allocation2 + $0x478] sm:$0xff] %v3344_v53  ;;  %v3026_v12 = vmax.f32 %v2808_v36, 0.0  ;;  %v3195_v53 = vld [vmem:[#allocation2 + $0x4d0] sm:$0xff] }
 0x209   : > { %3503 = vst [vmem:[#allocation2 + $0x470] sm:$0xff] %v3343_v14  ;;  %v3025_v55 = vmax.f32 %v2803_v11, 0.0  ;;  %v1469_v49 = vpop.permute.xlu1 %1468 }
 0x20a   : > { %v3346_v39 = vadd.f32 %v3186_v19, %v3026_v12  ;;  %v2818_v42 = vadd.f32 %v7395_v24, %v1469_v49  ;;  %v1464_v0 = vpop.permute.xlu0 %1463  ;;  %v3198_v12 = vld [vmem:[#allocation2 + $0x4e8] sm:$0xff] }
 0x20b   : > { %v3345_v15 = vadd.f32 %v3185_v47, %v3025_v55  ;;  %v2813_v4 = vadd.f32 %v7397_v5, %v1464_v0  ;;  %v3197_v55 = vld [vmem:[#allocation2 + $0x4e0] sm:$0xff] }
 0x20c   : > { %3506 = vst [vmem:[#allocation2 + $0x488] sm:$0xff] %v3346_v39  ;;  %v3028_v58 = vmax.f32 %v2818_v42, 0.0 }
 0x20d   : > { %3505 = vst [vmem:[#allocation2 + $0x480] sm:$0xff] %v3345_v15  ;;  %v3027_v20 = vmax.f32 %v2813_v4, 0.0  ;;  %v1479_v31 = vpop.permute.xlu1 %1478 }
 0x20e   : > { %v3348_v59 = vadd.f32 %v3188_v13, %v3028_v58  ;;  %v2828_v48 = vadd.f32 %v7403_v29, %v1479_v31  ;;  %v1474_v62 = vpop.permute.xlu0 %1473  ;;  %v3200_v13 = vld [vmem:[#allocation2 + $0x4f8] sm:$0xff]  ;;  %v3199_v58 = vld [vmem:[#allocation2 + $0x4f0] sm:$0xff]  ;;  %v3541_v31 = vld [vmem:[#allocation2 + $0x80] sm:$0xff] (!%p4784_p8) }
 0x20f   : > { %v3347_v35 = vadd.f32 %v3187_v18, %v3027_v20  ;;  %v2823_v25 = vadd.f32 %v7405_v63, %v1474_v62  ;;  %3717 = vadd.xlane.f32.xlu0 (!%p4784_p8), %v3541_v31  ;;  %v3544_v62 = vld [vmem:[#allocation2 + $0x98] sm:$0xff] (!%p4784_p8)  ;;  %v3595_v31 = vld [vmem:[#allocation2 + $0x230] sm:$0xff] (!%p4784_p8) }
 0x210   : > { %3508 = vst [vmem:[#allocation2 + $0x498] sm:$0xff] %v3348_v59  ;;  %v3030_v24 = vmax.f32 %v2828_v48, 0.0  ;;  %v3525_v59 = vld [vmem:[#allocation2] sm:$0xff] (!%p4784_p8)  ;;  %v3526_v48 = vld [vmem:[#allocation2 + $0x8] sm:$0xff] (!%p4784_p8) }
 0x211   : > { %3507 = vst [vmem:[#allocation2 + $0x490] sm:$0xff] %v3347_v35  ;;  %v3029_v45 = vmax.f32 %v2823_v25, 0.0  ;;  %v1489_v5 = vpop.permute.xlu1 %1488  ;;  %3685 = vadd.xlane.f32.xlu1 (!%p4784_p8), %v3525_v59  ;;  %v3527_v35 = vld [vmem:[#allocation2 + $0x10] sm:$0xff] (!%p4784_p8)  ;;  %v3545_v25 = vld [vmem:[#allocation2 + $0xa0] sm:$0xff] (!%p4784_p8)  ;;  %v3596_v59 = vld [vmem:[#allocation2 + $0x238] sm:$0xff] (!%p4784_p8) }
 0x212   : > { %v3350_v60 = vadd.f32 %v3190_v37, %v3030_v24  ;;  %v2838_v3 = vadd.f32 %v7409_v51, %v1489_v5  ;;  %v1484_v56 = vpop.permute.xlu0 %1483  ;;  %v3528_v37 = vld [vmem:[#allocation2 + $0x18] sm:$0xff] (!%p4784_p8)  ;;  %v3546_v24 = vld [vmem:[#allocation2 + $0xa8] sm:$0xff] (!%p4784_p8)  ;;  %v3547_v5 = vld [vmem:[#allocation2 + $0xb0] sm:$0xff] (!%p4784_p8) }
 0x213   : > { %v3349_v43 = vadd.f32 %v3189_v32, %v3029_v45  ;;  %v2833_v40 = vadd.f32 %v7411_v21, %v1484_v56  ;;  %v3529_v32 = vld [vmem:[#allocation2 + $0x20] sm:$0xff] (!%p4784_p8)  ;;  %v3530_v45 = vld [vmem:[#allocation2 + $0x28] sm:$0xff] (!%p4784_p8)  ;;  %v3532_v56 = vld [vmem:[#allocation2 + $0x38] sm:$0xff] (!%p4784_p8) }
 0x214   : > { %3510 = vst [vmem:[#allocation2 + $0x4a8] sm:$0xff] %v3350_v60  ;;  %v3032_v29 = vmax.f32 %v2838_v3, 0.0  ;;  %v3548_v60 = vld [vmem:[#allocation2 + $0xb8] sm:$0xff] (!%p4784_p8)  ;;  %v3531_v3 = vld [vmem:[#allocation2 + $0x30] sm:$0xff] (!%p4784_p8) }
 0x215   : > { %3509 = vst [vmem:[#allocation2 + $0x4a0] sm:$0xff] %v3349_v43  ;;  %v3031_v23 = vmax.f32 %v2833_v40, 0.0  ;;  %v1499_v63 = vpop.permute.xlu1 %1498  ;;  %3687 = vadd.xlane.f32.xlu1 (!%p4784_p8), %v3526_v48  ;;  %v3549_v43 = vld [vmem:[#allocation2 + $0xc0] sm:$0xff] (!%p4784_p8)  ;;  %v3582_v48 = vld [vmem:[#allocation2 + $0x1c8] sm:$0xff] (!%p4784_p8) }
 0x216   : > { %v3352_v57 = vadd.f32 %v3192_v2, %v3032_v29  ;;  %v2848_v54 = vadd.f32 %v7415_v50, %v1499_v63  ;;  %v1494_v30 = vpop.permute.xlu0 %1493  ;;  %v3550_v2 = vld [vmem:[#allocation2 + $0xc8] sm:$0xff] (!%p4784_p8)  ;;  %v3533_v40 = vld [vmem:[#allocation2 + $0x40] sm:$0xff] (!%p4784_p8)  ;;  %v3535_v63 = vld [vmem:[#allocation2 + $0x50] sm:$0xff] (!%p4784_p8) }
 0x217   : > { %v3351_v9 = vadd.f32 %v3191_v17, %v3031_v23  ;;  %v2843_v27 = vadd.f32 %v7417_v28, %v1494_v30  ;;  %v3534_v29 = vld [vmem:[#allocation2 + $0x48] sm:$0xff] (!%p4784_p8)  ;;  %v3551_v17 = vld [vmem:[#allocation2 + $0xd0] sm:$0xff] (!%p4784_p8)  ;;  %v3552_v23 = vld [vmem:[#allocation2 + $0xd8] sm:$0xff] (!%p4784_p8) }
 0x218   : > { %3512 = vst [vmem:[#allocation2 + $0x4b8] sm:$0xff] %v3352_v57  ;;  %v3034_v51 = vmax.f32 %v2848_v54, 0.0  ;;  %v3536_v57 = vld [vmem:[#allocation2 + $0x58] sm:$0xff] (!%p4784_p8)  ;;  %v3553_v54 = vld [vmem:[#allocation2 + $0xe0] sm:$0xff] (!%p4784_p8)  ;;  %v3554_v30 = vld [vmem:[#allocation2 + $0xe8] sm:$0xff] (!%p4784_p8) }
 0x219   : > { %3511 = vst [vmem:[#allocation2 + $0x4b0] sm:$0xff] %v3351_v9  ;;  %v3033_v41 = vmax.f32 %v2843_v27, 0.0  ;;  %v1509_v21 = vpop.permute.xlu1 %1508  ;;  %3723 = vadd.xlane.f32.xlu1 (!%p4784_p8), %v3544_v62  ;;  %v3537_v9 = vld [vmem:[#allocation2 + $0x60] sm:$0xff] (!%p4784_p8)  ;;  %v3555_v27 = vld [vmem:[#allocation2 + $0xf0] sm:$0xff] (!%p4784_p8)  ;;  %v3566_v62 = vld [vmem:[#allocation2 + $0x148] sm:$0xff] (!%p4784_p8) }
 0x21a   : > { %v3354_v8 = vadd.f32 %v3194_v52, %v3034_v51  ;;  %v2858_v10 = vadd.f32 %v7421_v26, %v1509_v21  ;;  %v1504_v16 = vpop.permute.xlu0 %1503  ;;  %v3538_v52 = vld [vmem:[#allocation2 + $0x68] sm:$0xff] (!%p4784_p8)  ;;  %v3556_v51 = vld [vmem:[#allocation2 + $0xf8] sm:$0xff] (!%p4784_p8)  ;;  %v3573_v21 = vld [vmem:[#allocation2 + $0x180] sm:$0xff] (!%p4784_p8) }
 0x21b   : > { %v3353_v6 = vadd.f32 %v3193_v33, %v3033_v41  ;;  %v2853_v7 = vadd.f32 %v7423_v61, %v1504_v16  ;;  %v3539_v33 = vld [vmem:[#allocation2 + $0x70] sm:$0xff] (!%p4784_p8)  ;;  %v3540_v41 = vld [vmem:[#allocation2 + $0x78] sm:$0xff] (!%p4784_p8)  ;;  %v3558_v16 = vld [vmem:[#allocation2 + $0x108] sm:$0xff] (!%p4784_p8) }
 0x21c   : > { %3514 = vst [vmem:[#allocation2 + $0x4c8] sm:$0xff] %v3354_v8  ;;  %v3036_v50 = vmax.f32 %v2858_v10, 0.0  ;;  %v3574_v8 = vld [vmem:[#allocation2 + $0x188] sm:$0xff] (!%p4784_p8)  ;;  %v3557_v10 = vld [vmem:[#allocation2 + $0x100] sm:$0xff] (!%p4784_p8) }
 0x21d   : > { %3513 = vst [vmem:[#allocation2 + $0x4c0] sm:$0xff] %v3353_v6  ;;  %v3035_v36 = vmax.f32 %v2853_v7, 0.0  ;;  %v1519_v28 = vpop.permute.xlu1 %1518  ;;  %3691 = vadd.xlane.f32.xlu1 (!%p4784_p8), %v3528_v37  ;;  %v3605_v6 = vld [vmem:[#allocation2 + $0x280] sm:$0xff] (!%p4784_p8)  ;;  %v3614_v37 = vld [vmem:[#allocation2 + $0x2c8] sm:$0xff] (!%p4784_p8) }
 0x21e   : > { %v3356_v38 = vadd.f32 %v3196_v22, %v3036_v50  ;;  %v2868_v14 = vadd.f32 %v7427_v44, %v1519_v28  ;;  %v1514_v19 = vpop.permute.xlu0 %1513  ;;  %v3606_v22 = vld [vmem:[#allocation2 + $0x288] sm:$0xff] (!%p4784_p8)  ;;  %v3589_v7 = vld [vmem:[#allocation2 + $0x200] sm:$0xff] (!%p4784_p8)  ;;  %v3559_v28 = vld [vmem:[#allocation2 + $0x110] sm:$0xff] (!%p4784_p8) }
 0x21f   : > { %v3355_v11 = vadd.f32 %v3195_v53, %v3035_v36  ;;  %v2863_v47 = vadd.f32 %v7429_v1, %v1514_v19  ;;  %v3590_v50 = vld [vmem:[#allocation2 + $0x208] sm:$0xff] (!%p4784_p8)  ;;  %v3575_v53 = vld [vmem:[#allocation2 + $0x190] sm:$0xff] (!%p4784_p8)  ;;  %v3576_v36 = vld [vmem:[#allocation2 + $0x198] sm:$0xff] (!%p4784_p8) }
 0x220   : > { %3516 = vst [vmem:[#allocation2 + $0x4d8] sm:$0xff] %v3356_v38  ;;  %v3038_v26 = vmax.f32 %v2868_v14, 0.0  ;;  %v3560_v38 = vld [vmem:[#allocation2 + $0x118] sm:$0xff] (!%p4784_p8)  ;;  %v3607_v14 = vld [vmem:[#allocation2 + $0x290] sm:$0xff] (!%p4784_p8) }
 0x221   : > { %3515 = vst [vmem:[#allocation2 + $0x4d0] sm:$0xff] %v3355_v11  ;;  %v3037_v49 = vmax.f32 %v2863_v47, 0.0  ;;  %v1529_v61 = vpop.permute.xlu1 %1528  ;;  %3727 = vadd.xlane.f32.xlu1 (!%p4784_p8), %v3546_v24  ;;  %v3608_v19 = vld [vmem:[#allocation2 + $0x298] sm:$0xff] (!%p4784_p8)  ;;  %v3591_v11 = vld [vmem:[#allocation2 + $0x210] sm:$0xff] (!%p4784_p8)  ;;  %v7467_v47 = vld [vmem:[%s7526_s3] sm:$0x77] (!%p4784_p8) }
 0x222   : > { %v3358_v39 = vadd.f32 %v3198_v12, %v3038_v26  ;;  %v2878_v42 = vadd.f32 %v7433_v34, %v1529_v61  ;;  %v1524_v0 = vpop.permute.xlu0 %1523  ;;  %v3542_v34 = vld [vmem:[#allocation2 + $0x88] sm:$0xff] (!%p4784_p8)  ;;  %v3592_v12 = vld [vmem:[#allocation2 + $0x218] sm:$0xff] (!%p4784_p8)  ;;  %v4176_v26 = vcombine.high (!%p4784_p8), %v7467_v47, %v7467_v47  ;;  %v3561_v61 = vld [vmem:[#allocation2 + $0x120] sm:$0xff] (!%p4784_p8) }
 0x223   : > { %v3357_v15 = vadd.f32 %v3197_v55, %v3037_v49  ;;  %v2873_v4 = vadd.f32 %v7435_v46, %v1524_v0  ;;  %3524 = sbr.rel (%p4784_p8) target bundleno = 1252 (0x4e4), region = 48  ;;  %3719 = vadd.xlane.f32.xlu0 (!%p4784_p8), %v3542_v34  ;;  %v3543_v46 = vld [vmem:[#allocation2 + $0x90] sm:$0xff] (!%p4784_p8)  ;;  %v3577_v55 = vld [vmem:[#allocation2 + $0x1a0] sm:$0xff] (!%p4784_p8)  ;;  %v3578_v49 = vld [vmem:[#allocation2 + $0x1a8] sm:$0xff] (!%p4784_p8) }
 0x224   : > { %3518 = vst [vmem:[#allocation2 + $0x4e8] sm:$0xff] %v3358_v39  ;;  %v3040_v44 = vmax.f32 %v2878_v42, 0.0  ;;  %4250 = vmatprep.mubr.f32.mxu0 (!%p4784_p8), %v4176_v26  ;;  %v3562_v39 = vld [vmem:[#allocation2 + $0x128] sm:$0xff] (!%p4784_p8)  ;;  %v3609_v42 = vld [vmem:[#allocation2 + $0x2a0] sm:$0xff] (!%p4784_p8) }
 0x225   : > { %3517 = vst [vmem:[#allocation2 + $0x4e0] sm:$0xff] %v3357_v15  ;;  %v3039_v18 = vmax.f32 %v2873_v4, 0.0  ;;  %3695 = vadd.xlane.f32.xlu1 (!%p4784_p8), %v3530_v45  ;;  %v3610_v0 = vld [vmem:[#allocation2 + $0x2a8] sm:$0xff] (!%p4784_p8)  ;;  %v3593_v15 = vld [vmem:[#allocation2 + $0x220] sm:$0xff] (!%p4784_p8)  ;;  %v3579_v4 = vld [vmem:[#allocation2 + $0x1b0] sm:$0xff] (!%p4784_p8) }
 0x226   : > { %v3360_v1 = vadd.f32 %v3200_v13, %v3040_v44  ;;  %v3594_v13 = vld [vmem:[#allocation2 + $0x228] sm:$0xff] (!%p4784_p8)  ;;  %v3580_v44 = vld [vmem:[#allocation2 + $0x1b8] sm:$0xff] (!%p4784_p8)  ;;  %v3581_v34 = vld [vmem:[#allocation2 + $0x1c0] sm:$0xff] (!%p4784_p8) }
 0x227   : > { %v3359_v20 = vadd.f32 %v3199_v58, %v3039_v18  ;;  %3721 = vadd.xlane.f32.xlu0 (!%p4784_p8), %v3543_v46  ;;  %v3563_v58 = vld [vmem:[#allocation2 + $0x130] sm:$0xff] (!%p4784_p8)  ;;  %v3564_v18 = vld [vmem:[#allocation2 + $0x138] sm:$0xff] (!%p4784_p8)  ;;  %v3565_v46 = vld [vmem:[#allocation2 + $0x140] sm:$0xff] (!%p4784_p8) }
 0x228   : > { %3520 = vst [vmem:[#allocation2 + $0x4f8] sm:$0xff] %v3360_v1  ;;  %v3611_v1 = vld [vmem:[#allocation2 + $0x2b0] sm:$0xff] (!%p4784_p8)  ;;  %v3598_v24 = vld [vmem:[#allocation2 + $0x248] sm:$0xff] (!%p4784_p8) }
 0x229   : > { %3519 = vst [vmem:[#allocation2 + $0x4f0] sm:$0xff] %v3359_v20  ;;  %3731 = vadd.xlane.f32.xlu1 (!%p4784_p8), %v3548_v60  ;;  %v3612_v20 = vld [vmem:[#allocation2 + $0x2b8] sm:$0xff] (!%p4784_p8)  ;;  %v3570_v26 = vld [vmem:[#allocation2 + $0x168] sm:$0xff] (!%p4784_p8) }
 0x22a   : > { %v3584_v60 = vld [vmem:[#allocation2 + $0x1d8] sm:$0xff] }
 0x22b   : > { %3689 = vadd.xlane.f32.xlu0 %v3527_v35  ;;  %v3613_v35 = vld [vmem:[#allocation2 + $0x2c0] sm:$0xff] }
 0x22d   : > { %3699 = vadd.xlane.f32.xlu1 %v3532_v56 }
 0x22f   : > { %3725 = vadd.xlane.f32.xlu0 %v3545_v25  ;;  %v3597_v25 = vld [vmem:[#allocation2 + $0x240] sm:$0xff] }
 0x231   : > { %3735 = vadd.xlane.f32.xlu1 %v3550_v2  ;;  %v3568_v2 = vld [vmem:[#allocation2 + $0x158] sm:$0xff] }
 0x233   : > { %3693 = vadd.xlane.f32.xlu0 %v3529_v32 }
 0x235   : > { %3703 = vadd.xlane.f32.xlu1 %v3534_v29 }
 0x237   : > { %3729 = vadd.xlane.f32.xlu0 %v3547_v5  ;;  %v3583_v5 = vld [vmem:[#allocation2 + $0x1d0] sm:$0xff] }
 0x239   : > { %3739 = vadd.xlane.f32.xlu1 %v3552_v23 }
 0x23b   : > { %3697 = vadd.xlane.f32.xlu0 %v3531_v3 }
 0x23d   : > { %3707 = vadd.xlane.f32.xlu1 %v3536_v57 }
 0x23f   : > { %3733 = vadd.xlane.f32.xlu0 %v3549_v43  ;;  %v3567_v43 = vld [vmem:[#allocation2 + $0x150] sm:$0xff] }
 0x241   : > { %3743 = vadd.xlane.f32.xlu1 %v3554_v30 }
 0x243   : > { %3701 = vadd.xlane.f32.xlu0 %v3533_v40 }
 0x245   : > { %3711 = vadd.xlane.f32.xlu1 %v3538_v52  ;;  %v3616_v52 = vld [vmem:[#allocation2 + $0x2d8] sm:$0xff] }
 0x247   : > { %3737 = vadd.xlane.f32.xlu0 %v3551_v17 }
 0x249   : > { %3747 = vadd.xlane.f32.xlu1 %v3556_v51 }
 0x24b   : > { %3705 = vadd.xlane.f32.xlu0 %v3535_v63 }
 0x24d   : > { %3715 = vadd.xlane.f32.xlu1 %v3540_v41 }
 0x24f   : > { %3741 = vadd.xlane.f32.xlu0 %v3553_v54 }
 0x251   : > { %3783 = vadd.xlane.f32.xlu1 %v3574_v8  ;;  %v3599_v8 = vld [vmem:[#allocation2 + $0x250] sm:$0xff] }
 0x253   : > { %3709 = vadd.xlane.f32.xlu0 %v3537_v9  ;;  %v3615_v9 = vld [vmem:[#allocation2 + $0x2d0] sm:$0xff] }
 0x255   : > { %3751 = vadd.xlane.f32.xlu1 %v3558_v16 }
 0x257   : > { %3745 = vadd.xlane.f32.xlu0 %v3555_v27 }
 0x259   : > { %3847 = vadd.xlane.f32.xlu1 %v3606_v22 }
 0x25b   : > { %3713 = vadd.xlane.f32.xlu0 %v3539_v33 }
 0x25d   : > { %3815 = vadd.xlane.f32.xlu1 %v3590_v50 }
 0x25f   : > { %3781 = vadd.xlane.f32.xlu0 %v3573_v21 }
 0x261   : > { %3787 = vadd.xlane.f32.xlu1 %v3576_v36  ;;  %v3586_v36 = vld [vmem:[#allocation2 + $0x1e8] sm:$0xff] }
 0x263   : > { %3749 = vadd.xlane.f32.xlu0 %v3557_v10  ;;  %v3600_v10 = vld [vmem:[#allocation2 + $0x258] sm:$0xff] }
 0x265   : > { %3755 = vadd.xlane.f32.xlu1 %v3560_v38 }
 0x267   : > { %3845 = vadd.xlane.f32.xlu0 %v3605_v6 }
 0x269   : > { %3851 = vadd.xlane.f32.xlu1 %v3608_v19 }
 0x26b   : > { %3813 = vadd.xlane.f32.xlu0 %v3589_v7 }
 0x26d   : > { %3819 = vadd.xlane.f32.xlu1 %v3592_v12  ;;  %v3569_v12 = vld [vmem:[#allocation2 + $0x160] sm:$0xff] }
 0x26f   : > { %3785 = vadd.xlane.f32.xlu0 %v3575_v53  ;;  %v3585_v53 = vld [vmem:[#allocation2 + $0x1e0] sm:$0xff] }
 0x271   : > { %3791 = vadd.xlane.f32.xlu1 %v3578_v49 }
 0x273   : > { %3753 = vadd.xlane.f32.xlu0 %v3559_v28 }
 0x275   : > { %3759 = vadd.xlane.f32.xlu1 %v3562_v39 }
 0x277   : > { %3849 = vadd.xlane.f32.xlu0 %v3607_v14 }
 0x279   : > { %3855 = vadd.xlane.f32.xlu1 %v3610_v0  ;;  %v3617_v0 = vld [vmem:[#allocation2 + $0x2e0] sm:$0xff] }
 0x27b   : > { %3817 = vadd.xlane.f32.xlu0 %v3591_v11 }
 0x27d   : > { %3823 = vadd.xlane.f32.xlu1 %v3594_v13 }
 0x27f   : > { %3789 = vadd.xlane.f32.xlu0 %v3577_v55 }
 0x281   : > { %3795 = vadd.xlane.f32.xlu1 %v3580_v44 }
 0x283   : > { %3757 = vadd.xlane.f32.xlu0 %v3561_v61 }
 0x285   : > { %3763 = vadd.xlane.f32.xlu1 %v3564_v18 }
 0x287   : > { %3853 = vadd.xlane.f32.xlu0 %v3609_v42 }
 0x289   : > { %3859 = vadd.xlane.f32.xlu1 %v3612_v20  ;;  %v3602_v20 = vld [vmem:[#allocation2 + $0x268] sm:$0xff] }
 0x28b   : > { %3821 = vadd.xlane.f32.xlu0 %v3593_v15  ;;  %v3618_v15 = vld [vmem:[#allocation2 + $0x2e8] sm:$0xff] }
 0x28d   : > { %3827 = vadd.xlane.f32.xlu1 %v3596_v59 }
 0x28f   : > { %3793 = vadd.xlane.f32.xlu0 %v3579_v4 }
 0x291   : > { %3799 = vadd.xlane.f32.xlu1 %v3582_v48 }
 0x293   : > { %3761 = vadd.xlane.f32.xlu0 %v3563_v58 }
 0x295   : > { %3767 = vadd.xlane.f32.xlu1 %v3566_v62  ;;  %v3587_v62 = vld [vmem:[#allocation2 + $0x1f0] sm:$0xff] }
 0x297   : > { %3857 = vadd.xlane.f32.xlu0 %v3611_v1  ;;  %v3601_v1 = vld [vmem:[#allocation2 + $0x260] sm:$0xff] }
 0x299   : > { %3863 = vadd.xlane.f32.xlu1 %v3614_v37 }
 0x29b   : > { %3825 = vadd.xlane.f32.xlu0 %v3595_v31 }
 0x29c   : > { %v3718_v32 = vpop.xlane.xlu0 %3717 }
 0x29d   : > { %3831 = vadd.xlane.f32.xlu1 %v3598_v24  ;;  %v4021_v40 = vmul.f32 0.00390625, %v3718_v32 }
 0x29e   : > { %v3686_v45 = vpop.xlane.xlu1 %3685 }
 0x29f   : > { %3797 = vadd.xlane.f32.xlu0 %v3581_v34  ;;  %v4005_v29 = vmul.f32 0.00390625, %v3686_v45 }
 0x2a1   : > { %3803 = vadd.xlane.f32.xlu1 %v3584_v60  ;;  %v3572_v60 = vld [vmem:[#allocation2 + $0x178] sm:$0xff] }
 0x2a2   : > { %v3688_v56 = vpop.xlane.xlu1 %3687 }
 0x2a3   : > { %3765 = vadd.xlane.f32.xlu0 %v3565_v46  ;;  %v4006_v23 = vmul.f32 0.00390625, %v3688_v56 }
 0x2a5   : > { %3771 = vadd.xlane.f32.xlu1 %v3568_v2  ;;  %v5368_v57 = vpack.c.bf16 %v4006_v23, %v4005_v29  ;;  %v3619_v29 = vld [vmem:[#allocation2 + $0x2f0] sm:$0xff] }
 0x2a6   : > { %v3724_v30 = vpop.xlane.xlu1 %3723 }
 0x2a7   : > { %3861 = vadd.xlane.f32.xlu0 %v3613_v35  ;;  %v4024_v51 = vmul.f32 0.00390625, %v3724_v30  ;;  %v3588_v35 = vld [vmem:[#allocation2 + $0x1f8] sm:$0xff] }
 0x2a9   : > { %3867 = vadd.xlane.f32.xlu1 %v3616_v52  ;;  %v3604_v52 = vld [vmem:[#allocation2 + $0x278] sm:$0xff] }
 0x2aa   : > { %v3692_v21 = vpop.xlane.xlu1 %3691 }
 0x2ab   : > { %3829 = vadd.xlane.f32.xlu0 %v3597_v25  ;;  %v4008_v6 = vmul.f32 0.00390625, %v3692_v21 }
 0x2ad   : > { %3835 = vadd.xlane.f32.xlu1 %v3600_v10  ;;  %v3638_v10 = vld [vmem:[#allocation2 + $0x388] sm:$0xff] }
 0x2ae   : > { %v3728_v50 = vpop.xlane.xlu1 %3727 }
 0x2af   : > { %3801 = vadd.xlane.f32.xlu0 %v3583_v5  ;;  %v4026_v38 = vmul.f32 0.00390625, %v3728_v50  ;;  %v3571_v5 = vld [vmem:[#allocation2 + $0x170] sm:$0xff] }
 0x2b0   : > { %v3720_v3 = vpop.xlane.xlu0 %3719 }
 0x2b1   : > { %v4022_v17 = vmul.f32 0.00390625, %v3720_v3  ;;  %3807 = vadd.xlane.f32.xlu1 %v3586_v36  ;;  %v3622_v36 = vld [vmem:[#allocation2 + $0x308] sm:$0xff] }
 0x2b2   : > { %v3696_v11 = vpop.xlane.xlu1 %3695 }
 0x2b3   : > { %3769 = vadd.xlane.f32.xlu0 %v3567_v43  ;;  %v5366_v63 = vpack.c.bf16 %v4022_v17, %v4021_v40  ;;  %v4010_v49 = vmul.f32 0.00390625, %v3696_v11  ;;  %v3620_v17 = vld [vmem:[#allocation2 + $0x2f8] sm:$0xff] }
 0x2b4   : > { %v3722_v54 = vpop.xlane.xlu0 %3721 }
 0x2b5   : > { %v4023_v27 = vmul.f32 0.00390625, %v3722_v54  ;;  %5367 = vmatprep.subr.bf16.mxu0 %v5366_v63  ;;  %3775 = vadd.xlane.f32.xlu1 %v3570_v26  ;;  %v3670_v26 = vld [vmem:[#allocation2 + $0x488] sm:$0xff] }
 0x2b6   : > { %5369 = vmatpush3.bf16.msra.mxu0 %v5368_v57  ;;  %v3732_v42 = vpop.xlane.xlu1 %3731 }
 0x2b7   : > { %v5370_v33 = vpack.c.bf16 %v4024_v51, %v4023_v27  ;;  %3865 = vadd.xlane.f32.xlu0 %v3615_v9  ;;  %v4028_v4 = vmul.f32 0.00390625, %v3732_v42  ;;  %v3603_v9 = vld [vmem:[#allocation2 + $0x270] sm:$0xff] }
 0x2b8   : > { %v3690_v41 = vpop.xlane.xlu0 %3689 }
 0x2b9   : > { %v4007_v16 = vmul.f32 0.00390625, %v3690_v41  ;;  %5371 = vmatprep.subr.bf16.mxu0 %v5370_v33  ;;  %3871 = vadd.xlane.f32.xlu1 %v3618_v15  ;;  %v3654_v15 = vld [vmem:[#allocation2 + $0x408] sm:$0xff] }
 0x2ba   : > { %v3700_v18 = vpop.xlane.xlu1 %3699 }
 0x2bb   : > { %v5372_v22 = vpack.c.bf16 %v4008_v6, %v4007_v16  ;;  %3833 = vadd.xlane.f32.xlu0 %v3599_v8  ;;  %v4012_v59 = vmul.f32 0.00390625, %v3700_v18  ;;  %v3637_v8 = vld [vmem:[#allocation2 + $0x380] sm:$0xff] }
 0x2bc   : > { %v3726_v7 = vpop.xlane.xlu0 %3725 }
 0x2bd   : > { %v4025_v28 = vmul.f32 0.00390625, %v3726_v7  ;;  %5373 = vmatpush3.bf16.msra.mxu0 %v5372_v22  ;;  %3839 = vadd.xlane.f32.xlu1 %v3602_v20  ;;  %v3640_v20 = vld [vmem:[#allocation2 + $0x398] sm:$0xff] }
 0x2be   : > { %v3736_v46 = vpop.xlane.xlu1 %3735 }
 0x2bf   : > { %v5374_v14 = vpack.c.bf16 %v4026_v38, %v4025_v28  ;;  %3805 = vadd.xlane.f32.xlu0 %v3585_v53  ;;  %v4030_v25 = vmul.f32 0.00390625, %v3736_v46  ;;  %v3621_v53 = vld [vmem:[#allocation2 + $0x300] sm:$0xff] }
 0x2c0   : > { %v3694_v19 = vpop.xlane.xlu0 %3693 }
 0x2c1   : > { %v4009_v55 = vmul.f32 0.00390625, %v3694_v19  ;;  %5375 = vmatprep.subr.bf16.mxu0 %v5374_v14  ;;  %3811 = vadd.xlane.f32.xlu1 %v3588_v35  ;;  %v3624_v35 = vld [vmem:[#allocation2 + $0x318] sm:$0xff] }
 0x2c2   : > { %v3704_v45 = vpop.xlane.xlu1 %3703 }
 0x2c3   : > { %v5376_v61 = vpack.c.bf16 %v4010_v49, %v4009_v55  ;;  %3773 = vadd.xlane.f32.xlu0 %v3569_v12  ;;  %v4014_v56 = vmul.f32 0.00390625, %v3704_v45  ;;  %v3669_v12 = vld [vmem:[#allocation2 + $0x480] sm:$0xff] }
 0x2c4   : > { %v3730_v39 = vpop.xlane.xlu0 %3729 }
 0x2c5   : > { %v4027_v13 = vmul.f32 0.00390625, %v3730_v39  ;;  %5377 = vmatpush3.bf16.msra.mxu0 %v5376_v61  ;;  %3779 = vadd.xlane.f32.xlu1 %v3572_v60 }
 0x2c6   : > { %v3740_v40 = vpop.xlane.xlu1 %3739 }
 0x2c7   : > { %v5378_v44 = vpack.c.bf16 %v4028_v4, %v4027_v13  ;;  %3869 = vadd.xlane.f32.xlu0 %v3617_v0  ;;  %v4032_v63 = vmul.f32 0.00390625, %v3740_v40  ;;  %v3653_v0 = vld [vmem:[#allocation2 + $0x400] sm:$0xff] }
 0x2c8   : > { %v3698_v58 = vpop.xlane.xlu0 %3697 }
 0x2c9   : > { %v4011_v31 = vmul.f32 0.00390625, %v3698_v58  ;;  %5379 = vmatprep.subr.bf16.mxu0 %v5378_v44  ;;  %3875 = vadd.xlane.f32.xlu1 %v3620_v17  ;;  %v3655_v17 = vld [vmem:[#allocation2 + $0x410] sm:$0xff] }
 0x2ca   : > { %v3708_v30 = vpop.xlane.xlu1 %3707 }
 0x2cb   : > { %v5380_v34 = vpack.c.bf16 %v4012_v59, %v4011_v31  ;;  %3837 = vadd.xlane.f32.xlu0 %v3601_v1  ;;  %v4016_v51 = vmul.f32 0.00390625, %v3708_v30  ;;  %v3639_v1 = vld [vmem:[#allocation2 + $0x390] sm:$0xff] }
 0x2cc   : > { %v3734_v48 = vpop.xlane.xlu0 %3733 }
 0x2cd   : > { %v4029_v37 = vmul.f32 0.00390625, %v3734_v48  ;;  %5381 = vmatpush3.bf16.msra.mxu0 %v5380_v34  ;;  %3843 = vadd.xlane.f32.xlu1 %v3604_v52 }
 0x2ce   : > { %v3744_v21 = vpop.xlane.xlu1 %3743 }
 0x2cf   : > { %v5382_v24 = vpack.c.bf16 %v4030_v25, %v4029_v37  ;;  %3809 = vadd.xlane.f32.xlu0 %v3587_v62  ;;  %v4034_v6 = vmul.f32 0.00390625, %v3744_v21  ;;  %v3623_v62 = vld [vmem:[#allocation2 + $0x310] sm:$0xff] }
 0x2d0   : > { %v3702_v32 = vpop.xlane.xlu0 %3701 }
 0x2d1   : > { %v4013_v3 = vmul.f32 0.00390625, %v3702_v32  ;;  %5383 = vmatprep.subr.bf16.mxu0 %v5382_v24  ;;  %3911 = vadd.xlane.f32.xlu1 %v3638_v10  ;;  %v7475_v24 = vld [vmem:[%s7526_s3 + $0x8] sm:$0x77] }
 0x2d2   : > { %v3712_v50 = vpop.xlane.xlu1 %3711  ;;  %v4177_v32 = vcombine.high %v7475_v24, %v7475_v24 }
 0x2d3   : > { %v5384_v43 = vpack.c.bf16 %v4014_v56, %v4013_v3  ;;  %3777 = vadd.xlane.f32.xlu0 %v3571_v5  ;;  %v4018_v38 = vmul.f32 0.00390625, %v3712_v50  ;;  %v3671_v3 = vld [vmem:[#allocation2 + $0x490] sm:$0xff]  ;;  %v3672_v56 = vld [vmem:[#allocation2 + $0x498] sm:$0xff] }
 0x2d4   : > { %v3738_v2 = vpop.xlane.xlu0 %3737  ;;  %4320 = vmatprep.mubr.f32.mxu1 %v4177_v32  ;;  %v3676_v32 = vld [vmem:[#allocation2 + $0x4b8] sm:$0xff] }
 0x2d5   : > { %v4031_v23 = vmul.f32 0.00390625, %v3738_v2  ;;  %5385 = vmatpush3.bf16.msra.mxu0 %v5384_v43  ;;  %3879 = vadd.xlane.f32.xlu1 %v3622_v36 }
 0x2d6   : > { %v3748_v11 = vpop.xlane.xlu1 %3747 }
 0x2d7   : > { %v5386_v57 = vpack.c.bf16 %v4032_v63, %v4031_v23  ;;  %3873 = vadd.xlane.f32.xlu0 %v3619_v29  ;;  %v4036_v49 = vmul.f32 0.00390625, %v3748_v11  ;;  %v3656_v23 = vld [vmem:[#allocation2 + $0x418] sm:$0xff] }
 0x2d8   : > { %v3706_v54 = vpop.xlane.xlu0 %3705 }
 0x2d9   : > { %v4015_v27 = vmul.f32 0.00390625, %v3706_v54  ;;  %5387 = vmatprep.subr.bf16.mxu0 %v5386_v57  ;;  %3975 = vadd.xlane.f32.xlu1 %v3670_v26  ;;  %v7482_v54 = vld [vmem:[%s7526_s3 + $0x10] sm:$0x77] }
 0x2da   : > { %v3716_v42 = vpop.xlane.xlu1 %3715  ;;  %v4178_v30 = vcombine.high %v7482_v54, %v7482_v54 }
 0x2db   : > { %v5388_v33 = vpack.c.bf16 %v4016_v51, %v4015_v27  ;;  %3841 = vadd.xlane.f32.xlu0 %v3603_v9  ;;  %v4020_v4 = vmul.f32 0.00390625, %v3716_v42  ;;  %v3641_v51 = vld [vmem:[#allocation2 + $0x3a0] sm:$0xff] }
 0x2dc   : > { %v3742_v41 = vpop.xlane.xlu0 %3741 }
 0x2dd   : > { %v4033_v16 = vmul.f32 0.00390625, %v3742_v41  ;;  %5389 = vmatpush3.bf16.msra.mxu0 %v5388_v33  ;;  %3943 = vadd.xlane.f32.xlu1 %v3654_v15  ;;  %v3642_v33 = vld [vmem:[#allocation2 + $0x3a8] sm:$0xff] }
 0x2de   : > { %v3784_v18 = vpop.xlane.xlu1 %3783 }
 0x2df   : > { %v5390_v22 = vpack.c.bf16 %v4034_v6, %v4033_v16  ;;  %3909 = vadd.xlane.f32.xlu0 %v3637_v8  ;;  %v4054_v59 = vmul.f32 0.00390625, %v3784_v18  ;;  %v3625_v6 = vld [vmem:[#allocation2 + $0x320] sm:$0xff] }
 0x2e0   : > { %v3710_v7 = vpop.xlane.xlu0 %3709 }
 0x2e1   : > { %v4017_v28 = vmul.f32 0.00390625, %v3710_v7  ;;  %5391 = vmatprep.subr.bf16.mxu0 %v5390_v22  ;;  %3915 = vadd.xlane.f32.xlu1 %v3640_v20  ;;  %v3626_v22 = vld [vmem:[#allocation2 + $0x328] sm:$0xff] }
 0x2e2   : > { %v3752_v46 = vpop.xlane.xlu1 %3751 }
 0x2e3   : > { %v5392_v14 = vpack.c.bf16 %v4018_v38, %v4017_v28  ;;  %3877 = vadd.xlane.f32.xlu0 %v3621_v53  ;;  %v4038_v25 = vmul.f32 0.00390625, %v3752_v46  ;;  %v3673_v38 = vld [vmem:[#allocation2 + $0x4a0] sm:$0xff] }
 0x2e4   : > { %v3746_v19 = vpop.xlane.xlu0 %3745 }
 0x2e5   : > { %v4035_v55 = vmul.f32 0.00390625, %v3746_v19  ;;  %5393 = vmatpush3.bf16.msra.mxu0 %v5392_v14  ;;  %3883 = vadd.xlane.f32.xlu1 %v3624_v35  ;;  %v3674_v14 = vld [vmem:[#allocation2 + $0x4a8] sm:$0xff] }
 0x2e6   : > { %v3848_v60 = vpop.xlane.xlu1 %3847 }
 0x2e7   : > { %v5394_v61 = vpack.c.bf16 %v4036_v49, %v4035_v55  ;;  %3973 = vadd.xlane.f32.xlu0 %v3669_v12  ;;  %v4086_v43 = vmul.f32 0.00390625, %v3848_v60  ;;  %v3657_v49 = vld [vmem:[#allocation2 + $0x420] sm:$0xff] }
 0x2e8   : > { %v3714_v39 = vpop.xlane.xlu0 %3713 }
 0x2e9   : > { %v4019_v13 = vmul.f32 0.00390625, %v3714_v39  ;;  %5395 = vmatprep.subr.bf16.mxu0 %v5394_v61  ;;  %3979 = vadd.xlane.f32.xlu1 %v3672_v56  ;;  %v3658_v61 = vld [vmem:[#allocation2 + $0x428] sm:$0xff] }
 0x2ea   : > { %v3816_v29 = vpop.xlane.xlu1 %3815 }
 0x2eb   : > { %v5396_v44 = vpack.c.bf16 %v4020_v4, %v4019_v13  ;;  %3941 = vadd.xlane.f32.xlu0 %v3653_v0  ;;  %v4070_v57 = vmul.f32 0.00390625, %v3816_v29  ;;  %v3643_v4 = vld [vmem:[#allocation2 + $0x3b0] sm:$0xff] }
 0x2ec   : > { %v3782_v58 = vpop.xlane.xlu0 %3781 }
 0x2ed   : > { %v4053_v31 = vmul.f32 0.00390625, %v3782_v58  ;;  %5397 = vmatpush3.bf16.msra.mxu0 %v5396_v44  ;;  %3947 = vadd.xlane.f32.xlu1 %v3656_v23  ;;  %v3644_v44 = vld [vmem:[#allocation2 + $0x3b8] sm:$0xff] }
 0x2ee   : > { %v3788_v27 = vpop.xlane.xlu1 %3787 }
 0x2ef   : > { %3913 = vadd.xlane.f32.xlu0 %v3639_v1  ;;  %v5398_v34 = vpack.c.bf16 %v4054_v59, %v4053_v31  ;;  %v4056_v21 = vmul.f32 0.00390625, %v3788_v27  ;;  %v3627_v59 = vld [vmem:[#allocation2 + $0x330] sm:$0xff] }
 0x2f0   : > { %v3750_v48 = vpop.xlane.xlu0 %3749  ;;  %4251 = vmatmul.mubr.f32.vlgmr.msra.gmra.mrb[0].mxu0 %v7467_v47 }
 0x2f1   : > { %v4037_v37 = vmul.f32 0.00390625, %v3750_v48  ;;  %5399 = vmatprep.subr.bf16.mxu1 %v5398_v34  ;;  %4390 = vmatprep.mubr.f32.mxu0 %v4178_v30  ;;  %v3628_v34 = vld [vmem:[#allocation2 + $0x338] sm:$0xff] }
 0x2f2   : > { %3919 = vadd.xlane.f32.xlu1 %v3642_v33  ;;  %v3756_v16 = vpop.xlane.xlu1 %3755  ;;  %v3629_v33 = vld [vmem:[#allocation2 + $0x340] sm:$0xff] }
 0x2f3   : > { %3881 = vadd.xlane.f32.xlu0 %v3623_v62  ;;  %v5400_v45 = vpack.c.bf16 %v4038_v25, %v4037_v37  ;;  %v4040_v50 = vmul.f32 0.00390625, %v3756_v16  ;;  %v3675_v25 = vld [vmem:[#allocation2 + $0x4b0] sm:$0xff] }
 0x2f4   : > { %v3846_v5 = vpop.xlane.xlu0 %3845 }
 0x2f5   : > { %v4085_v47 = vmul.f32 0.00390625, %v3846_v5  ;;  %5401 = vmatpush3.bf16.msra.mxu1 %v5400_v45 }
 0x2f6   : > { %3887 = vadd.xlane.f32.xlu1 %v3626_v22  ;;  %v3852_v28 = vpop.xlane.xlu1 %3851  ;;  %v3677_v22 = vld [vmem:[#allocation2 + $0x4c0] sm:$0xff] }
 0x2f7   : > { %v5430_v2 = vpack.c.bf16 %v4086_v43, %v4085_v47  ;;  %3977 = vadd.xlane.f32.xlu0 %v3671_v3  ;;  %v4088_v11 = vmul.f32 0.00390625, %v3852_v28  ;;  %v3659_v47 = vld [vmem:[#allocation2 + $0x430] sm:$0xff]  ;;  %v3660_v43 = vld [vmem:[#allocation2 + $0x438] sm:$0xff] }
 0x2f8   : > { %v3814_v40 = vpop.xlane.xlu0 %3813 }
 0x2f9   : > { %v4069_v63 = vmul.f32 0.00390625, %v3814_v40  ;;  %5431 = vmatprep.subr.bf16.mxu0 %v5430_v2 }
 0x2fa   : > { %3983 = vadd.xlane.f32.xlu1 %v3674_v14  ;;  %v3820_v55 = vpop.xlane.xlu1 %3819  ;;  %v3661_v14 = vld [vmem:[#allocation2 + $0x440] sm:$0xff] }
 0x2fb   : > { %v5432_v9 = vpack.c.bf16 %v4070_v57, %v4069_v63  ;;  %3945 = vadd.xlane.f32.xlu0 %v3655_v17  ;;  %v4072_v42 = vmul.f32 0.00390625, %v3820_v55  ;;  %v3645_v63 = vld [vmem:[#allocation2 + $0x3c0] sm:$0xff]  ;;  %v3646_v57 = vld [vmem:[#allocation2 + $0x3c8] sm:$0xff] }
 0x2fc   : > { %v3786_v52 = vpop.xlane.xlu0 %3785 }
 0x2fd   : > { %v4055_v41 = vmul.f32 0.00390625, %v3786_v52  ;;  %5433 = vmatpush3.bf16.msra.mxu0 %v5432_v9 }
 0x2fe   : > { %3951 = vadd.xlane.f32.xlu1 %v3658_v61  ;;  %v3792_v13 = vpop.xlane.xlu1 %3791  ;;  %v3647_v61 = vld [vmem:[#allocation2 + $0x3d0] sm:$0xff] }
 0x2ff   : > { %v5402_v8 = vpack.c.bf16 %v4056_v21, %v4055_v41  ;;  %3917 = vadd.xlane.f32.xlu0 %v3641_v51  ;;  %v4058_v18 = vmul.f32 0.00390625, %v3792_v13  ;;  %v3630_v41 = vld [vmem:[#allocation2 + $0x348] sm:$0xff] }
 0x300   : > { %v3754_v10 = vpop.xlane.xlu0 %3753 }
 0x301   : > { %v4039_v7 = vmul.f32 0.00390625, %v3754_v10  ;;  %5403 = vmatprep.subr.bf16.mxu1 %v5402_v8 }
 0x302   : > { %3923 = vadd.xlane.f32.xlu1 %v3644_v44  ;;  %v3760_v31 = vpop.xlane.xlu1 %3759  ;;  %v3631_v44 = vld [vmem:[#allocation2 + $0x350] sm:$0xff] }
 0x303   : > { %v5404_v53 = vpack.c.bf16 %v4040_v50, %v4039_v7  ;;  %3885 = vadd.xlane.f32.xlu0 %v3625_v6  ;;  %v4042_v46 = vmul.f32 0.00390625, %v3760_v31  ;;  %v3678_v7 = vld [vmem:[#allocation2 + $0x4c8] sm:$0xff] }
 0x304   : > { %v3850_v36 = vpop.xlane.xlu0 %3849 }
 0x305   : > { %v4087_v19 = vmul.f32 0.00390625, %v3850_v36  ;;  %5405 = vmatpush3.bf16.msra.mxu1 %v5404_v53 }
 0x306   : > { %3891 = vadd.xlane.f32.xlu1 %v3628_v34  ;;  %v3856_v37 = vpop.xlane.xlu1 %3855  ;;  %v3679_v34 = vld [vmem:[#allocation2 + $0x4d0] sm:$0xff] }
 0x307   : > { %v5434_v12 = vpack.c.bf16 %v4088_v11, %v4087_v19  ;;  %3981 = vadd.xlane.f32.xlu0 %v3673_v38  ;;  %v4090_v5 = vmul.f32 0.00390625, %v3856_v37  ;;  %v3662_v19 = vld [vmem:[#allocation2 + $0x448] sm:$0xff] }
 0x308   : > { %v3818_v26 = vpop.xlane.xlu0 %3817 }
 0x309   : > { %v4071_v39 = vmul.f32 0.00390625, %v3818_v26  ;;  %5435 = vmatprep.subr.bf16.mxu0 %v5434_v12 }
 0x30a   : > { %3987 = vadd.xlane.f32.xlu1 %v3676_v32  ;;  %v3824_v56 = vpop.xlane.xlu1 %3823  ;;  %v3663_v32 = vld [vmem:[#allocation2 + $0x450] sm:$0xff] }
 0x30b   : > { %v5436_v0 = vpack.c.bf16 %v4072_v42, %v4071_v39  ;;  %3949 = vadd.xlane.f32.xlu0 %v3657_v49  ;;  %v4074_v40 = vmul.f32 0.00390625, %v3824_v56  ;;  %v3648_v39 = vld [vmem:[#allocation2 + $0x3d8] sm:$0xff] }
 0x30c   : > { %v3790_v15 = vpop.xlane.xlu0 %3789 }
 0x30d   : > { %v4057_v58 = vmul.f32 0.00390625, %v3790_v15  ;;  %5437 = vmatpush3.bf16.msra.mxu0 %v5436_v0 }
 0x30e   : > { %3955 = vadd.xlane.f32.xlu1 %v3660_v43  ;;  %v3796_v23 = vpop.xlane.xlu1 %3795  ;;  %v3649_v43 = vld [vmem:[#allocation2 + $0x3e0] sm:$0xff] }
 0x30f   : > { %v5406_v1 = vpack.c.bf16 %v4058_v18, %v4057_v58  ;;  %3921 = vadd.xlane.f32.xlu0 %v3643_v4  ;;  %v4060_v9 = vmul.f32 0.00390625, %v3796_v23  ;;  %v3632_v58 = vld [vmem:[#allocation2 + $0x358] sm:$0xff] }
 0x310   : > { %v3758_v20 = vpop.xlane.xlu0 %3757 }
 0x311   : > { %v4041_v48 = vmul.f32 0.00390625, %v3758_v20  ;;  %5407 = vmatprep.subr.bf16.mxu1 %v5406_v1 }
 0x312   : > { %3927 = vadd.xlane.f32.xlu1 %v3646_v57  ;;  %v3764_v51 = vpop.xlane.xlu1 %3763  ;;  %v3633_v57 = vld [vmem:[#allocation2 + $0x360] sm:$0xff] }
 0x313   : > { %v5408_v62 = vpack.c.bf16 %v4042_v46, %v4041_v48  ;;  %3889 = vadd.xlane.f32.xlu0 %v3627_v59  ;;  %v4044_v8 = vmul.f32 0.00390625, %v3764_v51  ;;  %v3680_v48 = vld [vmem:[#allocation2 + $0x4d8] sm:$0xff] }
 0x314   : > { %v3854_v35 = vpop.xlane.xlu0 %3853 }
 0x315   : > { %v4089_v45 = vmul.f32 0.00390625, %v3854_v35  ;;  %5409 = vmatpush3.bf16.msra.mxu1 %v5408_v62 }
 0x316   : > { %3895 = vadd.xlane.f32.xlu1 %v3630_v41  ;;  %v3860_v6 = vpop.xlane.xlu1 %3859  ;;  %v3681_v41 = vld [vmem:[#allocation2 + $0x4e0] sm:$0xff] }
 0x317   : > { %v5438_v60 = vpack.c.bf16 %v4090_v5, %v4089_v45  ;;  %3985 = vadd.xlane.f32.xlu0 %v3675_v25  ;;  %v4092_v53 = vmul.f32 0.00390625, %v3860_v6  ;;  %v3664_v45 = vld [vmem:[#allocation2 + $0x458] sm:$0xff] }
 0x318   : > { %v3822_v3 = vpop.xlane.xlu0 %3821 }
 0x319   : > { %v4073_v2 = vmul.f32 0.00390625, %v3822_v3  ;;  %5439 = vmatprep.subr.bf16.mxu0 %v5438_v60 }
 0x31a   : > { %3991 = vadd.xlane.f32.xlu1 %v3678_v7  ;;  %v3828_v38 = vpop.xlane.xlu1 %3827  ;;  %v3665_v7 = vld [vmem:[#allocation2 + $0x460] sm:$0xff] }
 0x31b   : > { %v5440_v29 = vpack.c.bf16 %v4074_v40, %v4073_v2  ;;  %3953 = vadd.xlane.f32.xlu0 %v3659_v47  ;;  %v4076_v12 = vmul.f32 0.00390625, %v3828_v38  ;;  %v3650_v2 = vld [vmem:[#allocation2 + $0x3e8] sm:$0xff] }
 0x31c   : > { %v3794_v17 = vpop.xlane.xlu0 %3793 }
 0x31d   : > { %v4059_v30 = vmul.f32 0.00390625, %v3794_v17  ;;  %5441 = vmatpush3.bf16.msra.mxu0 %v5440_v29 }
 0x31e   : > { %3959 = vadd.xlane.f32.xlu1 %v3662_v19  ;;  %v3800_v49 = vpop.xlane.xlu1 %3799  ;;  %v3651_v19 = vld [vmem:[#allocation2 + $0x3f0] sm:$0xff] }
 0x31f   : > { %v5410_v52 = vpack.c.bf16 %v4060_v9, %v4059_v30  ;;  %3925 = vadd.xlane.f32.xlu0 %v3645_v63  ;;  %v4062_v0 = vmul.f32 0.00390625, %v3800_v49  ;;  %v3634_v30 = vld [vmem:[#allocation2 + $0x368] sm:$0xff] }
 0x320   : > { %v3762_v27 = vpop.xlane.xlu0 %3761 }
 0x321   : > { %v4043_v21 = vmul.f32 0.00390625, %v3762_v27  ;;  %5411 = vmatprep.subr.bf16.mxu1 %v5410_v52 }
 0x322   : > { %3931 = vadd.xlane.f32.xlu1 %v3648_v39  ;;  %v3768_v4 = vpop.xlane.xlu1 %3767  ;;  %v3635_v39 = vld [vmem:[#allocation2 + $0x370] sm:$0xff] }
 0x323   : > { %v5412_v10 = vpack.c.bf16 %v4044_v8, %v4043_v21  ;;  %3893 = vadd.xlane.f32.xlu0 %v3629_v33  ;;  %v4046_v1 = vmul.f32 0.00390625, %v3768_v4  ;;  %v3682_v21 = vld [vmem:[#allocation2 + $0x4e8] sm:$0xff] }
 0x324   : > { %v3858_v16 = vpop.xlane.xlu0 %3857 }
 0x325   : > { %v4091_v50 = vmul.f32 0.00390625, %v3858_v16  ;;  %5413 = vmatpush3.bf16.msra.mxu1 %v5412_v10 }
 0x326   : > { %3899 = vadd.xlane.f32.xlu1 %v3632_v58  ;;  %v3864_v59 = vpop.xlane.xlu1 %3863  ;;  %v3683_v58 = vld [vmem:[#allocation2 + $0x4f0] sm:$0xff] }
 0x327   : > { %v5442_v36 = vpack.c.bf16 %v4092_v53, %v4091_v50  ;;  %3989 = vadd.xlane.f32.xlu0 %v3677_v22  ;;  %v4094_v62 = vmul.f32 0.00390625, %v3864_v59  ;;  %v3666_v50 = vld [vmem:[#allocation2 + $0x468] sm:$0xff] }
 0x328   : > { %v3826_v28 = vpop.xlane.xlu0 %3825 }
 0x329   : > { %v4075_v11 = vmul.f32 0.00390625, %v3826_v28  ;;  %5443 = vmatprep.subr.bf16.mxu0 %v5442_v36 }
 0x32a   : > { %3995 = vadd.xlane.f32.xlu1 %v3680_v48  ;;  %v3832_v25 = vpop.xlane.xlu1 %3831  ;;  %v3667_v48 = vld [vmem:[#allocation2 + $0x470] sm:$0xff] }
 0x32b   : > { %v5444_v26 = vpack.c.bf16 %v4076_v12, %v4075_v11  ;;  %3957 = vadd.xlane.f32.xlu0 %v3661_v14  ;;  %v4078_v60 = vmul.f32 0.00390625, %v3832_v25  ;;  %v3652_v11 = vld [vmem:[#allocation2 + $0x3f8] sm:$0xff] }
 0x32c   : > { %v3798_v55 = vpop.xlane.xlu0 %3797 }
 0x32d   : > { %v4061_v42 = vmul.f32 0.00390625, %v3798_v55  ;;  %5445 = vmatpush3.bf16.msra.mxu0 %v5444_v26 }
 0x32e   : > { %3963 = vadd.xlane.f32.xlu1 %v3664_v45  ;;  %v3804_v47 = vpop.xlane.xlu1 %3803 }
 0x32f   : > { %v5414_v15 = vpack.c.bf16 %v4062_v0, %v4061_v42  ;;  %3929 = vadd.xlane.f32.xlu0 %v3647_v61  ;;  %v4064_v29 = vmul.f32 0.00390625, %v3804_v47  ;;  %v3636_v42 = vld [vmem:[#allocation2 + $0x378] sm:$0xff] }
 0x330   : > { %v3766_v13 = vpop.xlane.xlu0 %3765 }
 0x331   : > { %v4045_v18 = vmul.f32 0.00390625, %v3766_v13  ;;  %5415 = vmatprep.subr.bf16.mxu1 %v5414_v15 }
 0x332   : > { %3935 = vadd.xlane.f32.xlu1 %v3650_v2  ;;  %v3772_v63 = vpop.xlane.xlu1 %3771 }
 0x333   : > { %v5416_v20 = vpack.c.bf16 %v4046_v1, %v4045_v18  ;;  %3897 = vadd.xlane.f32.xlu0 %v3631_v44  ;;  %v4048_v52 = vmul.f32 0.00390625, %v3772_v63  ;;  %v3684_v18 = vld [vmem:[#allocation2 + $0x4f8] sm:$0xff] }
 0x334   : > { %v3862_v31 = vpop.xlane.xlu0 %3861 }
 0x335   : > { %v4093_v46 = vmul.f32 0.00390625, %v3862_v31  ;;  %5417 = vmatpush3.bf16.msra.mxu1 %v5416_v20 }
 0x336   : > { %3903 = vadd.xlane.f32.xlu1 %v3634_v30  ;;  %v3868_v33 = vpop.xlane.xlu1 %3867 }
 0x337   : > { %v5446_v35 = vpack.c.bf16 %v4094_v62, %v4093_v46  ;;  %3993 = vadd.xlane.f32.xlu0 %v3679_v34  ;;  %v4096_v10 = vmul.f32 0.00390625, %v3868_v33  ;;  %v3668_v46 = vld [vmem:[#allocation2 + $0x478] sm:$0xff] }
 0x338   : > { %v3830_v37 = vpop.xlane.xlu0 %3829 }
 0x339   : > { %v4077_v5 = vmul.f32 0.00390625, %v3830_v37  ;;  %5447 = vmatprep.subr.bf16.mxu0 %v5446_v35 }
 0x33a   : > { %3999 = vadd.xlane.f32.xlu1 %v3682_v21  ;;  %v3836_v22 = vpop.xlane.xlu1 %3835 }
 0x33b   : > { %v5448_v3 = vpack.c.bf16 %v4078_v60, %v4077_v5  ;;  %3961 = vadd.xlane.f32.xlu0 %v3663_v32  ;;  %v4080_v36 = vmul.f32 0.00390625, %v3836_v22 }
 0x33c   : > { %v3802_v56 = vpop.xlane.xlu0 %3801 }
 0x33d   : > { %v4063_v40 = vmul.f32 0.00390625, %v3802_v56  ;;  %5449 = vmatpush3.bf16.msra.mxu0 %v5448_v3 }
 0x33e   : > { %3967 = vadd.xlane.f32.xlu1 %v3666_v50  ;;  %v3808_v14 = vpop.xlane.xlu1 %3807 }
 0x33f   : > { %v5418_v17 = vpack.c.bf16 %v4064_v29, %v4063_v40  ;;  %3933 = vadd.xlane.f32.xlu0 %v3649_v43  ;;  %v4066_v26 = vmul.f32 0.00390625, %v3808_v14 }
 0x340   : > { %v3770_v23 = vpop.xlane.xlu0 %3769 }
 0x341   : > { %v4047_v9 = vmul.f32 0.00390625, %v3770_v23  ;;  %5419 = vmatprep.subr.bf16.mxu1 %v5418_v17  ;;  %v7489_v17 = vld [vmem:[%s7526_s3 + $0x18] sm:$0x77] }
 0x342   : > { %3939 = vadd.xlane.f32.xlu1 %v3652_v11  ;;  %v3776_v61 = vpop.xlane.xlu1 %3775 }
 0x343   : > { %v5420_v27 = vpack.c.bf16 %v4048_v52, %v4047_v9  ;;  %3901 = vadd.xlane.f32.xlu0 %v3633_v57  ;;  %v4050_v15 = vmul.f32 0.00390625, %v3776_v61  ;;  %v4179_v57 = vcombine.high %v7489_v17, %v7489_v17 }
 0x344   : > { %v3866_v51 = vpop.xlane.xlu0 %3865 }
 0x345   : > { %v4095_v8 = vmul.f32 0.00390625, %v3866_v51  ;;  %5421 = vmatpush3.bf16.msra.mxu1 %v5420_v27 }
 0x346   : > { %3907 = vadd.xlane.f32.xlu1 %v3636_v42  ;;  %v3872_v44 = vpop.xlane.xlu1 %3871 }
 0x347   : > { %v5450_v16 = vpack.c.bf16 %v4096_v10, %v4095_v8  ;;  %3997 = vadd.xlane.f32.xlu0 %v3681_v41  ;;  %v4098_v20 = vmul.f32 0.00390625, %v3872_v44  ;;  %v7497_v8 = vld [vmem:[%s7526_s3 + $0x20] sm:$0x77] }
 0x348   : > { %v3834_v6 = vpop.xlane.xlu0 %3833 }
 0x349   : > { %v4079_v53 = vmul.f32 0.00390625, %v3834_v6  ;;  %5451 = vmatprep.subr.bf16.mxu0 %v5450_v16  ;;  %v4180_v6 = vcombine.high %v7497_v8, %v7497_v8 }
 0x34a   : > { %4003 = vadd.xlane.f32.xlu1 %v3684_v18  ;;  %v3840_v34 = vpop.xlane.xlu1 %3839 }
 0x34b   : > { %v5452_v28 = vpack.c.bf16 %v4080_v36, %v4079_v53  ;;  %3965 = vadd.xlane.f32.xlu0 %v3665_v7  ;;  %v4082_v35 = vmul.f32 0.00390625, %v3840_v34 }
 0x34c   : > { %v3806_v38 = vpop.xlane.xlu0 %3805 }
 0x34d   : > { %v4065_v12 = vmul.f32 0.00390625, %v3806_v38  ;;  %5453 = vmatpush3.bf16.msra.mxu0 %v5452_v28 }
 0x34e   : > { %3971 = vadd.xlane.f32.xlu1 %v3668_v46  ;;  %v3812_v32 = vpop.xlane.xlu1 %3811 }
 0x34f   : > { %v5422_v55 = vpack.c.bf16 %v4066_v26, %v4065_v12  ;;  %3937 = vadd.xlane.f32.xlu0 %v3651_v19  ;;  %v4068_v5 = vmul.f32 0.00390625, %v3812_v32 }
 0x350   : > { %v3774_v49 = vpop.xlane.xlu0 %3773 }
 0x351   : > { %v4049_v0 = vmul.f32 0.00390625, %v3774_v49  ;;  %5423 = vmatprep.subr.bf16.mxu1 %v5422_v55 }
 0x352   : > { %v3780_v56 = vpop.xlane.xlu1 %3779 }
 0x353   : > { %v5424_v13 = vpack.c.bf16 %v4050_v15, %v4049_v0  ;;  %3905 = vadd.xlane.f32.xlu0 %v3635_v39  ;;  %v4052_v43 = vmul.f32 0.00390625, %v3780_v56 }
 0x354   : > { %v3870_v4 = vpop.xlane.xlu0 %3869 }
 0x355   : > { %v4097_v1 = vmul.f32 0.00390625, %v3870_v4  ;;  %5425 = vmatpush3.bf16.msra.mxu1 %v5424_v13 }
 0x356   : > { %v3876_v29 = vpop.xlane.xlu1 %3875 }
 0x357   : > { %v5454_v31 = vpack.c.bf16 %v4098_v20, %v4097_v1  ;;  %4001 = vadd.xlane.f32.xlu0 %v3683_v58  ;;  %v4100_v63 = vmul.f32 0.00390625, %v3876_v29 }
 0x358   : > { %v3838_v59 = vpop.xlane.xlu0 %3837 }
 0x359   : > { %v4081_v62 = vmul.f32 0.00390625, %v3838_v59  ;;  %5455 = vmatprep.subr.bf16.mxu0 %v5454_v31 }
 0x35a   : > { %v3844_v52 = vpop.xlane.xlu1 %3843 }
 0x35b   : > { %v5456_v37 = vpack.c.bf16 %v4082_v35, %v4081_v62  ;;  %3969 = vadd.xlane.f32.xlu0 %v3667_v48  ;;  %v4084_v51 = vmul.f32 0.00390625, %v3844_v52 }
 0x35c   : > { %v3810_v25 = vpop.xlane.xlu0 %3809 }
 0x35d   : > { %v4067_v45 = vmul.f32 0.00390625, %v3810_v25  ;;  %5457 = vmatpush3.bf16.msra.mxu0 %v5456_v37 }
 0x35e   : > { %v3912_v21 = vpop.xlane.xlu1 %3911 }
 0x35f   : > { %v5426_v60 = vpack.c.bf16 %v4068_v5, %v4067_v45  ;;  %v4118_v16 = vmul.f32 0.00390625, %v3912_v21 }
 0x360   : > { %v3778_v3 = vpop.xlane.xlu0 %3777 }
 0x361   : > { %v4051_v47 = vmul.f32 0.00390625, %v3778_v3  ;;  %5427 = vmatprep.subr.bf16.mxu1 %v5426_v60 }
 0x362   : > { %v3880_v7 = vpop.xlane.xlu1 %3879 }
 0x363   : > { %v5428_v2 = vpack.c.bf16 %v4052_v43, %v4051_v47  ;;  %v4102_v53 = vmul.f32 0.00390625, %v3880_v7 }
 0x364   : > { %v3874_v40 = vpop.xlane.xlu0 %3873 }
 0x365   : > { %v4099_v23 = vmul.f32 0.00390625, %v3874_v40  ;;  %5429 = vmatpush3.bf16.msra.mxu1 %v5428_v2 }
 0x366   : > { %v3976_v38 = vpop.xlane.xlu1 %3975 }
 0x367   : > { %v5458_v30 = vpack.c.bf16 %v4100_v63, %v4099_v23  ;;  %v4150_v19 = vmul.f32 0.00390625, %v3976_v38 }
 0x368   : > { %v3842_v9 = vpop.xlane.xlu0 %3841  ;;  %4321 = vmatmul.mubr.f32.vlgmr.msra.gmra.mrb[0].mxu1 %v7475_v24 }
 0x369   : > { %v4083_v27 = vmul.f32 0.00390625, %v3842_v9  ;;  %5459 = vmatprep.subr.bf16.mxu0 %v5458_v30  ;;  %4460 = vmatprep.mubr.f32.mxu1 %v4179_v57 }
 0x36a   : > { %v3944_v26 = vpop.xlane.xlu1 %3943 }
 0x36b   : > { %v5460_v33 = vpack.c.bf16 %v4084_v51, %v4083_v27  ;;  %v4134_v49 = vmul.f32 0.00390625, %v3944_v26 }
 0x36c   : > { %v3910_v41 = vpop.xlane.xlu0 %3909 }
 0x36d   : > { %v4117_v10 = vmul.f32 0.00390625, %v3910_v41  ;;  %5461 = vmatpush3.bf16.msra.mxu0 %v5460_v33 }
 0x36e   : > { %v3916_v42 = vpop.xlane.xlu1 %3915 }
 0x36f   : > { %v5462_v22 = vpack.c.bf16 %v4118_v16, %v4117_v10  ;;  %v4120_v0 = vmul.f32 0.00390625, %v3916_v42 }
 0x370   : > { %v3878_v24 = vpop.xlane.xlu0 %3877  ;;  %4391 = vmatmul.mubr.f32.vlgmr.msra.gmra.mrb[2].mxu0 %v7482_v54 }
 0x371   : > { %v4101_v50 = vmul.f32 0.00390625, %v3878_v24  ;;  %5463 = vmatprep.subr.bf16.mxu1 %v5462_v22  ;;  %4530 = vmatprep.mubr.f32.mxu0 %v4180_v6 }
 0x372   : > { %v3884_v4 = vpop.xlane.xlu1 %3883 }
 0x373   : > { %v5464_v36 = vpack.c.bf16 %v4102_v53, %v4101_v50  ;;  %v4104_v58 = vmul.f32 0.00390625, %v3884_v4 }
 0x374   : > { %v3974_v28 = vpop.xlane.xlu0 %3973 }
 0x375   : > { %v4149_v14 = vmul.f32 0.00390625, %v3974_v28  ;;  %5465 = vmatpush3.bf16.msra.mxu1 %v5464_v36 }
 0x376   : > { %v3980_v20 = vpop.xlane.xlu1 %3979 }
 0x377   : > { %v5494_v11 = vpack.c.bf16 %v4150_v19, %v4149_v14  ;;  %v4152_v59 = vmul.f32 0.00390625, %v3980_v20 }
 0x378   : > { %v3942_v12 = vpop.xlane.xlu0 %3941 }
 0x379   : > { %v4133_v55 = vmul.f32 0.00390625, %v3942_v12  ;;  %5495 = vmatprep.subr.bf16.mxu0 %v5494_v11 }
 0x37a   : > { %v3948_v46 = vpop.xlane.xlu1 %3947 }
 0x37b   : > { %v5496_v61 = vpack.c.bf16 %v4134_v49, %v4133_v55  ;;  %v4136_v35 = vmul.f32 0.00390625, %v3948_v46 }
 0x37c   : > { %v3914_v39 = vpop.xlane.xlu0 %3913 }
 0x37d   : > { %v4119_v54 = vmul.f32 0.00390625, %v3914_v39  ;;  %5497 = vmatpush3.bf16.msra.mxu0 %v5496_v61 }
 0x37f   : > { %v5466_v15 = vpack.c.bf16 %v4120_v0, %v4119_v54  ;;  %v3920_v32 = vpop.xlane.xlu1 %3919 }
 0x380   : > { %v3882_v13 = vpop.xlane.xlu0 %3881  ;;  %v4122_v5 = vmul.f32 0.00390625, %v3920_v32 }
 0x381   : > { %v4103_v44 = vmul.f32 0.00390625, %v3882_v13  ;;  %5467 = vmatprep.subr.bf16.mxu1 %v5466_v15 }
 0x383   : > { %v5468_v18 = vpack.c.bf16 %v4104_v58, %v4103_v44  ;;  %v3888_v56 = vpop.xlane.xlu1 %3887 }
 0x384   : > { %v3978_v1 = vpop.xlane.xlu0 %3977  ;;  %v4106_v43 = vmul.f32 0.00390625, %v3888_v56 }
 0x385   : > { %v4151_v31 = vmul.f32 0.00390625, %v3978_v1  ;;  %5469 = vmatpush3.bf16.msra.mxu1 %v5468_v18 }
 0x387   : > { %v5498_v34 = vpack.c.bf16 %v4152_v59, %v4151_v31  ;;  %v3984_v29 = vpop.xlane.xlu1 %3983 }
 0x388   : > { %v3946_v48 = vpop.xlane.xlu0 %3945  ;;  %v4154_v63 = vmul.f32 0.00390625, %v3984_v29 }
 0x389   : > { %v4135_v62 = vmul.f32 0.00390625, %v3946_v48  ;;  %5499 = vmatprep.subr.bf16.mxu0 %v5498_v34 }
 0x38b   : > { %v5500_v37 = vpack.c.bf16 %v4136_v35, %v4135_v62  ;;  %v3952_v9 = vpop.xlane.xlu1 %3951 }
 0x38c   : > { %v3918_v25 = vpop.xlane.xlu0 %3917  ;;  %v4138_v27 = vmul.f32 0.00390625, %v3952_v9 }
 0x38d   : > { %v4121_v45 = vmul.f32 0.00390625, %v3918_v25  ;;  %5501 = vmatpush3.bf16.msra.mxu0 %v5500_v37 }
 0x38f   : > { %v5470_v60 = vpack.c.bf16 %v4122_v5, %v4121_v45  ;;  %v3924_v41 = vpop.xlane.xlu1 %3923 }
 0x390   : > { %v3886_v3 = vpop.xlane.xlu0 %3885  ;;  %v4124_v10 = vmul.f32 0.00390625, %v3924_v41 }
 0x391   : > { %v4105_v47 = vmul.f32 0.00390625, %v3886_v3  ;;  %5471 = vmatprep.subr.bf16.mxu1 %v5470_v60 }
 0x393   : > { %v5472_v2 = vpack.c.bf16 %v4106_v43, %v4105_v47  ;;  %v3892_v22 = vpop.xlane.xlu1 %3891 }
 0x394   : > { %v3982_v40 = vpop.xlane.xlu0 %3981  ;;  %v4108_v7 = vmul.f32 0.00390625, %v3892_v22 }
 0x395   : > { %v4153_v23 = vmul.f32 0.00390625, %v3982_v40  ;;  %5473 = vmatpush3.bf16.msra.mxu1 %v5472_v2 }
 0x397   : > { %v5502_v57 = vpack.c.bf16 %v4154_v63, %v4153_v23  ;;  %v3988_v36 = vpop.xlane.xlu1 %3987 }
 0x398   : > { %v3950_v30 = vpop.xlane.xlu0 %3949  ;;  %v4156_v38 = vmul.f32 0.00390625, %v3988_v36 }
 0x399   : > { %v4137_v52 = vmul.f32 0.00390625, %v3950_v30  ;;  %5503 = vmatprep.subr.bf16.mxu0 %v5502_v57 }
 0x39b   : > { %v5504_v51 = vpack.c.bf16 %v4138_v27, %v4137_v52  ;;  %v3956_v11 = vpop.xlane.xlu1 %3955 }
 0x39c   : > { %v3922_v33 = vpop.xlane.xlu0 %3921  ;;  %v4140_v26 = vmul.f32 0.00390625, %v3956_v11 }
 0x39d   : > { %v4123_v21 = vmul.f32 0.00390625, %v3922_v33  ;;  %5505 = vmatpush3.bf16.msra.mxu0 %v5504_v51 }
 0x39f   : > { %v5474_v16 = vpack.c.bf16 %v4124_v10, %v4123_v21  ;;  %v3928_v61 = vpop.xlane.xlu1 %3927 }
 0x3a0   : > { %v3890_v6 = vpop.xlane.xlu0 %3889  ;;  %v4126_v42 = vmul.f32 0.00390625, %v3928_v61 }
 0x3a1   : > { %v4107_v24 = vmul.f32 0.00390625, %v3890_v6  ;;  %5475 = vmatprep.subr.bf16.mxu1 %v5474_v16 }
 0x3a3   : > { %v5476_v50 = vpack.c.bf16 %v4108_v7, %v4107_v24  ;;  %v3896_v15 = vpop.xlane.xlu1 %3895 }
 0x3a4   : > { %v3986_v53 = vpop.xlane.xlu0 %3985  ;;  %v4110_v4 = vmul.f32 0.00390625, %v3896_v15 }
 0x3a5   : > { %v4155_v28 = vmul.f32 0.00390625, %v3986_v53  ;;  %5477 = vmatpush3.bf16.msra.mxu1 %v5476_v50 }
 0x3a7   : > { %v5506_v14 = vpack.c.bf16 %v4156_v38, %v4155_v28  ;;  %v3992_v18 = vpop.xlane.xlu1 %3991 }
 0x3a8   : > { %v3954_v19 = vpop.xlane.xlu0 %3953  ;;  %v4158_v20 = vmul.f32 0.00390625, %v3992_v18 }
 0x3a9   : > { %v4139_v12 = vmul.f32 0.00390625, %v3954_v19  ;;  %5507 = vmatprep.subr.bf16.mxu0 %v5506_v14 }
 0x3ab   : > { %v5508_v55 = vpack.c.bf16 %v4140_v26, %v4139_v12  ;;  %v3960_v34 = vpop.xlane.xlu1 %3959 }
 0x3ac   : > { %v3926_v49 = vpop.xlane.xlu0 %3925  ;;  %v4142_v46 = vmul.f32 0.00390625, %v3960_v34 }
 0x3ad   : > { %v4125_v39 = vmul.f32 0.00390625, %v3926_v49  ;;  %5509 = vmatpush3.bf16.msra.mxu0 %v5508_v55 }
 0x3af   : > { %v5478_v54 = vpack.c.bf16 %v4126_v42, %v4125_v39  ;;  %v3932_v37 = vpop.xlane.xlu1 %3931 }
 0x3b0   : > { %v3894_v0 = vpop.xlane.xlu0 %3893  ;;  %v4128_v32 = vmul.f32 0.00390625, %v3932_v37  ;;  %v4170_v37 = vld [vmem:[%s7527_s4] sm:$0x7] }
 0x3b1   : > { %v4109_v13 = vmul.f32 0.00390625, %v3894_v0  ;;  %5479 = vmatprep.subr.bf16.mxu1 %v5478_v54 }
 0x3b3   : > { %v5480_v44 = vpack.c.bf16 %v4110_v4, %v4109_v13  ;;  %v3900_v60 = vpop.xlane.xlu1 %3899 }
 0x3b4   : > { %v3990_v58 = vpop.xlane.xlu0 %3989  ;;  %v4112_v56 = vmul.f32 0.00390625, %v3900_v60 }
 0x3b5   : > { %v4157_v1 = vmul.f32 0.00390625, %v3990_v58  ;;  %5481 = vmatpush3.bf16.msra.mxu1 %v5480_v44 }
 0x3b7   : > { %v5510_v31 = vpack.c.bf16 %v4158_v20, %v4157_v1  ;;  %v3996_v40 = vpop.xlane.xlu1 %3995 }
 0x3b8   : > { %v3958_v59 = vpop.xlane.xlu0 %3957  ;;  %v4160_v23 = vmul.f32 0.00390625, %v3996_v40 }
 0x3b9   : > { %v4141_v48 = vmul.f32 0.00390625, %v3958_v59  ;;  %5511 = vmatprep.subr.bf16.mxu0 %v5510_v31 }
 0x3bb   : > { %v5512_v62 = vpack.c.bf16 %v4142_v46, %v4141_v48  ;;  %v3964_v52 = vpop.xlane.xlu1 %3963 }
 0x3bc   : > { %v3930_v35 = vpop.xlane.xlu0 %3929  ;;  %v4144_v51 = vmul.f32 0.00390625, %v3964_v52 }
 0x3bd   : > { %v4127_v25 = vmul.f32 0.00390625, %v3930_v35  ;;  %5513 = vmatpush3.bf16.msra.mxu0 %v5512_v62 }
 0x3bf   : > { %v5482_v45 = vpack.c.bf16 %v4128_v32, %v4127_v25  ;;  %v3936_v21 = vpop.xlane.xlu1 %3935 }
 0x3c0   : > { %v3898_v5 = vpop.xlane.xlu0 %3897  ;;  %v4130_v16 = vmul.f32 0.00390625, %v3936_v21 }
 0x3c1   : > { %v4111_v3 = vmul.f32 0.00390625, %v3898_v5  ;;  %5483 = vmatprep.subr.bf16.mxu1 %v5482_v45 }
 0x3c3   : > { %v5484_v47 = vpack.c.bf16 %v4112_v56, %v4111_v3  ;;  %v4981_v43 = vpop.f32.mrb[0].mxu0  ;;  %v3904_v24 = vpop.xlane.xlu1 %3903 }
 0x3c4   : > { %v3994_v2 = vpop.xlane.xlu0 %3993  ;;  %v4982_v63 = vpop.f32.mrb[1].mxu0  ;;  %v4114_v50 = vmul.f32 0.00390625, %v3904_v24 }
 0x3c5   : > { %v4159_v29 = vmul.f32 0.00390625, %v3994_v2  ;;  %5485 = vmatpush3.bf16.msra.mxu1 %v5484_v47  ;;  %v4983_v57 = vadd.f32 %v4982_v63, %v4981_v43 }
 0x3c7   : > { %v5514_v30 = vpack.c.bf16 %v4160_v23, %v4159_v29  ;;  %v4000_v28 = vpop.xlane.xlu1 %3999  ;;  %v4253_v25 = vadd.f32 %v4983_v57, %v4170_v37 }
 0x3c8   : > { %v3962_v9 = vpop.xlane.xlu0 %3961  ;;  %v4162_v14 = vmul.f32 0.00390625, %v4000_v28 }
 0x3c9   : > { %v4143_v27 = vmul.f32 0.00390625, %v3962_v9  ;;  %5515 = vmatprep.subr.bf16.mxu0 %v5514_v30 }
 0x3cb   : > { %v5516_v33 = vpack.c.bf16 %v4144_v51, %v4143_v27  ;;  %v3968_v12 = vpop.xlane.xlu1 %3967 }
 0x3cc   : > { %v3934_v41 = vpop.xlane.xlu0 %3933  ;;  %v4146_v55 = vmul.f32 0.00390625, %v3968_v12 }
 0x3cd   : > { %v4129_v10 = vmul.f32 0.00390625, %v3934_v41  ;;  %5517 = vmatpush3.bf16.msra.mxu0 %v5516_v33 }
 0x3cf   : > { %v5486_v6 = vpack.c.bf16 %v4130_v16, %v4129_v10  ;;  %v3940_v39 = vpop.xlane.xlu1 %3939 }
 0x3d0   : > { %v3902_v22 = vpop.xlane.xlu0 %3901  ;;  %v4132_v54 = vmul.f32 0.00390625, %v3940_v39 }
 0x3d1   : > { %v4113_v7 = vmul.f32 0.00390625, %v3902_v22  ;;  %5487 = vmatprep.subr.bf16.mxu1 %v5486_v6 }
 0x3d3   : > { %v5488_v53 = vpack.c.bf16 %v4114_v50, %v4113_v7  ;;  %v3908_v13 = vpop.xlane.xlu1 %3907 }
 0x3d4   : > { %v3998_v36 = vpop.xlane.xlu0 %3997  ;;  %v4116_v44 = vmul.f32 0.00390625, %v3908_v13 }
 0x3d5   : > { %v4161_v38 = vmul.f32 0.00390625, %v3998_v36  ;;  %5489 = vmatpush3.bf16.msra.mxu1 %v5488_v53 }
 0x3d7   : > { %v5518_v19 = vpack.c.bf16 %v4162_v14, %v4161_v38  ;;  %v4004_v1 = vpop.xlane.xlu1 %4003 }
 0x3d8   : > { %v3966_v11 = vpop.xlane.xlu0 %3965  ;;  %v4164_v31 = vmul.f32 0.00390625, %v4004_v1 }
 0x3d9   : > { %v4145_v26 = vmul.f32 0.00390625, %v3966_v11  ;;  %5519 = vmatprep.subr.bf16.mxu0 %v5518_v19 }
 0x3db   : > { %v5520_v49 = vpack.c.bf16 %v4146_v55, %v4145_v26  ;;  %v3972_v48 = vpop.xlane.xlu1 %3971 }
 0x3dc   : > { %v3938_v61 = vpop.xlane.xlu0 %3937  ;;  %v4148_v62 = vmul.f32 0.00390625, %v3972_v48 }
 0x3dd   : > { %v4131_v42 = vmul.f32 0.00390625, %v3938_v61  ;;  %5521 = vmatpush3.bf16.msra.mxu0 %v5520_v49 }
 0x3df   : > { %v5490_v0 = vpack.c.bf16 %v4132_v54, %v4131_v42 }
 0x3e0   : > { %v3906_v15 = vpop.xlane.xlu0 %3905 }
 0x3e1   : > { %v4115_v4 = vmul.f32 0.00390625, %v3906_v15  ;;  %5491 = vmatprep.subr.bf16.mxu1 %v5490_v0 }
 0x3e3   : > { %v5492_v58 = vpack.c.bf16 %v4116_v44, %v4115_v4 }
 0x3e4   : > { %v4002_v18 = vpop.xlane.xlu0 %4001 }
 0x3e5   : > { %v4163_v20 = vmul.f32 0.00390625, %v4002_v18  ;;  %5493 = vmatpush3.bf16.msra.mxu1 %v5492_v58 }
 0x3e7   : > { %v5522_v59 = vpack.c.bf16 %v4164_v31, %v4163_v20 }
 0x3e8   : > { %v3970_v34 = vpop.xlane.xlu0 %3969  ;;  %4461 = vmatmul.mubr.f32.vlgmr.msra.gmra.mrb[2].mxu1 %v7489_v17 }
 0x3e9   : > { %v4147_v46 = vmul.f32 0.00390625, %v3970_v34  ;;  %5523 = vmatprep.subr.bf16.mxu0 %v5522_v59 }
 0x3eb   : > { %v5524_v35 = vpack.c.bf16 %v4148_v62, %v4147_v46 }
 0x3ed   : > { %5525 = vmatpush3.bf16.msra.mxu0 %v5524_v35 }
 0x3f0   : > { %4531 = vmatmul.mubr.f32.vlgmr.msra.gmra.mrb[4].mxu0 %v7497_v8 }
 0x43b   : > { %v5016_v32 = vpop.f32.mrb[0].mxu1 }
 0x43c   : > { %v5017_v45 = vpop.f32.mrb[1].mxu1 }
 0x43d   : > { %v5018_v5 = vadd.f32 %v5017_v45, %v5016_v32 }
 0x43f   : > { %v4323_v60 = vadd.f32 %v5018_v5, %v4253_v25 }
 0x443   : > { %v5051_v3 = vpop.f32.mrb[2].mxu0 }
 0x444   : > { %v5052_v56 = vpop.f32.mrb[3].mxu0 }
 0x445   : > { %v5053_v17 = vadd.f32 %v5052_v56, %v5051_v3 }
 0x447   : > { %v4393_v47 = vadd.f32 %v5053_v17, %v4323_v60 }
 0x4bb   : > { %v5086_v43 = vpop.f32.mrb[2].mxu1 }
 0x4bc   : > { %v5087_v2 = vpop.f32.mrb[3].mxu1 }
 0x4bd   : > { %v5088_v40 = vadd.f32 %v5087_v2, %v5086_v43 }
 0x4bf   : > { %v4463_v29 = vadd.f32 %v5088_v40, %v4393_v47 }
 0x4c3   : > { %v5121_v23 = vpop.f32.mrb[4].mxu0 }
 0x4c4   : > { %v5122_v8 = vpop.f32.mrb[5].mxu0 }
 0x4c5   : > { %v5123_v63 = vadd.f32 %v5122_v8, %v5121_v23 }
 0x4c7   : > { %v4533_v30 = vadd.f32 %v5123_v63, %v4463_v29 }
 0x4c9   : > { %v4785_v9 = vmul.f32 -1.442695, %v4533_v30 }
 0x4cb   : > { %5577 = vpow2.f32 %v4785_v9 }
 0x4d5   : > { %v5578_v57 = vpop.eup %5577 }
 0x4d6   : > { %v4539_v52 = vadd.f32 1.0, %v5578_v57 }
 0x4d8   : > { %5579 = vrcp.f32 %v4539_v52 }
 0x4e2   : > { %v5580_v27 = vpop.eup %5579 }
 0x4e3   : > { %4543 = vst.msk [vmem:[%s5690_s6] sm:$0x7] %vm4542_vm2, %v5580_v27 }
 0x4e4 PF: > { %s15_s22 = sadd.s32 1, %s5619_s22   ;;  %s7589_s18 = smov %s5611_s20 }
 0x4e5   : > { %p12_p9 = scmp.ge.s32.totalorder %s15_s22, 6   ;;  %s7590_s19 = smov %s5615_s21 }
 0x4e6   : > { %s7591_s20 = smov %s7594_s23  ;;  %s7592_s21 = smov %s7598_s24 }
 0x4e7   :  { %14 = sbr.rel (!%p12_p9) target bundleno = 3 (0x3), region = 78 }

</bundles_post_ra>
